<compile_context>
chip_gen: v6e
topology: v6e:2x2x1
jax: 0.10.0
libtpu: 0.0.40
codegen_flags: <defaults>
</compile_context>

<pallas_src>
import math
from functools import partial

import jax
import jax.numpy as jnp
from jax import lax
from jax.experimental import pallas as pl
from jax.experimental.pallas import tpu as pltpu

CPAD = 16  # channel padding used only inside the packed weight/bias operands

# Small VGG-like encoder (conv/relu/maxpool descriptors) that the Decoder mirrors.
BASE_MODEL = [
    ("conv", 3, 8), ("relu",), ("conv", 8, 8), ("relu",), ("maxpool",),
    ("conv", 8, 16), ("relu",), ("maxpool",), ("conv", 16, 16), ("relu",),
]


def build_decoder_layers(base_model):
    """('scaleup',) or ('conv', Cin, Cout, relu) descriptors, mirroring Decoder.__init__."""
    layers = []
    for layer in reversed(base_model):
        if layer[0] == "maxpool":
            layers.append(("scaleup",))
        elif layer[0] == "conv":
            cin_base, cout_base = layer[1], layer[2]
            # reversed conv: Conv2d(out_channels, in_channels, 3) preceded by refl-pad, then ReLU
            layers.append(("conv", cout_base, cin_base, True))
    # reverse_model = reverse_model[:-1]  -> drop the final ReLU
    if layers and layers[-1][0] == "conv":
        c = layers[-1]
        layers[-1] = ("conv", c[1], c[2], False)
    return layers


def init_decoder_params(layers, key):
    """Xavier-uniform OIHW weights + zero bias for each conv layer, in layer order."""
    conv_params = []
    for layer in layers:
        if layer[0] != "conv":
            continue
        _, cin, cout, _ = layer
        key, sub = jax.random.split(key)
        fan_in, fan_out = cin * 9, cout * 9
        bound = math.sqrt(6.0 / (fan_in + fan_out))
        w_oihw = jax.random.uniform(sub, (cout, cin, 3, 3), jnp.float32,
                                    minval=-bound, maxval=bound)
        b = jnp.zeros((cout,), jnp.float32)
        conv_params.append((w_oihw, b))
    return conv_params


def make_fused_plan(layers, H0, W0, C0):
    """Fuse each nearest-x2 ScaleUp into the conv that follows it.

    Returns [(cin, cout, h_in, w_in, upsample, relu), ...] and the final (H, W, C).
    """
    plan = []
    H, W, C = H0, W0, C0
    i = 0
    while i < len(layers):
        if layers[i][0] == "scaleup":
            assert i + 1 < len(layers) and layers[i + 1][0] == "conv", \
                "every ScaleUp must be followed by a conv to fuse into"
            _, cin, cout, relu = layers[i + 1]
            assert cin == C, (cin, C)
            plan.append((cin, cout, H, W, True, relu))
            H, W, C = 2 * H, 2 * W, cout
            i += 2
        else:
            _, cin, cout, relu = layers[i]
            assert cin == C, (cin, C)
            plan.append((cin, cout, H, W, False, relu))
            C = cout
            i += 1
    return plan, (H, W, C)


def _tap_gather_matrices(h_in, w_in, upsample):
    """(9, S_in, S_out) exact 0/1 bf16 matrices.

    x(C, S_in) @ G_tap gives, for every output pixel, the source pixel of
    [optional nearest-x2 upsample] + ReflectionPad2d(1) at 3x3 tap (kh, kw), flattened (C, S_out).
    """
    h_out = 2 * h_in if upsample else h_in
    w_out = 2 * w_in if upsample else w_in
    s_in, s_out = h_in * w_in, h_out * w_out
    oi = jnp.arange(s_out)
    ho, wo = oi // w_out, oi % w_out
    rows = jnp.arange(s_in)[:, None]
    mats = []
    for kh in range(3):
        for kw in range(3):
            hp = ho + kh - 1
            wp = wo + kw - 1
            # reflect (pad=1) on the (possibly upsampled) grid
            hr = jnp.where(hp < 0, -hp, jnp.where(hp >= h_out, 2 * h_out - 2 - hp, hp))
            wr = jnp.where(wp < 0, -wp, jnp.where(wp >= w_out, 2 * w_out - 2 - wp, wp))
            if upsample:                       # nearest x2: source = floor(index / 2)
                hr, wr = hr // 2, wr // 2
            src = hr * w_in + wr
            mats.append((rows == src[None, :]).astype(jnp.bfloat16))
    return jnp.stack(mats)                     # (9, s_in, s_out)


# ----------------------------------------------------------------------------
# Fused Pallas kernel: the entire decoder for one batch element per grid step.
# ----------------------------------------------------------------------------
def _decoder_kernel(x_ref, *refs, plan):
    n_stage = len(plan)
    g_refs = refs[:n_stage]
    w_ref = refs[n_stage]         # (n_stage, 9, 16, 16) bf16, zero-padded per-tap weights
    b_ref = refs[n_stage + 1]     # (n_stage, 16, 1)     f32, zero-padded biases
    o_ref = refs[n_stage + 2]     # (1, Cf, Hf*Wf)       f32

    x = x_ref[0]                  # (C, H*W) bf16 — channels on sublanes, flat spatial on lanes
    acc = None
    for si, (cin, cout, _h_in, _w_in, _upsample, relu) in enumerate(plan):
        g_ref = g_refs[si]
        s_out = g_ref.shape[-1]
        acc = jnp.zeros((cout, s_out), jnp.float32)
        for tap in range(9):
            # pad/upsample/tap-shift as an exact 0/1 gather matmul (no in-kernel slicing of x)
            p = jnp.dot(x, g_ref[tap], preferred_element_type=jnp.float32)   # (cin, s_out)
            w_tap = w_ref[si, tap][:cout, :cin]                              # (cout, cin) bf16
            acc = acc + jnp.dot(w_tap, p.astype(jnp.bfloat16),
                                preferred_element_type=jnp.float32)
        acc = acc + b_ref[si][:cout, :]          # bias + ReLU in f32
        if relu:
            acc = jnp.maximum(acc, 0.0)
        x = acc.astype(jnp.bfloat16)             # bf16 inter-stage activation
    o_ref[0] = acc                               # lane-dense (Cf, Hf*Wf) f32 store


def decoder_forward_pallas(x_nchw, layers, conv_params):
    N, C0, H0, W0 = x_nchw.shape
    plan, (Hf, Wf, Cf) = make_fused_plan(layers, H0, W0, C0)
    assert len(plan) == len(conv_params)
    S0, Sf = H0 * W0, Hf * Wf

    # NCHW -> (N, C, H*W): free reshape, no transpose, halves input DMA via bf16.
    x = x_nchw.reshape(N, C0, S0).astype(jnp.bfloat16)

    g_ops, w_list, b_list = [], [], []
    for (cin, cout, h_in, w_in, upsample, _relu), (w_oihw, b) in zip(plan, conv_params):
        g_ops.append(_tap_gather_matrices(h_in, w_in, upsample))             # (9, s_in, s_out)
        w_taps = jnp.transpose(w_oihw, (2, 3, 0, 1)).reshape(9, cout, cin)   # tap-major
        w_list.append(jnp.pad(w_taps, ((0, 0), (0, CPAD - cout), (0, CPAD - cin))))
        b_list.append(jnp.pad(b, (0, CPAD - cout)).reshape(CPAD, 1))
    w_all = jnp.stack(w_list).astype(jnp.bfloat16)       # (n_stage, 9, 16, 16)
    b_all = jnp.stack(b_list).astype(jnp.float32)        # (n_stage, 16, 1)

    in_specs = [pl.BlockSpec((1, C0, S0), lambda n: (n, 0, 0))]
    for g in g_ops:
        in_specs.append(pl.BlockSpec(g.shape, lambda n: (0, 0, 0)))
    in_specs.append(pl.BlockSpec(w_all.shape, lambda n: (0, 0, 0, 0)))
    in_specs.append(pl.BlockSpec(b_all.shape, lambda n: (0, 0, 0)))

    kernel = partial(_decoder_kernel, plan=tuple(plan))
    out = pl.pallas_call(
        kernel,
        out_shape=jax.ShapeDtypeStruct((N, Cf, Sf), jnp.float32),
        grid=(N,),
        in_specs=in_specs,
        out_specs=pl.BlockSpec((1, Cf, Sf), lambda n: (n, 0, 0)),
        compiler_params=pltpu.CompilerParams(dimension_semantics=("parallel",)),
    )(x, *g_ops, w_all, b_all)

    return out.reshape(N, Cf, Hf, Wf)            # (N, 3, 16, 16), free reshape (no transpose)


# ----------------------------------------------------------------------------
# Reference (lax.conv) with matching precision (bf16 operands, f32 accumulation).
# ----------------------------------------------------------------------------
def decoder_forward_ref(x_nchw, layers, conv_params):
    x = jnp.transpose(x_nchw, (0, 2, 3, 1))      # NHWC
    ci = 0
    for layer in layers:
        if layer[0] == "scaleup":
            x = jnp.repeat(jnp.repeat(x, 2, axis=1), 2, axis=2)
        else:
            _, _, _, relu = layer
            w_oihw, b = conv_params[ci]
            ci += 1
            w_hwio = jnp.transpose(w_oihw, (2, 3, 1, 0))
            xp = jnp.pad(x.astype(jnp.bfloat16), ((0, 0), (1, 1), (1, 1), (0, 0)),
                         mode="reflect")
            y = lax.conv_general_dilated(
                xp, w_hwio.astype(jnp.bfloat16),
                window_strides=(1, 1), padding="VALID",
                dimension_numbers=("NHWC", "HWIO", "NHWC"),
                preferred_element_type=jnp.float32)
            y = y + b[None, None, None, :]
            if relu:
                y = jnp.maximum(y, 0.0)
            x = y
    return jnp.transpose(x, (0, 3, 1, 2))


if __name__ == "__main__":
    key = jax.random.PRNGKey(0)
    k_x, k_w = jax.random.split(key)

    layers = build_decoder_layers(BASE_MODEL)
    conv_params = init_decoder_params(layers, k_w)

    # Decoder input = truncated-VGG encoder output: 16 channels at 4x4 (16x16 image, 2 maxpools).
    x = jax.random.normal(k_x, (2, 16, 4, 4), jnp.float32)   # NCHW

    out = decoder_forward_pallas(x, layers, conv_params)
    out = jax.block_until_ready(out)

    ref = decoder_forward_ref(x, layers, conv_params)
    assert out.shape == (2, 3, 16, 16), out.shape
    max_err = float(jnp.max(jnp.abs(out - ref)))
    assert jnp.allclose(out, ref, atol=5e-3, rtol=5e-3), max_err
    print("KERNEL_OK")
</pallas_src>

<mosaic_0001>
module attributes {stable_mosaic.version = 11 : i64} {
  func.func @_decoder_kernel(%arg0: i32, %arg1: memref<1x16x16xbf16, #tpu.memory_space<vmem>>, %arg2: memref<9x16x16xbf16, #tpu.memory_space<vmem>>, %arg3: memref<9x16x64xbf16, #tpu.memory_space<vmem>>, %arg4: memref<9x64x256xbf16, #tpu.memory_space<vmem>>, %arg5: memref<9x256x256xbf16, #tpu.memory_space<vmem>>, %arg6: memref<4x9x16x16xbf16, #tpu.memory_space<vmem>>, %arg7: memref<4x16x1xf32, #tpu.memory_space<vmem>>, %arg8: memref<1x3x256xf32, #tpu.memory_space<vmem>>) attributes {dimension_semantics = [#tpu.dimension_semantics<parallel>], iteration_bounds = array<i64: 2>, scalar_prefetch = 0 : i64, scratch_operands = 0 : i64, tpu.core_type = #tpu.core_type<tc>, window_params = [{transform_indices = @transform_0, window_bounds = array<i64: 1, 16, 16>}, {pipeline_mode = #tpu.pipeline_mode<synchronous>, transform_indices = @transform_1, window_bounds = array<i64: 9, 16, 16>}, {pipeline_mode = #tpu.pipeline_mode<synchronous>, transform_indices = @transform_2, window_bounds = array<i64: 9, 16, 64>}, {pipeline_mode = #tpu.pipeline_mode<synchronous>, transform_indices = @transform_3, window_bounds = array<i64: 9, 64, 256>}, {pipeline_mode = #tpu.pipeline_mode<synchronous>, transform_indices = @transform_4, window_bounds = array<i64: 9, 256, 256>}, {pipeline_mode = #tpu.pipeline_mode<synchronous>, transform_indices = @transform_5, window_bounds = array<i64: 4, 9, 16, 16>}, {pipeline_mode = #tpu.pipeline_mode<synchronous>, transform_indices = @transform_6, window_bounds = array<i64: 4, 16, 1>}, {transform_indices = @transform_7, window_bounds = array<i64: 1, 3, 256>}]} {
    %c0 = arith.constant 0 : index
    %c0_0 = arith.constant 0 : index
    %c0_1 = arith.constant 0 : index
    %0 = vector.load %arg1[%c0, %c0_0, %c0_1] : memref<1x16x16xbf16, #tpu.memory_space<vmem>>, vector<1x16x16xbf16>
    %1 = vector.shape_cast %0 : vector<1x16x16xbf16> to vector<16x16xbf16>
    %cst = arith.constant 0.000000e+00 : f32
    %2 = vector.broadcast %cst : f32 to vector<16x16xf32>
    %c0_2 = arith.constant 0 : index
    %c0_3 = arith.constant 0 : index
    %c0_4 = arith.constant 0 : index
    %3 = vector.load %arg2[%c0_2, %c0_3, %c0_4] : memref<9x16x16xbf16, #tpu.memory_space<vmem>>, vector<1x16x16xbf16>
    %4 = vector.shape_cast %3 : vector<1x16x16xbf16> to vector<16x16xbf16>
    %cst_5 = arith.constant dense<0.000000e+00> : vector<16x16xf32>
    %5 = tpu.matmul %1, %4, %cst_5 {dimension_numbers = #tpu.dot_dimension_numbers<[1], [0], [0], [1], [0, 0, 1, 1], [], []>} : vector<16x16xbf16>, vector<16x16xbf16>, vector<16x16xf32> -> vector<16x16xf32>
    %c0_6 = arith.constant 0 : index
    %c0_7 = arith.constant 0 : index
    %c0_8 = arith.constant 0 : index
    %c0_9 = arith.constant 0 : index
    %6 = vector.load %arg6[%c0_6, %c0_7, %c0_8, %c0_9] : memref<4x9x16x16xbf16, #tpu.memory_space<vmem>>, vector<1x1x16x16xbf16>
    %7 = vector.shape_cast %6 : vector<1x1x16x16xbf16> to vector<16x16xbf16>
    %8 = arith.truncf %5 : vector<16x16xf32> to vector<16x16xbf16>
    %cst_10 = arith.constant dense<0.000000e+00> : vector<16x16xf32>
    %9 = tpu.matmul %7, %8, %cst_10 {dimension_numbers = #tpu.dot_dimension_numbers<[1], [0], [0], [1], [0, 0, 1, 1], [], []>} : vector<16x16xbf16>, vector<16x16xbf16>, vector<16x16xf32> -> vector<16x16xf32>
    %10 = arith.addf %2, %9 : vector<16x16xf32>
    %c1 = arith.constant 1 : index
    %c0_11 = arith.constant 0 : index
    %c0_12 = arith.constant 0 : index
    %11 = vector.load %arg2[%c1, %c0_11, %c0_12] : memref<9x16x16xbf16, #tpu.memory_space<vmem>>, vector<1x16x16xbf16>
    %12 = vector.shape_cast %11 : vector<1x16x16xbf16> to vector<16x16xbf16>
    %cst_13 = arith.constant dense<0.000000e+00> : vector<16x16xf32>
    %13 = tpu.matmul %1, %12, %cst_13 {dimension_numbers = #tpu.dot_dimension_numbers<[1], [0], [0], [1], [0, 0, 1, 1], [], []>} : vector<16x16xbf16>, vector<16x16xbf16>, vector<16x16xf32> -> vector<16x16xf32>
    %c0_14 = arith.constant 0 : index
    %c1_15 = arith.constant 1 : index
    %c0_16 = arith.constant 0 : index
    %c0_17 = arith.constant 0 : index
    %14 = vector.load %arg6[%c0_14, %c1_15, %c0_16, %c0_17] : memref<4x9x16x16xbf16, #tpu.memory_space<vmem>>, vector<1x1x16x16xbf16>
    %15 = vector.shape_cast %14 : vector<1x1x16x16xbf16> to vector<16x16xbf16>
    %16 = arith.truncf %13 : vector<16x16xf32> to vector<16x16xbf16>
    %cst_18 = arith.constant dense<0.000000e+00> : vector<16x16xf32>
    %17 = tpu.matmul %15, %16, %cst_18 {dimension_numbers = #tpu.dot_dimension_numbers<[1], [0], [0], [1], [0, 0, 1, 1], [], []>} : vector<16x16xbf16>, vector<16x16xbf16>, vector<16x16xf32> -> vector<16x16xf32>
    %18 = arith.addf %10, %17 : vector<16x16xf32>
    %c2 = arith.constant 2 : index
    %c0_19 = arith.constant 0 : index
    %c0_20 = arith.constant 0 : index
    %19 = vector.load %arg2[%c2, %c0_19, %c0_20] : memref<9x16x16xbf16, #tpu.memory_space<vmem>>, vector<1x16x16xbf16>
    %20 = vector.shape_cast %19 : vector<1x16x16xbf16> to vector<16x16xbf16>
    %cst_21 = arith.constant dense<0.000000e+00> : vector<16x16xf32>
    %21 = tpu.matmul %1, %20, %cst_21 {dimension_numbers = #tpu.dot_dimension_numbers<[1], [0], [0], [1], [0, 0, 1, 1], [], []>} : vector<16x16xbf16>, vector<16x16xbf16>, vector<16x16xf32> -> vector<16x16xf32>
    %c0_22 = arith.constant 0 : index
    %c2_23 = arith.constant 2 : index
    %c0_24 = arith.constant 0 : index
    %c0_25 = arith.constant 0 : index
    %22 = vector.load %arg6[%c0_22, %c2_23, %c0_24, %c0_25] : memref<4x9x16x16xbf16, #tpu.memory_space<vmem>>, vector<1x1x16x16xbf16>
    %23 = vector.shape_cast %22 : vector<1x1x16x16xbf16> to vector<16x16xbf16>
    %24 = arith.truncf %21 : vector<16x16xf32> to vector<16x16xbf16>
    %cst_26 = arith.constant dense<0.000000e+00> : vector<16x16xf32>
    %25 = tpu.matmul %23, %24, %cst_26 {dimension_numbers = #tpu.dot_dimension_numbers<[1], [0], [0], [1], [0, 0, 1, 1], [], []>} : vector<16x16xbf16>, vector<16x16xbf16>, vector<16x16xf32> -> vector<16x16xf32>
    %26 = arith.addf %18, %25 : vector<16x16xf32>
    %c3 = arith.constant 3 : index
    %c0_27 = arith.constant 0 : index
    %c0_28 = arith.constant 0 : index
    %27 = vector.load %arg2[%c3, %c0_27, %c0_28] : memref<9x16x16xbf16, #tpu.memory_space<vmem>>, vector<1x16x16xbf16>
    %28 = vector.shape_cast %27 : vector<1x16x16xbf16> to vector<16x16xbf16>
    %cst_29 = arith.constant dense<0.000000e+00> : vector<16x16xf32>
    %29 = tpu.matmul %1, %28, %cst_29 {dimension_numbers = #tpu.dot_dimension_numbers<[1], [0], [0], [1], [0, 0, 1, 1], [], []>} : vector<16x16xbf16>, vector<16x16xbf16>, vector<16x16xf32> -> vector<16x16xf32>
    %c0_30 = arith.constant 0 : index
    %c3_31 = arith.constant 3 : index
    %c0_32 = arith.constant 0 : index
    %c0_33 = arith.constant 0 : index
    %30 = vector.load %arg6[%c0_30, %c3_31, %c0_32, %c0_33] : memref<4x9x16x16xbf16, #tpu.memory_space<vmem>>, vector<1x1x16x16xbf16>
    %31 = vector.shape_cast %30 : vector<1x1x16x16xbf16> to vector<16x16xbf16>
    %32 = arith.truncf %29 : vector<16x16xf32> to vector<16x16xbf16>
    %cst_34 = arith.constant dense<0.000000e+00> : vector<16x16xf32>
    %33 = tpu.matmul %31, %32, %cst_34 {dimension_numbers = #tpu.dot_dimension_numbers<[1], [0], [0], [1], [0, 0, 1, 1], [], []>} : vector<16x16xbf16>, vector<16x16xbf16>, vector<16x16xf32> -> vector<16x16xf32>
    %34 = arith.addf %26, %33 : vector<16x16xf32>
    %c4 = arith.constant 4 : index
    %c0_35 = arith.constant 0 : index
    %c0_36 = arith.constant 0 : index
    %35 = vector.load %arg2[%c4, %c0_35, %c0_36] : memref<9x16x16xbf16, #tpu.memory_space<vmem>>, vector<1x16x16xbf16>
    %36 = vector.shape_cast %35 : vector<1x16x16xbf16> to vector<16x16xbf16>
    %cst_37 = arith.constant dense<0.000000e+00> : vector<16x16xf32>
    %37 = tpu.matmul %1, %36, %cst_37 {dimension_numbers = #tpu.dot_dimension_numbers<[1], [0], [0], [1], [0, 0, 1, 1], [], []>} : vector<16x16xbf16>, vector<16x16xbf16>, vector<16x16xf32> -> vector<16x16xf32>
    %c0_38 = arith.constant 0 : index
    %c4_39 = arith.constant 4 : index
    %c0_40 = arith.constant 0 : index
    %c0_41 = arith.constant 0 : index
    %38 = vector.load %arg6[%c0_38, %c4_39, %c0_40, %c0_41] : memref<4x9x16x16xbf16, #tpu.memory_space<vmem>>, vector<1x1x16x16xbf16>
    %39 = vector.shape_cast %38 : vector<1x1x16x16xbf16> to vector<16x16xbf16>
    %40 = arith.truncf %37 : vector<16x16xf32> to vector<16x16xbf16>
    %cst_42 = arith.constant dense<0.000000e+00> : vector<16x16xf32>
    %41 = tpu.matmul %39, %40, %cst_42 {dimension_numbers = #tpu.dot_dimension_numbers<[1], [0], [0], [1], [0, 0, 1, 1], [], []>} : vector<16x16xbf16>, vector<16x16xbf16>, vector<16x16xf32> -> vector<16x16xf32>
    %42 = arith.addf %34, %41 : vector<16x16xf32>
    %c5 = arith.constant 5 : index
    %c0_43 = arith.constant 0 : index
    %c0_44 = arith.constant 0 : index
    %43 = vector.load %arg2[%c5, %c0_43, %c0_44] : memref<9x16x16xbf16, #tpu.memory_space<vmem>>, vector<1x16x16xbf16>
    %44 = vector.shape_cast %43 : vector<1x16x16xbf16> to vector<16x16xbf16>
    %cst_45 = arith.constant dense<0.000000e+00> : vector<16x16xf32>
    %45 = tpu.matmul %1, %44, %cst_45 {dimension_numbers = #tpu.dot_dimension_numbers<[1], [0], [0], [1], [0, 0, 1, 1], [], []>} : vector<16x16xbf16>, vector<16x16xbf16>, vector<16x16xf32> -> vector<16x16xf32>
    %c0_46 = arith.constant 0 : index
    %c5_47 = arith.constant 5 : index
    %c0_48 = arith.constant 0 : index
    %c0_49 = arith.constant 0 : index
    %46 = vector.load %arg6[%c0_46, %c5_47, %c0_48, %c0_49] : memref<4x9x16x16xbf16, #tpu.memory_space<vmem>>, vector<1x1x16x16xbf16>
    %47 = vector.shape_cast %46 : vector<1x1x16x16xbf16> to vector<16x16xbf16>
    %48 = arith.truncf %45 : vector<16x16xf32> to vector<16x16xbf16>
    %cst_50 = arith.constant dense<0.000000e+00> : vector<16x16xf32>
    %49 = tpu.matmul %47, %48, %cst_50 {dimension_numbers = #tpu.dot_dimension_numbers<[1], [0], [0], [1], [0, 0, 1, 1], [], []>} : vector<16x16xbf16>, vector<16x16xbf16>, vector<16x16xf32> -> vector<16x16xf32>
    %50 = arith.addf %42, %49 : vector<16x16xf32>
    %c6 = arith.constant 6 : index
    %c0_51 = arith.constant 0 : index
    %c0_52 = arith.constant 0 : index
    %51 = vector.load %arg2[%c6, %c0_51, %c0_52] : memref<9x16x16xbf16, #tpu.memory_space<vmem>>, vector<1x16x16xbf16>
    %52 = vector.shape_cast %51 : vector<1x16x16xbf16> to vector<16x16xbf16>
    %cst_53 = arith.constant dense<0.000000e+00> : vector<16x16xf32>
    %53 = tpu.matmul %1, %52, %cst_53 {dimension_numbers = #tpu.dot_dimension_numbers<[1], [0], [0], [1], [0, 0, 1, 1], [], []>} : vector<16x16xbf16>, vector<16x16xbf16>, vector<16x16xf32> -> vector<16x16xf32>
    %c0_54 = arith.constant 0 : index
    %c6_55 = arith.constant 6 : index
    %c0_56 = arith.constant 0 : index
    %c0_57 = arith.constant 0 : index
    %54 = vector.load %arg6[%c0_54, %c6_55, %c0_56, %c0_57] : memref<4x9x16x16xbf16, #tpu.memory_space<vmem>>, vector<1x1x16x16xbf16>
    %55 = vector.shape_cast %54 : vector<1x1x16x16xbf16> to vector<16x16xbf16>
    %56 = arith.truncf %53 : vector<16x16xf32> to vector<16x16xbf16>
    %cst_58 = arith.constant dense<0.000000e+00> : vector<16x16xf32>
    %57 = tpu.matmul %55, %56, %cst_58 {dimension_numbers = #tpu.dot_dimension_numbers<[1], [0], [0], [1], [0, 0, 1, 1], [], []>} : vector<16x16xbf16>, vector<16x16xbf16>, vector<16x16xf32> -> vector<16x16xf32>
    %58 = arith.addf %50, %57 : vector<16x16xf32>
    %c7 = arith.constant 7 : index
    %c0_59 = arith.constant 0 : index
    %c0_60 = arith.constant 0 : index
    %59 = vector.load %arg2[%c7, %c0_59, %c0_60] : memref<9x16x16xbf16, #tpu.memory_space<vmem>>, vector<1x16x16xbf16>
    %60 = vector.shape_cast %59 : vector<1x16x16xbf16> to vector<16x16xbf16>
    %cst_61 = arith.constant dense<0.000000e+00> : vector<16x16xf32>
    %61 = tpu.matmul %1, %60, %cst_61 {dimension_numbers = #tpu.dot_dimension_numbers<[1], [0], [0], [1], [0, 0, 1, 1], [], []>} : vector<16x16xbf16>, vector<16x16xbf16>, vector<16x16xf32> -> vector<16x16xf32>
    %c0_62 = arith.constant 0 : index
    %c7_63 = arith.constant 7 : index
    %c0_64 = arith.constant 0 : index
    %c0_65 = arith.constant 0 : index
    %62 = vector.load %arg6[%c0_62, %c7_63, %c0_64, %c0_65] : memref<4x9x16x16xbf16, #tpu.memory_space<vmem>>, vector<1x1x16x16xbf16>
    %63 = vector.shape_cast %62 : vector<1x1x16x16xbf16> to vector<16x16xbf16>
    %64 = arith.truncf %61 : vector<16x16xf32> to vector<16x16xbf16>
    %cst_66 = arith.constant dense<0.000000e+00> : vector<16x16xf32>
    %65 = tpu.matmul %63, %64, %cst_66 {dimension_numbers = #tpu.dot_dimension_numbers<[1], [0], [0], [1], [0, 0, 1, 1], [], []>} : vector<16x16xbf16>, vector<16x16xbf16>, vector<16x16xf32> -> vector<16x16xf32>
    %66 = arith.addf %58, %65 : vector<16x16xf32>
    %c8 = arith.constant 8 : index
    %c0_67 = arith.constant 0 : index
    %c0_68 = arith.constant 0 : index
    %67 = vector.load %arg2[%c8, %c0_67, %c0_68] : memref<9x16x16xbf16, #tpu.memory_space<vmem>>, vector<1x16x16xbf16>
    %68 = vector.shape_cast %67 : vector<1x16x16xbf16> to vector<16x16xbf16>
    %cst_69 = arith.constant dense<0.000000e+00> : vector<16x16xf32>
    %69 = tpu.matmul %1, %68, %cst_69 {dimension_numbers = #tpu.dot_dimension_numbers<[1], [0], [0], [1], [0, 0, 1, 1], [], []>} : vector<16x16xbf16>, vector<16x16xbf16>, vector<16x16xf32> -> vector<16x16xf32>
    %c0_70 = arith.constant 0 : index
    %c8_71 = arith.constant 8 : index
    %c0_72 = arith.constant 0 : index
    %c0_73 = arith.constant 0 : index
    %70 = vector.load %arg6[%c0_70, %c8_71, %c0_72, %c0_73] : memref<4x9x16x16xbf16, #tpu.memory_space<vmem>>, vector<1x1x16x16xbf16>
    %71 = vector.shape_cast %70 : vector<1x1x16x16xbf16> to vector<16x16xbf16>
    %72 = arith.truncf %69 : vector<16x16xf32> to vector<16x16xbf16>
    %cst_74 = arith.constant dense<0.000000e+00> : vector<16x16xf32>
    %73 = tpu.matmul %71, %72, %cst_74 {dimension_numbers = #tpu.dot_dimension_numbers<[1], [0], [0], [1], [0, 0, 1, 1], [], []>} : vector<16x16xbf16>, vector<16x16xbf16>, vector<16x16xf32> -> vector<16x16xf32>
    %74 = arith.addf %66, %73 : vector<16x16xf32>
    %c0_75 = arith.constant 0 : index
    %c0_76 = arith.constant 0 : index
    %c0_77 = arith.constant 0 : index
    %75 = vector.load %arg7[%c0_75, %c0_76, %c0_77] : memref<4x16x1xf32, #tpu.memory_space<vmem>>, vector<1x16x1xf32>
    %76 = vector.shape_cast %75 : vector<1x16x1xf32> to vector<16x1xf32>
    %77 = vector.broadcast %76 : vector<16x1xf32> to vector<16x16xf32>
    %78 = arith.addf %74, %77 : vector<16x16xf32>
    %cst_78 = arith.constant 0.000000e+00 : f32
    %79 = vector.broadcast %cst_78 : f32 to vector<16x16xf32>
    %80 = arith.maximumf %78, %79 : vector<16x16xf32>
    %81 = arith.truncf %80 : vector<16x16xf32> to vector<16x16xbf16>
    %cst_79 = arith.constant 0.000000e+00 : f32
    %82 = vector.broadcast %cst_79 : f32 to vector<8x64xf32>
    %c0_80 = arith.constant 0 : index
    %c0_81 = arith.constant 0 : index
    %c0_82 = arith.constant 0 : index
    %83 = vector.load %arg3[%c0_80, %c0_81, %c0_82] : memref<9x16x64xbf16, #tpu.memory_space<vmem>>, vector<1x16x64xbf16>
    %84 = vector.shape_cast %83 : vector<1x16x64xbf16> to vector<16x64xbf16>
    %cst_83 = arith.constant dense<0.000000e+00> : vector<16x64xf32>
    %85 = tpu.matmul %81, %84, %cst_83 {dimension_numbers = #tpu.dot_dimension_numbers<[1], [0], [0], [1], [0, 0, 1, 1], [], []>} : vector<16x16xbf16>, vector<16x64xbf16>, vector<16x64xf32> -> vector<16x64xf32>
    %c1_84 = arith.constant 1 : index
    %c0_85 = arith.constant 0 : index
    %c0_86 = arith.constant 0 : index
    %c0_87 = arith.constant 0 : index
    %86 = vector.load %arg6[%c1_84, %c0_85, %c0_86, %c0_87] : memref<4x9x16x16xbf16, #tpu.memory_space<vmem>>, vector<1x1x16x16xbf16>
    %87 = vector.shape_cast %86 : vector<1x1x16x16xbf16> to vector<16x16xbf16>
    %88 = vector.extract_strided_slice %87 {offsets = [0, 0], sizes = [8, 16], strides = [1, 1]} : vector<16x16xbf16> to vector<8x16xbf16>
    %89 = arith.truncf %85 : vector<16x64xf32> to vector<16x64xbf16>
    %cst_88 = arith.constant dense<0.000000e+00> : vector<8x64xf32>
    %90 = tpu.matmul %88, %89, %cst_88 {dimension_numbers = #tpu.dot_dimension_numbers<[1], [0], [0], [1], [0, 0, 1, 1], [], []>} : vector<8x16xbf16>, vector<16x64xbf16>, vector<8x64xf32> -> vector<8x64xf32>
    %91 = arith.addf %82, %90 : vector<8x64xf32>
    %c1_89 = arith.constant 1 : index
    %c0_90 = arith.constant 0 : index
    %c0_91 = arith.constant 0 : index
    %92 = vector.load %arg3[%c1_89, %c0_90, %c0_91] : memref<9x16x64xbf16, #tpu.memory_space<vmem>>, vector<1x16x64xbf16>
    %93 = vector.shape_cast %92 : vector<1x16x64xbf16> to vector<16x64xbf16>
    %cst_92 = arith.constant dense<0.000000e+00> : vector<16x64xf32>
    %94 = tpu.matmul %81, %93, %cst_92 {dimension_numbers = #tpu.dot_dimension_numbers<[1], [0], [0], [1], [0, 0, 1, 1], [], []>} : vector<16x16xbf16>, vector<16x64xbf16>, vector<16x64xf32> -> vector<16x64xf32>
    %c1_93 = arith.constant 1 : index
    %c1_94 = arith.constant 1 : index
    %c0_95 = arith.constant 0 : index
    %c0_96 = arith.constant 0 : index
    %95 = vector.load %arg6[%c1_93, %c1_94, %c0_95, %c0_96] : memref<4x9x16x16xbf16, #tpu.memory_space<vmem>>, vector<1x1x16x16xbf16>
    %96 = vector.shape_cast %95 : vector<1x1x16x16xbf16> to vector<16x16xbf16>
    %97 = vector.extract_strided_slice %96 {offsets = [0, 0], sizes = [8, 16], strides = [1, 1]} : vector<16x16xbf16> to vector<8x16xbf16>
    %98 = arith.truncf %94 : vector<16x64xf32> to vector<16x64xbf16>
    %cst_97 = arith.constant dense<0.000000e+00> : vector<8x64xf32>
    %99 = tpu.matmul %97, %98, %cst_97 {dimension_numbers = #tpu.dot_dimension_numbers<[1], [0], [0], [1], [0, 0, 1, 1], [], []>} : vector<8x16xbf16>, vector<16x64xbf16>, vector<8x64xf32> -> vector<8x64xf32>
    %100 = arith.addf %91, %99 : vector<8x64xf32>
    %c2_98 = arith.constant 2 : index
    %c0_99 = arith.constant 0 : index
    %c0_100 = arith.constant 0 : index
    %101 = vector.load %arg3[%c2_98, %c0_99, %c0_100] : memref<9x16x64xbf16, #tpu.memory_space<vmem>>, vector<1x16x64xbf16>
    %102 = vector.shape_cast %101 : vector<1x16x64xbf16> to vector<16x64xbf16>
    %cst_101 = arith.constant dense<0.000000e+00> : vector<16x64xf32>
    %103 = tpu.matmul %81, %102, %cst_101 {dimension_numbers = #tpu.dot_dimension_numbers<[1], [0], [0], [1], [0, 0, 1, 1], [], []>} : vector<16x16xbf16>, vector<16x64xbf16>, vector<16x64xf32> -> vector<16x64xf32>
    %c1_102 = arith.constant 1 : index
    %c2_103 = arith.constant 2 : index
    %c0_104 = arith.constant 0 : index
    %c0_105 = arith.constant 0 : index
    %104 = vector.load %arg6[%c1_102, %c2_103, %c0_104, %c0_105] : memref<4x9x16x16xbf16, #tpu.memory_space<vmem>>, vector<1x1x16x16xbf16>
    %105 = vector.shape_cast %104 : vector<1x1x16x16xbf16> to vector<16x16xbf16>
    %106 = vector.extract_strided_slice %105 {offsets = [0, 0], sizes = [8, 16], strides = [1, 1]} : vector<16x16xbf16> to vector<8x16xbf16>
    %107 = arith.truncf %103 : vector<16x64xf32> to vector<16x64xbf16>
    %cst_106 = arith.constant dense<0.000000e+00> : vector<8x64xf32>
    %108 = tpu.matmul %106, %107, %cst_106 {dimension_numbers = #tpu.dot_dimension_numbers<[1], [0], [0], [1], [0, 0, 1, 1], [], []>} : vector<8x16xbf16>, vector<16x64xbf16>, vector<8x64xf32> -> vector<8x64xf32>
    %109 = arith.addf %100, %108 : vector<8x64xf32>
    %c3_107 = arith.constant 3 : index
    %c0_108 = arith.constant 0 : index
    %c0_109 = arith.constant 0 : index
    %110 = vector.load %arg3[%c3_107, %c0_108, %c0_109] : memref<9x16x64xbf16, #tpu.memory_space<vmem>>, vector<1x16x64xbf16>
    %111 = vector.shape_cast %110 : vector<1x16x64xbf16> to vector<16x64xbf16>
    %cst_110 = arith.constant dense<0.000000e+00> : vector<16x64xf32>
    %112 = tpu.matmul %81, %111, %cst_110 {dimension_numbers = #tpu.dot_dimension_numbers<[1], [0], [0], [1], [0, 0, 1, 1], [], []>} : vector<16x16xbf16>, vector<16x64xbf16>, vector<16x64xf32> -> vector<16x64xf32>
    %c1_111 = arith.constant 1 : index
    %c3_112 = arith.constant 3 : index
    %c0_113 = arith.constant 0 : index
    %c0_114 = arith.constant 0 : index
    %113 = vector.load %arg6[%c1_111, %c3_112, %c0_113, %c0_114] : memref<4x9x16x16xbf16, #tpu.memory_space<vmem>>, vector<1x1x16x16xbf16>
    %114 = vector.shape_cast %113 : vector<1x1x16x16xbf16> to vector<16x16xbf16>
    %115 = vector.extract_strided_slice %114 {offsets = [0, 0], sizes = [8, 16], strides = [1, 1]} : vector<16x16xbf16> to vector<8x16xbf16>
    %116 = arith.truncf %112 : vector<16x64xf32> to vector<16x64xbf16>
    %cst_115 = arith.constant dense<0.000000e+00> : vector<8x64xf32>
    %117 = tpu.matmul %115, %116, %cst_115 {dimension_numbers = #tpu.dot_dimension_numbers<[1], [0], [0], [1], [0, 0, 1, 1], [], []>} : vector<8x16xbf16>, vector<16x64xbf16>, vector<8x64xf32> -> vector<8x64xf32>
    %118 = arith.addf %109, %117 : vector<8x64xf32>
    %c4_116 = arith.constant 4 : index
    %c0_117 = arith.constant 0 : index
    %c0_118 = arith.constant 0 : index
    %119 = vector.load %arg3[%c4_116, %c0_117, %c0_118] : memref<9x16x64xbf16, #tpu.memory_space<vmem>>, vector<1x16x64xbf16>
    %120 = vector.shape_cast %119 : vector<1x16x64xbf16> to vector<16x64xbf16>
    %cst_119 = arith.constant dense<0.000000e+00> : vector<16x64xf32>
    %121 = tpu.matmul %81, %120, %cst_119 {dimension_numbers = #tpu.dot_dimension_numbers<[1], [0], [0], [1], [0, 0, 1, 1], [], []>} : vector<16x16xbf16>, vector<16x64xbf16>, vector<16x64xf32> -> vector<16x64xf32>
    %c1_120 = arith.constant 1 : index
    %c4_121 = arith.constant 4 : index
    %c0_122 = arith.constant 0 : index
    %c0_123 = arith.constant 0 : index
    %122 = vector.load %arg6[%c1_120, %c4_121, %c0_122, %c0_123] : memref<4x9x16x16xbf16, #tpu.memory_space<vmem>>, vector<1x1x16x16xbf16>
    %123 = vector.shape_cast %122 : vector<1x1x16x16xbf16> to vector<16x16xbf16>
    %124 = vector.extract_strided_slice %123 {offsets = [0, 0], sizes = [8, 16], strides = [1, 1]} : vector<16x16xbf16> to vector<8x16xbf16>
    %125 = arith.truncf %121 : vector<16x64xf32> to vector<16x64xbf16>
    %cst_124 = arith.constant dense<0.000000e+00> : vector<8x64xf32>
    %126 = tpu.matmul %124, %125, %cst_124 {dimension_numbers = #tpu.dot_dimension_numbers<[1], [0], [0], [1], [0, 0, 1, 1], [], []>} : vector<8x16xbf16>, vector<16x64xbf16>, vector<8x64xf32> -> vector<8x64xf32>
    %127 = arith.addf %118, %126 : vector<8x64xf32>
    %c5_125 = arith.constant 5 : index
    %c0_126 = arith.constant 0 : index
    %c0_127 = arith.constant 0 : index
    %128 = vector.load %arg3[%c5_125, %c0_126, %c0_127] : memref<9x16x64xbf16, #tpu.memory_space<vmem>>, vector<1x16x64xbf16>
    %129 = vector.shape_cast %128 : vector<1x16x64xbf16> to vector<16x64xbf16>
    %cst_128 = arith.constant dense<0.000000e+00> : vector<16x64xf32>
    %130 = tpu.matmul %81, %129, %cst_128 {dimension_numbers = #tpu.dot_dimension_numbers<[1], [0], [0], [1], [0, 0, 1, 1], [], []>} : vector<16x16xbf16>, vector<16x64xbf16>, vector<16x64xf32> -> vector<16x64xf32>
    %c1_129 = arith.constant 1 : index
    %c5_130 = arith.constant 5 : index
    %c0_131 = arith.constant 0 : index
    %c0_132 = arith.constant 0 : index
    %131 = vector.load %arg6[%c1_129, %c5_130, %c0_131, %c0_132] : memref<4x9x16x16xbf16, #tpu.memory_space<vmem>>, vector<1x1x16x16xbf16>
    %132 = vector.shape_cast %131 : vector<1x1x16x16xbf16> to vector<16x16xbf16>
    %133 = vector.extract_strided_slice %132 {offsets = [0, 0], sizes = [8, 16], strides = [1, 1]} : vector<16x16xbf16> to vector<8x16xbf16>
    %134 = arith.truncf %130 : vector<16x64xf32> to vector<16x64xbf16>
    %cst_133 = arith.constant dense<0.000000e+00> : vector<8x64xf32>
    %135 = tpu.matmul %133, %134, %cst_133 {dimension_numbers = #tpu.dot_dimension_numbers<[1], [0], [0], [1], [0, 0, 1, 1], [], []>} : vector<8x16xbf16>, vector<16x64xbf16>, vector<8x64xf32> -> vector<8x64xf32>
    %136 = arith.addf %127, %135 : vector<8x64xf32>
    %c6_134 = arith.constant 6 : index
    %c0_135 = arith.constant 0 : index
    %c0_136 = arith.constant 0 : index
    %137 = vector.load %arg3[%c6_134, %c0_135, %c0_136] : memref<9x16x64xbf16, #tpu.memory_space<vmem>>, vector<1x16x64xbf16>
    %138 = vector.shape_cast %137 : vector<1x16x64xbf16> to vector<16x64xbf16>
    %cst_137 = arith.constant dense<0.000000e+00> : vector<16x64xf32>
    %139 = tpu.matmul %81, %138, %cst_137 {dimension_numbers = #tpu.dot_dimension_numbers<[1], [0], [0], [1], [0, 0, 1, 1], [], []>} : vector<16x16xbf16>, vector<16x64xbf16>, vector<16x64xf32> -> vector<16x64xf32>
    %c1_138 = arith.constant 1 : index
    %c6_139 = arith.constant 6 : index
    %c0_140 = arith.constant 0 : index
    %c0_141 = arith.constant 0 : index
    %140 = vector.load %arg6[%c1_138, %c6_139, %c0_140, %c0_141] : memref<4x9x16x16xbf16, #tpu.memory_space<vmem>>, vector<1x1x16x16xbf16>
    %141 = vector.shape_cast %140 : vector<1x1x16x16xbf16> to vector<16x16xbf16>
    %142 = vector.extract_strided_slice %141 {offsets = [0, 0], sizes = [8, 16], strides = [1, 1]} : vector<16x16xbf16> to vector<8x16xbf16>
    %143 = arith.truncf %139 : vector<16x64xf32> to vector<16x64xbf16>
    %cst_142 = arith.constant dense<0.000000e+00> : vector<8x64xf32>
    %144 = tpu.matmul %142, %143, %cst_142 {dimension_numbers = #tpu.dot_dimension_numbers<[1], [0], [0], [1], [0, 0, 1, 1], [], []>} : vector<8x16xbf16>, vector<16x64xbf16>, vector<8x64xf32> -> vector<8x64xf32>
    %145 = arith.addf %136, %144 : vector<8x64xf32>
    %c7_143 = arith.constant 7 : index
    %c0_144 = arith.constant 0 : index
    %c0_145 = arith.constant 0 : index
    %146 = vector.load %arg3[%c7_143, %c0_144, %c0_145] : memref<9x16x64xbf16, #tpu.memory_space<vmem>>, vector<1x16x64xbf16>
    %147 = vector.shape_cast %146 : vector<1x16x64xbf16> to vector<16x64xbf16>
    %cst_146 = arith.constant dense<0.000000e+00> : vector<16x64xf32>
    %148 = tpu.matmul %81, %147, %cst_146 {dimension_numbers = #tpu.dot_dimension_numbers<[1], [0], [0], [1], [0, 0, 1, 1], [], []>} : vector<16x16xbf16>, vector<16x64xbf16>, vector<16x64xf32> -> vector<16x64xf32>
    %c1_147 = arith.constant 1 : index
    %c7_148 = arith.constant 7 : index
    %c0_149 = arith.constant 0 : index
    %c0_150 = arith.constant 0 : index
    %149 = vector.load %arg6[%c1_147, %c7_148, %c0_149, %c0_150] : memref<4x9x16x16xbf16, #tpu.memory_space<vmem>>, vector<1x1x16x16xbf16>
    %150 = vector.shape_cast %149 : vector<1x1x16x16xbf16> to vector<16x16xbf16>
    %151 = vector.extract_strided_slice %150 {offsets = [0, 0], sizes = [8, 16], strides = [1, 1]} : vector<16x16xbf16> to vector<8x16xbf16>
    %152 = arith.truncf %148 : vector<16x64xf32> to vector<16x64xbf16>
    %cst_151 = arith.constant dense<0.000000e+00> : vector<8x64xf32>
    %153 = tpu.matmul %151, %152, %cst_151 {dimension_numbers = #tpu.dot_dimension_numbers<[1], [0], [0], [1], [0, 0, 1, 1], [], []>} : vector<8x16xbf16>, vector<16x64xbf16>, vector<8x64xf32> -> vector<8x64xf32>
    %154 = arith.addf %145, %153 : vector<8x64xf32>
    %c8_152 = arith.constant 8 : index
    %c0_153 = arith.constant 0 : index
    %c0_154 = arith.constant 0 : index
    %155 = vector.load %arg3[%c8_152, %c0_153, %c0_154] : memref<9x16x64xbf16, #tpu.memory_space<vmem>>, vector<1x16x64xbf16>
    %156 = vector.shape_cast %155 : vector<1x16x64xbf16> to vector<16x64xbf16>
    %cst_155 = arith.constant dense<0.000000e+00> : vector<16x64xf32>
    %157 = tpu.matmul %81, %156, %cst_155 {dimension_numbers = #tpu.dot_dimension_numbers<[1], [0], [0], [1], [0, 0, 1, 1], [], []>} : vector<16x16xbf16>, vector<16x64xbf16>, vector<16x64xf32> -> vector<16x64xf32>
    %c1_156 = arith.constant 1 : index
    %c8_157 = arith.constant 8 : index
    %c0_158 = arith.constant 0 : index
    %c0_159 = arith.constant 0 : index
    %158 = vector.load %arg6[%c1_156, %c8_157, %c0_158, %c0_159] : memref<4x9x16x16xbf16, #tpu.memory_space<vmem>>, vector<1x1x16x16xbf16>
    %159 = vector.shape_cast %158 : vector<1x1x16x16xbf16> to vector<16x16xbf16>
    %160 = vector.extract_strided_slice %159 {offsets = [0, 0], sizes = [8, 16], strides = [1, 1]} : vector<16x16xbf16> to vector<8x16xbf16>
    %161 = arith.truncf %157 : vector<16x64xf32> to vector<16x64xbf16>
    %cst_160 = arith.constant dense<0.000000e+00> : vector<8x64xf32>
    %162 = tpu.matmul %160, %161, %cst_160 {dimension_numbers = #tpu.dot_dimension_numbers<[1], [0], [0], [1], [0, 0, 1, 1], [], []>} : vector<8x16xbf16>, vector<16x64xbf16>, vector<8x64xf32> -> vector<8x64xf32>
    %163 = arith.addf %154, %162 : vector<8x64xf32>
    %c1_161 = arith.constant 1 : index
    %c0_162 = arith.constant 0 : index
    %c0_163 = arith.constant 0 : index
    %164 = vector.load %arg7[%c1_161, %c0_162, %c0_163] : memref<4x16x1xf32, #tpu.memory_space<vmem>>, vector<1x16x1xf32>
    %165 = vector.shape_cast %164 : vector<1x16x1xf32> to vector<16x1xf32>
    %166 = vector.extract_strided_slice %165 {offsets = [0, 0], sizes = [8, 1], strides = [1, 1]} : vector<16x1xf32> to vector<8x1xf32>
    %167 = vector.broadcast %166 : vector<8x1xf32> to vector<8x64xf32>
    %168 = arith.addf %163, %167 : vector<8x64xf32>
    %cst_164 = arith.constant 0.000000e+00 : f32
    %169 = vector.broadcast %cst_164 : f32 to vector<8x64xf32>
    %170 = arith.maximumf %168, %169 : vector<8x64xf32>
    %171 = arith.truncf %170 : vector<8x64xf32> to vector<8x64xbf16>
    %cst_165 = arith.constant 0.000000e+00 : f32
    %172 = vector.broadcast %cst_165 : f32 to vector<8x256xf32>
    %c0_166 = arith.constant 0 : index
    %c0_167 = arith.constant 0 : index
    %c0_168 = arith.constant 0 : index
    %173 = vector.load %arg4[%c0_166, %c0_167, %c0_168] : memref<9x64x256xbf16, #tpu.memory_space<vmem>>, vector<1x64x256xbf16>
    %174 = vector.shape_cast %173 : vector<1x64x256xbf16> to vector<64x256xbf16>
    %cst_169 = arith.constant dense<0.000000e+00> : vector<8x256xf32>
    %175 = tpu.matmul %171, %174, %cst_169 {dimension_numbers = #tpu.dot_dimension_numbers<[1], [0], [0], [1], [0, 0, 1, 1], [], []>} : vector<8x64xbf16>, vector<64x256xbf16>, vector<8x256xf32> -> vector<8x256xf32>
    %c2_170 = arith.constant 2 : index
    %c0_171 = arith.constant 0 : index
    %c0_172 = arith.constant 0 : index
    %c0_173 = arith.constant 0 : index
    %176 = vector.load %arg6[%c2_170, %c0_171, %c0_172, %c0_173] : memref<4x9x16x16xbf16, #tpu.memory_space<vmem>>, vector<1x1x16x16xbf16>
    %177 = vector.shape_cast %176 : vector<1x1x16x16xbf16> to vector<16x16xbf16>
    %178 = vector.extract_strided_slice %177 {offsets = [0, 0], sizes = [8, 8], strides = [1, 1]} : vector<16x16xbf16> to vector<8x8xbf16>
    %179 = arith.truncf %175 : vector<8x256xf32> to vector<8x256xbf16>
    %cst_174 = arith.constant dense<0.000000e+00> : vector<8x256xf32>
    %180 = tpu.matmul %178, %179, %cst_174 {dimension_numbers = #tpu.dot_dimension_numbers<[1], [0], [0], [1], [0, 0, 1, 1], [], []>} : vector<8x8xbf16>, vector<8x256xbf16>, vector<8x256xf32> -> vector<8x256xf32>
    %181 = arith.addf %172, %180 : vector<8x256xf32>
    %c1_175 = arith.constant 1 : index
    %c0_176 = arith.constant 0 : index
    %c0_177 = arith.constant 0 : index
    %182 = vector.load %arg4[%c1_175, %c0_176, %c0_177] : memref<9x64x256xbf16, #tpu.memory_space<vmem>>, vector<1x64x256xbf16>
    %183 = vector.shape_cast %182 : vector<1x64x256xbf16> to vector<64x256xbf16>
    %cst_178 = arith.constant dense<0.000000e+00> : vector<8x256xf32>
    %184 = tpu.matmul %171, %183, %cst_178 {dimension_numbers = #tpu.dot_dimension_numbers<[1], [0], [0], [1], [0, 0, 1, 1], [], []>} : vector<8x64xbf16>, vector<64x256xbf16>, vector<8x256xf32> -> vector<8x256xf32>
    %c2_179 = arith.constant 2 : index
    %c1_180 = arith.constant 1 : index
    %c0_181 = arith.constant 0 : index
    %c0_182 = arith.constant 0 : index
    %185 = vector.load %arg6[%c2_179, %c1_180, %c0_181, %c0_182] : memref<4x9x16x16xbf16, #tpu.memory_space<vmem>>, vector<1x1x16x16xbf16>
    %186 = vector.shape_cast %185 : vector<1x1x16x16xbf16> to vector<16x16xbf16>
    %187 = vector.extract_strided_slice %186 {offsets = [0, 0], sizes = [8, 8], strides = [1, 1]} : vector<16x16xbf16> to vector<8x8xbf16>
    %188 = arith.truncf %184 : vector<8x256xf32> to vector<8x256xbf16>
    %cst_183 = arith.constant dense<0.000000e+00> : vector<8x256xf32>
    %189 = tpu.matmul %187, %188, %cst_183 {dimension_numbers = #tpu.dot_dimension_numbers<[1], [0], [0], [1], [0, 0, 1, 1], [], []>} : vector<8x8xbf16>, vector<8x256xbf16>, vector<8x256xf32> -> vector<8x256xf32>
    %190 = arith.addf %181, %189 : vector<8x256xf32>
    %c2_184 = arith.constant 2 : index
    %c0_185 = arith.constant 0 : index
    %c0_186 = arith.constant 0 : index
    %191 = vector.load %arg4[%c2_184, %c0_185, %c0_186] : memref<9x64x256xbf16, #tpu.memory_space<vmem>>, vector<1x64x256xbf16>
    %192 = vector.shape_cast %191 : vector<1x64x256xbf16> to vector<64x256xbf16>
    %cst_187 = arith.constant dense<0.000000e+00> : vector<8x256xf32>
    %193 = tpu.matmul %171, %192, %cst_187 {dimension_numbers = #tpu.dot_dimension_numbers<[1], [0], [0], [1], [0, 0, 1, 1], [], []>} : vector<8x64xbf16>, vector<64x256xbf16>, vector<8x256xf32> -> vector<8x256xf32>
    %c2_188 = arith.constant 2 : index
    %c2_189 = arith.constant 2 : index
    %c0_190 = arith.constant 0 : index
    %c0_191 = arith.constant 0 : index
    %194 = vector.load %arg6[%c2_188, %c2_189, %c0_190, %c0_191] : memref<4x9x16x16xbf16, #tpu.memory_space<vmem>>, vector<1x1x16x16xbf16>
    %195 = vector.shape_cast %194 : vector<1x1x16x16xbf16> to vector<16x16xbf16>
    %196 = vector.extract_strided_slice %195 {offsets = [0, 0], sizes = [8, 8], strides = [1, 1]} : vector<16x16xbf16> to vector<8x8xbf16>
    %197 = arith.truncf %193 : vector<8x256xf32> to vector<8x256xbf16>
    %cst_192 = arith.constant dense<0.000000e+00> : vector<8x256xf32>
    %198 = tpu.matmul %196, %197, %cst_192 {dimension_numbers = #tpu.dot_dimension_numbers<[1], [0], [0], [1], [0, 0, 1, 1], [], []>} : vector<8x8xbf16>, vector<8x256xbf16>, vector<8x256xf32> -> vector<8x256xf32>
    %199 = arith.addf %190, %198 : vector<8x256xf32>
    %c3_193 = arith.constant 3 : index
    %c0_194 = arith.constant 0 : index
    %c0_195 = arith.constant 0 : index
    %200 = vector.load %arg4[%c3_193, %c0_194, %c0_195] : memref<9x64x256xbf16, #tpu.memory_space<vmem>>, vector<1x64x256xbf16>
    %201 = vector.shape_cast %200 : vector<1x64x256xbf16> to vector<64x256xbf16>
    %cst_196 = arith.constant dense<0.000000e+00> : vector<8x256xf32>
    %202 = tpu.matmul %171, %201, %cst_196 {dimension_numbers = #tpu.dot_dimension_numbers<[1], [0], [0], [1], [0, 0, 1, 1], [], []>} : vector<8x64xbf16>, vector<64x256xbf16>, vector<8x256xf32> -> vector<8x256xf32>
    %c2_197 = arith.constant 2 : index
    %c3_198 = arith.constant 3 : index
    %c0_199 = arith.constant 0 : index
    %c0_200 = arith.constant 0 : index
    %203 = vector.load %arg6[%c2_197, %c3_198, %c0_199, %c0_200] : memref<4x9x16x16xbf16, #tpu.memory_space<vmem>>, vector<1x1x16x16xbf16>
    %204 = vector.shape_cast %203 : vector<1x1x16x16xbf16> to vector<16x16xbf16>
    %205 = vector.extract_strided_slice %204 {offsets = [0, 0], sizes = [8, 8], strides = [1, 1]} : vector<16x16xbf16> to vector<8x8xbf16>
    %206 = arith.truncf %202 : vector<8x256xf32> to vector<8x256xbf16>
    %cst_201 = arith.constant dense<0.000000e+00> : vector<8x256xf32>
    %207 = tpu.matmul %205, %206, %cst_201 {dimension_numbers = #tpu.dot_dimension_numbers<[1], [0], [0], [1], [0, 0, 1, 1], [], []>} : vector<8x8xbf16>, vector<8x256xbf16>, vector<8x256xf32> -> vector<8x256xf32>
    %208 = arith.addf %199, %207 : vector<8x256xf32>
    %c4_202 = arith.constant 4 : index
    %c0_203 = arith.constant 0 : index
    %c0_204 = arith.constant 0 : index
    %209 = vector.load %arg4[%c4_202, %c0_203, %c0_204] : memref<9x64x256xbf16, #tpu.memory_space<vmem>>, vector<1x64x256xbf16>
    %210 = vector.shape_cast %209 : vector<1x64x256xbf16> to vector<64x256xbf16>
    %cst_205 = arith.constant dense<0.000000e+00> : vector<8x256xf32>
    %211 = tpu.matmul %171, %210, %cst_205 {dimension_numbers = #tpu.dot_dimension_numbers<[1], [0], [0], [1], [0, 0, 1, 1], [], []>} : vector<8x64xbf16>, vector<64x256xbf16>, vector<8x256xf32> -> vector<8x256xf32>
    %c2_206 = arith.constant 2 : index
    %c4_207 = arith.constant 4 : index
    %c0_208 = arith.constant 0 : index
    %c0_209 = arith.constant 0 : index
    %212 = vector.load %arg6[%c2_206, %c4_207, %c0_208, %c0_209] : memref<4x9x16x16xbf16, #tpu.memory_space<vmem>>, vector<1x1x16x16xbf16>
    %213 = vector.shape_cast %212 : vector<1x1x16x16xbf16> to vector<16x16xbf16>
    %214 = vector.extract_strided_slice %213 {offsets = [0, 0], sizes = [8, 8], strides = [1, 1]} : vector<16x16xbf16> to vector<8x8xbf16>
    %215 = arith.truncf %211 : vector<8x256xf32> to vector<8x256xbf16>
    %cst_210 = arith.constant dense<0.000000e+00> : vector<8x256xf32>
    %216 = tpu.matmul %214, %215, %cst_210 {dimension_numbers = #tpu.dot_dimension_numbers<[1], [0], [0], [1], [0, 0, 1, 1], [], []>} : vector<8x8xbf16>, vector<8x256xbf16>, vector<8x256xf32> -> vector<8x256xf32>
    %217 = arith.addf %208, %216 : vector<8x256xf32>
    %c5_211 = arith.constant 5 : index
    %c0_212 = arith.constant 0 : index
    %c0_213 = arith.constant 0 : index
    %218 = vector.load %arg4[%c5_211, %c0_212, %c0_213] : memref<9x64x256xbf16, #tpu.memory_space<vmem>>, vector<1x64x256xbf16>
    %219 = vector.shape_cast %218 : vector<1x64x256xbf16> to vector<64x256xbf16>
    %cst_214 = arith.constant dense<0.000000e+00> : vector<8x256xf32>
    %220 = tpu.matmul %171, %219, %cst_214 {dimension_numbers = #tpu.dot_dimension_numbers<[1], [0], [0], [1], [0, 0, 1, 1], [], []>} : vector<8x64xbf16>, vector<64x256xbf16>, vector<8x256xf32> -> vector<8x256xf32>
    %c2_215 = arith.constant 2 : index
    %c5_216 = arith.constant 5 : index
    %c0_217 = arith.constant 0 : index
    %c0_218 = arith.constant 0 : index
    %221 = vector.load %arg6[%c2_215, %c5_216, %c0_217, %c0_218] : memref<4x9x16x16xbf16, #tpu.memory_space<vmem>>, vector<1x1x16x16xbf16>
    %222 = vector.shape_cast %221 : vector<1x1x16x16xbf16> to vector<16x16xbf16>
    %223 = vector.extract_strided_slice %222 {offsets = [0, 0], sizes = [8, 8], strides = [1, 1]} : vector<16x16xbf16> to vector<8x8xbf16>
    %224 = arith.truncf %220 : vector<8x256xf32> to vector<8x256xbf16>
    %cst_219 = arith.constant dense<0.000000e+00> : vector<8x256xf32>
    %225 = tpu.matmul %223, %224, %cst_219 {dimension_numbers = #tpu.dot_dimension_numbers<[1], [0], [0], [1], [0, 0, 1, 1], [], []>} : vector<8x8xbf16>, vector<8x256xbf16>, vector<8x256xf32> -> vector<8x256xf32>
    %226 = arith.addf %217, %225 : vector<8x256xf32>
    %c6_220 = arith.constant 6 : index
    %c0_221 = arith.constant 0 : index
    %c0_222 = arith.constant 0 : index
    %227 = vector.load %arg4[%c6_220, %c0_221, %c0_222] : memref<9x64x256xbf16, #tpu.memory_space<vmem>>, vector<1x64x256xbf16>
    %228 = vector.shape_cast %227 : vector<1x64x256xbf16> to vector<64x256xbf16>
    %cst_223 = arith.constant dense<0.000000e+00> : vector<8x256xf32>
    %229 = tpu.matmul %171, %228, %cst_223 {dimension_numbers = #tpu.dot_dimension_numbers<[1], [0], [0], [1], [0, 0, 1, 1], [], []>} : vector<8x64xbf16>, vector<64x256xbf16>, vector<8x256xf32> -> vector<8x256xf32>
    %c2_224 = arith.constant 2 : index
    %c6_225 = arith.constant 6 : index
    %c0_226 = arith.constant 0 : index
    %c0_227 = arith.constant 0 : index
    %230 = vector.load %arg6[%c2_224, %c6_225, %c0_226, %c0_227] : memref<4x9x16x16xbf16, #tpu.memory_space<vmem>>, vector<1x1x16x16xbf16>
    %231 = vector.shape_cast %230 : vector<1x1x16x16xbf16> to vector<16x16xbf16>
    %232 = vector.extract_strided_slice %231 {offsets = [0, 0], sizes = [8, 8], strides = [1, 1]} : vector<16x16xbf16> to vector<8x8xbf16>
    %233 = arith.truncf %229 : vector<8x256xf32> to vector<8x256xbf16>
    %cst_228 = arith.constant dense<0.000000e+00> : vector<8x256xf32>
    %234 = tpu.matmul %232, %233, %cst_228 {dimension_numbers = #tpu.dot_dimension_numbers<[1], [0], [0], [1], [0, 0, 1, 1], [], []>} : vector<8x8xbf16>, vector<8x256xbf16>, vector<8x256xf32> -> vector<8x256xf32>
    %235 = arith.addf %226, %234 : vector<8x256xf32>
    %c7_229 = arith.constant 7 : index
    %c0_230 = arith.constant 0 : index
    %c0_231 = arith.constant 0 : index
    %236 = vector.load %arg4[%c7_229, %c0_230, %c0_231] : memref<9x64x256xbf16, #tpu.memory_space<vmem>>, vector<1x64x256xbf16>
    %237 = vector.shape_cast %236 : vector<1x64x256xbf16> to vector<64x256xbf16>
    %cst_232 = arith.constant dense<0.000000e+00> : vector<8x256xf32>
    %238 = tpu.matmul %171, %237, %cst_232 {dimension_numbers = #tpu.dot_dimension_numbers<[1], [0], [0], [1], [0, 0, 1, 1], [], []>} : vector<8x64xbf16>, vector<64x256xbf16>, vector<8x256xf32> -> vector<8x256xf32>
    %c2_233 = arith.constant 2 : index
    %c7_234 = arith.constant 7 : index
    %c0_235 = arith.constant 0 : index
    %c0_236 = arith.constant 0 : index
    %239 = vector.load %arg6[%c2_233, %c7_234, %c0_235, %c0_236] : memref<4x9x16x16xbf16, #tpu.memory_space<vmem>>, vector<1x1x16x16xbf16>
    %240 = vector.shape_cast %239 : vector<1x1x16x16xbf16> to vector<16x16xbf16>
    %241 = vector.extract_strided_slice %240 {offsets = [0, 0], sizes = [8, 8], strides = [1, 1]} : vector<16x16xbf16> to vector<8x8xbf16>
    %242 = arith.truncf %238 : vector<8x256xf32> to vector<8x256xbf16>
    %cst_237 = arith.constant dense<0.000000e+00> : vector<8x256xf32>
    %243 = tpu.matmul %241, %242, %cst_237 {dimension_numbers = #tpu.dot_dimension_numbers<[1], [0], [0], [1], [0, 0, 1, 1], [], []>} : vector<8x8xbf16>, vector<8x256xbf16>, vector<8x256xf32> -> vector<8x256xf32>
    %244 = arith.addf %235, %243 : vector<8x256xf32>
    %c8_238 = arith.constant 8 : index
    %c0_239 = arith.constant 0 : index
    %c0_240 = arith.constant 0 : index
    %245 = vector.load %arg4[%c8_238, %c0_239, %c0_240] : memref<9x64x256xbf16, #tpu.memory_space<vmem>>, vector<1x64x256xbf16>
    %246 = vector.shape_cast %245 : vector<1x64x256xbf16> to vector<64x256xbf16>
    %cst_241 = arith.constant dense<0.000000e+00> : vector<8x256xf32>
    %247 = tpu.matmul %171, %246, %cst_241 {dimension_numbers = #tpu.dot_dimension_numbers<[1], [0], [0], [1], [0, 0, 1, 1], [], []>} : vector<8x64xbf16>, vector<64x256xbf16>, vector<8x256xf32> -> vector<8x256xf32>
    %c2_242 = arith.constant 2 : index
    %c8_243 = arith.constant 8 : index
    %c0_244 = arith.constant 0 : index
    %c0_245 = arith.constant 0 : index
    %248 = vector.load %arg6[%c2_242, %c8_243, %c0_244, %c0_245] : memref<4x9x16x16xbf16, #tpu.memory_space<vmem>>, vector<1x1x16x16xbf16>
    %249 = vector.shape_cast %248 : vector<1x1x16x16xbf16> to vector<16x16xbf16>
    %250 = vector.extract_strided_slice %249 {offsets = [0, 0], sizes = [8, 8], strides = [1, 1]} : vector<16x16xbf16> to vector<8x8xbf16>
    %251 = arith.truncf %247 : vector<8x256xf32> to vector<8x256xbf16>
    %cst_246 = arith.constant dense<0.000000e+00> : vector<8x256xf32>
    %252 = tpu.matmul %250, %251, %cst_246 {dimension_numbers = #tpu.dot_dimension_numbers<[1], [0], [0], [1], [0, 0, 1, 1], [], []>} : vector<8x8xbf16>, vector<8x256xbf16>, vector<8x256xf32> -> vector<8x256xf32>
    %253 = arith.addf %244, %252 : vector<8x256xf32>
    %c2_247 = arith.constant 2 : index
    %c0_248 = arith.constant 0 : index
    %c0_249 = arith.constant 0 : index
    %254 = vector.load %arg7[%c2_247, %c0_248, %c0_249] : memref<4x16x1xf32, #tpu.memory_space<vmem>>, vector<1x16x1xf32>
    %255 = vector.shape_cast %254 : vector<1x16x1xf32> to vector<16x1xf32>
    %256 = vector.extract_strided_slice %255 {offsets = [0, 0], sizes = [8, 1], strides = [1, 1]} : vector<16x1xf32> to vector<8x1xf32>
    %257 = vector.broadcast %256 : vector<8x1xf32> to vector<8x256xf32>
    %258 = arith.addf %253, %257 : vector<8x256xf32>
    %cst_250 = arith.constant 0.000000e+00 : f32
    %259 = vector.broadcast %cst_250 : f32 to vector<8x256xf32>
    %260 = arith.maximumf %258, %259 : vector<8x256xf32>
    %261 = arith.truncf %260 : vector<8x256xf32> to vector<8x256xbf16>
    %cst_251 = arith.constant 0.000000e+00 : f32
    %262 = vector.broadcast %cst_251 : f32 to vector<3x256xf32>
    %c0_252 = arith.constant 0 : index
    %c0_253 = arith.constant 0 : index
    %c0_254 = arith.constant 0 : index
    %263 = vector.load %arg5[%c0_252, %c0_253, %c0_254] : memref<9x256x256xbf16, #tpu.memory_space<vmem>>, vector<1x256x256xbf16>
    %264 = vector.shape_cast %263 : vector<1x256x256xbf16> to vector<256x256xbf16>
    %cst_255 = arith.constant dense<0.000000e+00> : vector<8x256xf32>
    %265 = tpu.matmul %261, %264, %cst_255 {dimension_numbers = #tpu.dot_dimension_numbers<[1], [0], [0], [1], [0, 0, 1, 1], [], []>} : vector<8x256xbf16>, vector<256x256xbf16>, vector<8x256xf32> -> vector<8x256xf32>
    %c3_256 = arith.constant 3 : index
    %c0_257 = arith.constant 0 : index
    %c0_258 = arith.constant 0 : index
    %c0_259 = arith.constant 0 : index
    %266 = vector.load %arg6[%c3_256, %c0_257, %c0_258, %c0_259] : memref<4x9x16x16xbf16, #tpu.memory_space<vmem>>, vector<1x1x16x16xbf16>
    %267 = vector.shape_cast %266 : vector<1x1x16x16xbf16> to vector<16x16xbf16>
    %268 = vector.extract_strided_slice %267 {offsets = [0, 0], sizes = [3, 8], strides = [1, 1]} : vector<16x16xbf16> to vector<3x8xbf16>
    %269 = arith.truncf %265 : vector<8x256xf32> to vector<8x256xbf16>
    %cst_260 = arith.constant dense<0.000000e+00> : vector<3x256xf32>
    %270 = tpu.matmul %268, %269, %cst_260 {dimension_numbers = #tpu.dot_dimension_numbers<[1], [0], [0], [1], [0, 0, 1, 1], [], []>} : vector<3x8xbf16>, vector<8x256xbf16>, vector<3x256xf32> -> vector<3x256xf32>
    %271 = arith.addf %262, %270 : vector<3x256xf32>
    %c1_261 = arith.constant 1 : index
    %c0_262 = arith.constant 0 : index
    %c0_263 = arith.constant 0 : index
    %272 = vector.load %arg5[%c1_261, %c0_262, %c0_263] : memref<9x256x256xbf16, #tpu.memory_space<vmem>>, vector<1x256x256xbf16>
    %273 = vector.shape_cast %272 : vector<1x256x256xbf16> to vector<256x256xbf16>
    %cst_264 = arith.constant dense<0.000000e+00> : vector<8x256xf32>
    %274 = tpu.matmul %261, %273, %cst_264 {dimension_numbers = #tpu.dot_dimension_numbers<[1], [0], [0], [1], [0, 0, 1, 1], [], []>} : vector<8x256xbf16>, vector<256x256xbf16>, vector<8x256xf32> -> vector<8x256xf32>
    %c3_265 = arith.constant 3 : index
    %c1_266 = arith.constant 1 : index
    %c0_267 = arith.constant 0 : index
    %c0_268 = arith.constant 0 : index
    %275 = vector.load %arg6[%c3_265, %c1_266, %c0_267, %c0_268] : memref<4x9x16x16xbf16, #tpu.memory_space<vmem>>, vector<1x1x16x16xbf16>
    %276 = vector.shape_cast %275 : vector<1x1x16x16xbf16> to vector<16x16xbf16>
    %277 = vector.extract_strided_slice %276 {offsets = [0, 0], sizes = [3, 8], strides = [1, 1]} : vector<16x16xbf16> to vector<3x8xbf16>
    %278 = arith.truncf %274 : vector<8x256xf32> to vector<8x256xbf16>
    %cst_269 = arith.constant dense<0.000000e+00> : vector<3x256xf32>
    %279 = tpu.matmul %277, %278, %cst_269 {dimension_numbers = #tpu.dot_dimension_numbers<[1], [0], [0], [1], [0, 0, 1, 1], [], []>} : vector<3x8xbf16>, vector<8x256xbf16>, vector<3x256xf32> -> vector<3x256xf32>
    %280 = arith.addf %271, %279 : vector<3x256xf32>
    %c2_270 = arith.constant 2 : index
    %c0_271 = arith.constant 0 : index
    %c0_272 = arith.constant 0 : index
    %281 = vector.load %arg5[%c2_270, %c0_271, %c0_272] : memref<9x256x256xbf16, #tpu.memory_space<vmem>>, vector<1x256x256xbf16>
    %282 = vector.shape_cast %281 : vector<1x256x256xbf16> to vector<256x256xbf16>
    %cst_273 = arith.constant dense<0.000000e+00> : vector<8x256xf32>
    %283 = tpu.matmul %261, %282, %cst_273 {dimension_numbers = #tpu.dot_dimension_numbers<[1], [0], [0], [1], [0, 0, 1, 1], [], []>} : vector<8x256xbf16>, vector<256x256xbf16>, vector<8x256xf32> -> vector<8x256xf32>
    %c3_274 = arith.constant 3 : index
    %c2_275 = arith.constant 2 : index
    %c0_276 = arith.constant 0 : index
    %c0_277 = arith.constant 0 : index
    %284 = vector.load %arg6[%c3_274, %c2_275, %c0_276, %c0_277] : memref<4x9x16x16xbf16, #tpu.memory_space<vmem>>, vector<1x1x16x16xbf16>
    %285 = vector.shape_cast %284 : vector<1x1x16x16xbf16> to vector<16x16xbf16>
    %286 = vector.extract_strided_slice %285 {offsets = [0, 0], sizes = [3, 8], strides = [1, 1]} : vector<16x16xbf16> to vector<3x8xbf16>
    %287 = arith.truncf %283 : vector<8x256xf32> to vector<8x256xbf16>
    %cst_278 = arith.constant dense<0.000000e+00> : vector<3x256xf32>
    %288 = tpu.matmul %286, %287, %cst_278 {dimension_numbers = #tpu.dot_dimension_numbers<[1], [0], [0], [1], [0, 0, 1, 1], [], []>} : vector<3x8xbf16>, vector<8x256xbf16>, vector<3x256xf32> -> vector<3x256xf32>
    %289 = arith.addf %280, %288 : vector<3x256xf32>
    %c3_279 = arith.constant 3 : index
    %c0_280 = arith.constant 0 : index
    %c0_281 = arith.constant 0 : index
    %290 = vector.load %arg5[%c3_279, %c0_280, %c0_281] : memref<9x256x256xbf16, #tpu.memory_space<vmem>>, vector<1x256x256xbf16>
    %291 = vector.shape_cast %290 : vector<1x256x256xbf16> to vector<256x256xbf16>
    %cst_282 = arith.constant dense<0.000000e+00> : vector<8x256xf32>
    %292 = tpu.matmul %261, %291, %cst_282 {dimension_numbers = #tpu.dot_dimension_numbers<[1], [0], [0], [1], [0, 0, 1, 1], [], []>} : vector<8x256xbf16>, vector<256x256xbf16>, vector<8x256xf32> -> vector<8x256xf32>
    %c3_283 = arith.constant 3 : index
    %c3_284 = arith.constant 3 : index
    %c0_285 = arith.constant 0 : index
    %c0_286 = arith.constant 0 : index
    %293 = vector.load %arg6[%c3_283, %c3_284, %c0_285, %c0_286] : memref<4x9x16x16xbf16, #tpu.memory_space<vmem>>, vector<1x1x16x16xbf16>
    %294 = vector.shape_cast %293 : vector<1x1x16x16xbf16> to vector<16x16xbf16>
    %295 = vector.extract_strided_slice %294 {offsets = [0, 0], sizes = [3, 8], strides = [1, 1]} : vector<16x16xbf16> to vector<3x8xbf16>
    %296 = arith.truncf %292 : vector<8x256xf32> to vector<8x256xbf16>
    %cst_287 = arith.constant dense<0.000000e+00> : vector<3x256xf32>
    %297 = tpu.matmul %295, %296, %cst_287 {dimension_numbers = #tpu.dot_dimension_numbers<[1], [0], [0], [1], [0, 0, 1, 1], [], []>} : vector<3x8xbf16>, vector<8x256xbf16>, vector<3x256xf32> -> vector<3x256xf32>
    %298 = arith.addf %289, %297 : vector<3x256xf32>
    %c4_288 = arith.constant 4 : index
    %c0_289 = arith.constant 0 : index
    %c0_290 = arith.constant 0 : index
    %299 = vector.load %arg5[%c4_288, %c0_289, %c0_290] : memref<9x256x256xbf16, #tpu.memory_space<vmem>>, vector<1x256x256xbf16>
    %300 = vector.shape_cast %299 : vector<1x256x256xbf16> to vector<256x256xbf16>
    %cst_291 = arith.constant dense<0.000000e+00> : vector<8x256xf32>
    %301 = tpu.matmul %261, %300, %cst_291 {dimension_numbers = #tpu.dot_dimension_numbers<[1], [0], [0], [1], [0, 0, 1, 1], [], []>} : vector<8x256xbf16>, vector<256x256xbf16>, vector<8x256xf32> -> vector<8x256xf32>
    %c3_292 = arith.constant 3 : index
    %c4_293 = arith.constant 4 : index
    %c0_294 = arith.constant 0 : index
    %c0_295 = arith.constant 0 : index
    %302 = vector.load %arg6[%c3_292, %c4_293, %c0_294, %c0_295] : memref<4x9x16x16xbf16, #tpu.memory_space<vmem>>, vector<1x1x16x16xbf16>
    %303 = vector.shape_cast %302 : vector<1x1x16x16xbf16> to vector<16x16xbf16>
    %304 = vector.extract_strided_slice %303 {offsets = [0, 0], sizes = [3, 8], strides = [1, 1]} : vector<16x16xbf16> to vector<3x8xbf16>
    %305 = arith.truncf %301 : vector<8x256xf32> to vector<8x256xbf16>
    %cst_296 = arith.constant dense<0.000000e+00> : vector<3x256xf32>
    %306 = tpu.matmul %304, %305, %cst_296 {dimension_numbers = #tpu.dot_dimension_numbers<[1], [0], [0], [1], [0, 0, 1, 1], [], []>} : vector<3x8xbf16>, vector<8x256xbf16>, vector<3x256xf32> -> vector<3x256xf32>
    %307 = arith.addf %298, %306 : vector<3x256xf32>
    %c5_297 = arith.constant 5 : index
    %c0_298 = arith.constant 0 : index
    %c0_299 = arith.constant 0 : index
    %308 = vector.load %arg5[%c5_297, %c0_298, %c0_299] : memref<9x256x256xbf16, #tpu.memory_space<vmem>>, vector<1x256x256xbf16>
    %309 = vector.shape_cast %308 : vector<1x256x256xbf16> to vector<256x256xbf16>
    %cst_300 = arith.constant dense<0.000000e+00> : vector<8x256xf32>
    %310 = tpu.matmul %261, %309, %cst_300 {dimension_numbers = #tpu.dot_dimension_numbers<[1], [0], [0], [1], [0, 0, 1, 1], [], []>} : vector<8x256xbf16>, vector<256x256xbf16>, vector<8x256xf32> -> vector<8x256xf32>
    %c3_301 = arith.constant 3 : index
    %c5_302 = arith.constant 5 : index
    %c0_303 = arith.constant 0 : index
    %c0_304 = arith.constant 0 : index
    %311 = vector.load %arg6[%c3_301, %c5_302, %c0_303, %c0_304] : memref<4x9x16x16xbf16, #tpu.memory_space<vmem>>, vector<1x1x16x16xbf16>
    %312 = vector.shape_cast %311 : vector<1x1x16x16xbf16> to vector<16x16xbf16>
    %313 = vector.extract_strided_slice %312 {offsets = [0, 0], sizes = [3, 8], strides = [1, 1]} : vector<16x16xbf16> to vector<3x8xbf16>
    %314 = arith.truncf %310 : vector<8x256xf32> to vector<8x256xbf16>
    %cst_305 = arith.constant dense<0.000000e+00> : vector<3x256xf32>
    %315 = tpu.matmul %313, %314, %cst_305 {dimension_numbers = #tpu.dot_dimension_numbers<[1], [0], [0], [1], [0, 0, 1, 1], [], []>} : vector<3x8xbf16>, vector<8x256xbf16>, vector<3x256xf32> -> vector<3x256xf32>
    %316 = arith.addf %307, %315 : vector<3x256xf32>
    %c6_306 = arith.constant 6 : index
    %c0_307 = arith.constant 0 : index
    %c0_308 = arith.constant 0 : index
    %317 = vector.load %arg5[%c6_306, %c0_307, %c0_308] : memref<9x256x256xbf16, #tpu.memory_space<vmem>>, vector<1x256x256xbf16>
    %318 = vector.shape_cast %317 : vector<1x256x256xbf16> to vector<256x256xbf16>
    %cst_309 = arith.constant dense<0.000000e+00> : vector<8x256xf32>
    %319 = tpu.matmul %261, %318, %cst_309 {dimension_numbers = #tpu.dot_dimension_numbers<[1], [0], [0], [1], [0, 0, 1, 1], [], []>} : vector<8x256xbf16>, vector<256x256xbf16>, vector<8x256xf32> -> vector<8x256xf32>
    %c3_310 = arith.constant 3 : index
    %c6_311 = arith.constant 6 : index
    %c0_312 = arith.constant 0 : index
    %c0_313 = arith.constant 0 : index
    %320 = vector.load %arg6[%c3_310, %c6_311, %c0_312, %c0_313] : memref<4x9x16x16xbf16, #tpu.memory_space<vmem>>, vector<1x1x16x16xbf16>
    %321 = vector.shape_cast %320 : vector<1x1x16x16xbf16> to vector<16x16xbf16>
    %322 = vector.extract_strided_slice %321 {offsets = [0, 0], sizes = [3, 8], strides = [1, 1]} : vector<16x16xbf16> to vector<3x8xbf16>
    %323 = arith.truncf %319 : vector<8x256xf32> to vector<8x256xbf16>
    %cst_314 = arith.constant dense<0.000000e+00> : vector<3x256xf32>
    %324 = tpu.matmul %322, %323, %cst_314 {dimension_numbers = #tpu.dot_dimension_numbers<[1], [0], [0], [1], [0, 0, 1, 1], [], []>} : vector<3x8xbf16>, vector<8x256xbf16>, vector<3x256xf32> -> vector<3x256xf32>
    %325 = arith.addf %316, %324 : vector<3x256xf32>
    %c7_315 = arith.constant 7 : index
    %c0_316 = arith.constant 0 : index
    %c0_317 = arith.constant 0 : index
    %326 = vector.load %arg5[%c7_315, %c0_316, %c0_317] : memref<9x256x256xbf16, #tpu.memory_space<vmem>>, vector<1x256x256xbf16>
    %327 = vector.shape_cast %326 : vector<1x256x256xbf16> to vector<256x256xbf16>
    %cst_318 = arith.constant dense<0.000000e+00> : vector<8x256xf32>
    %328 = tpu.matmul %261, %327, %cst_318 {dimension_numbers = #tpu.dot_dimension_numbers<[1], [0], [0], [1], [0, 0, 1, 1], [], []>} : vector<8x256xbf16>, vector<256x256xbf16>, vector<8x256xf32> -> vector<8x256xf32>
    %c3_319 = arith.constant 3 : index
    %c7_320 = arith.constant 7 : index
    %c0_321 = arith.constant 0 : index
    %c0_322 = arith.constant 0 : index
    %329 = vector.load %arg6[%c3_319, %c7_320, %c0_321, %c0_322] : memref<4x9x16x16xbf16, #tpu.memory_space<vmem>>, vector<1x1x16x16xbf16>
    %330 = vector.shape_cast %329 : vector<1x1x16x16xbf16> to vector<16x16xbf16>
    %331 = vector.extract_strided_slice %330 {offsets = [0, 0], sizes = [3, 8], strides = [1, 1]} : vector<16x16xbf16> to vector<3x8xbf16>
    %332 = arith.truncf %328 : vector<8x256xf32> to vector<8x256xbf16>
    %cst_323 = arith.constant dense<0.000000e+00> : vector<3x256xf32>
    %333 = tpu.matmul %331, %332, %cst_323 {dimension_numbers = #tpu.dot_dimension_numbers<[1], [0], [0], [1], [0, 0, 1, 1], [], []>} : vector<3x8xbf16>, vector<8x256xbf16>, vector<3x256xf32> -> vector<3x256xf32>
    %334 = arith.addf %325, %333 : vector<3x256xf32>
    %c8_324 = arith.constant 8 : index
    %c0_325 = arith.constant 0 : index
    %c0_326 = arith.constant 0 : index
    %335 = vector.load %arg5[%c8_324, %c0_325, %c0_326] : memref<9x256x256xbf16, #tpu.memory_space<vmem>>, vector<1x256x256xbf16>
    %336 = vector.shape_cast %335 : vector<1x256x256xbf16> to vector<256x256xbf16>
    %cst_327 = arith.constant dense<0.000000e+00> : vector<8x256xf32>
    %337 = tpu.matmul %261, %336, %cst_327 {dimension_numbers = #tpu.dot_dimension_numbers<[1], [0], [0], [1], [0, 0, 1, 1], [], []>} : vector<8x256xbf16>, vector<256x256xbf16>, vector<8x256xf32> -> vector<8x256xf32>
    %c3_328 = arith.constant 3 : index
    %c8_329 = arith.constant 8 : index
    %c0_330 = arith.constant 0 : index
    %c0_331 = arith.constant 0 : index
    %338 = vector.load %arg6[%c3_328, %c8_329, %c0_330, %c0_331] : memref<4x9x16x16xbf16, #tpu.memory_space<vmem>>, vector<1x1x16x16xbf16>
    %339 = vector.shape_cast %338 : vector<1x1x16x16xbf16> to vector<16x16xbf16>
    %340 = vector.extract_strided_slice %339 {offsets = [0, 0], sizes = [3, 8], strides = [1, 1]} : vector<16x16xbf16> to vector<3x8xbf16>
    %341 = arith.truncf %337 : vector<8x256xf32> to vector<8x256xbf16>
    %cst_332 = arith.constant dense<0.000000e+00> : vector<3x256xf32>
    %342 = tpu.matmul %340, %341, %cst_332 {dimension_numbers = #tpu.dot_dimension_numbers<[1], [0], [0], [1], [0, 0, 1, 1], [], []>} : vector<3x8xbf16>, vector<8x256xbf16>, vector<3x256xf32> -> vector<3x256xf32>
    %343 = arith.addf %334, %342 : vector<3x256xf32>
    %c3_333 = arith.constant 3 : index
    %c0_334 = arith.constant 0 : index
    %c0_335 = arith.constant 0 : index
    %344 = vector.load %arg7[%c3_333, %c0_334, %c0_335] : memref<4x16x1xf32, #tpu.memory_space<vmem>>, vector<1x16x1xf32>
    %345 = vector.shape_cast %344 : vector<1x16x1xf32> to vector<16x1xf32>
    %346 = vector.extract_strided_slice %345 {offsets = [0, 0], sizes = [3, 1], strides = [1, 1]} : vector<16x1xf32> to vector<3x1xf32>
    %347 = vector.broadcast %346 : vector<3x1xf32> to vector<3x256xf32>
    %348 = arith.addf %343, %347 : vector<3x256xf32>
    %c0_336 = arith.constant 0 : index
    %c0_337 = arith.constant 0 : index
    %c0_338 = arith.constant 0 : index
    %349 = vector.load %arg8[%c0_336, %c0_337, %c0_338] : memref<1x3x256xf32, #tpu.memory_space<vmem>>, vector<1x3x256xf32>
    %350 = vector.shape_cast %349 : vector<1x3x256xf32> to vector<3x256xf32>
    %351 = vector.shape_cast %348 : vector<3x256xf32> to vector<1x3x256xf32>
    tpu.vector_store %arg8[%c0_336, %c0_337, %c0_338], %351 {strides = array<i32>} : memref<1x3x256xf32, #tpu.memory_space<vmem>>, vector<1x3x256xf32>,
    return
  }
  func.func @transform_0(%arg0: i32) -> (i32, i32, i32) {
    %c0_i32 = arith.constant 0 : i32
    %c0_i32_0 = arith.constant 0 : i32
    %c0_i32_1 = arith.constant 0 : i32
    return %arg0, %c0_i32, %c0_i32_0 : i32, i32, i32
  }
  func.func @transform_1(%arg0: i32) -> (i32, i32, i32) {
    %c0_i32 = arith.constant 0 : i32
    %c0_i32_0 = arith.constant 0 : i32
    %c0_i32_1 = arith.constant 0 : i32
    %c0_i32_2 = arith.constant 0 : i32
    return %c0_i32, %c0_i32_0, %c0_i32_1 : i32, i32, i32
  }
  func.func @transform_2(%arg0: i32) -> (i32, i32, i32) {
    %c0_i32 = arith.constant 0 : i32
    %c0_i32_0 = arith.constant 0 : i32
    %c0_i32_1 = arith.constant 0 : i32
    %c0_i32_2 = arith.constant 0 : i32
    return %c0_i32, %c0_i32_0, %c0_i32_1 : i32, i32, i32
  }
  func.func @transform_3(%arg0: i32) -> (i32, i32, i32) {
    %c0_i32 = arith.constant 0 : i32
    %c0_i32_0 = arith.constant 0 : i32
    %c0_i32_1 = arith.constant 0 : i32
    %c0_i32_2 = arith.constant 0 : i32
    return %c0_i32, %c0_i32_0, %c0_i32_1 : i32, i32, i32
  }
  func.func @transform_4(%arg0: i32) -> (i32, i32, i32) {
    %c0_i32 = arith.constant 0 : i32
    %c0_i32_0 = arith.constant 0 : i32
    %c0_i32_1 = arith.constant 0 : i32
    %c0_i32_2 = arith.constant 0 : i32
    return %c0_i32, %c0_i32_0, %c0_i32_1 : i32, i32, i32
  }
  func.func @transform_5(%arg0: i32) -> (i32, i32, i32, i32) {
    %c0_i32 = arith.constant 0 : i32
    %c0_i32_0 = arith.constant 0 : i32
    %c0_i32_1 = arith.constant 0 : i32
    %c0_i32_2 = arith.constant 0 : i32
    %c0_i32_3 = arith.constant 0 : i32
    return %c0_i32, %c0_i32_0, %c0_i32_1, %c0_i32_2 : i32, i32, i32, i32
  }
  func.func @transform_6(%arg0: i32) -> (i32, i32, i32) {
    %c0_i32 = arith.constant 0 : i32
    %c0_i32_0 = arith.constant 0 : i32
    %c0_i32_1 = arith.constant 0 : i32
    %c0_i32_2 = arith.constant 0 : i32
    return %c0_i32, %c0_i32_0, %c0_i32_1 : i32, i32, i32
  }
  func.func @transform_7(%arg0: i32) -> (i32, i32, i32) {
    %c0_i32 = arith.constant 0 : i32
    %c0_i32_0 = arith.constant 0 : i32
    %c0_i32_1 = arith.constant 0 : i32
    return %arg0, %c0_i32, %c0_i32_0 : i32, i32, i32
  }
}

</mosaic_0001>

<bundles_post_ra>
// kernel: tpu_custom_call.1
= control target key start
LH: loop header
LB: loop body
LE: loop exit
PB: predicated region body
PF: predicated region fallthrough
CT: control target
= control target key end

     0   :  { %12 = vsyncpa [#allocation3], 0  ;;  %s8546_s0 = inlined_call_operand.hbm [shape: bf16[2,16,16], index: 0, kind: input, shape index: {}]   ;;  %s8547_s1 = inlined_call_operand.hbm [shape: bf16[9,16,16], index: 1, kind: input, shape index: {}]   ;;  %s8548_s2 = inlined_call_operand.hbm [shape: bf16[9,16,64], index: 2, kind: input, shape index: {}]   ;;  %s8549_s3 = inlined_call_operand.hbm [shape: bf16[9,64,256], index: 3, kind: input, shape index: {}]   ;;  %s8550_s4 = inlined_call_operand.hbm [shape: bf16[9,256,256], index: 4, kind: input, shape index: {}]   ;;  %s8551_s5 = inlined_call_operand.hbm [shape: bf16[4,9,16,16], index: 5, kind: input, shape index: {}]   ;;  %s8552_s6 = inlined_call_operand.vmem [shape: f32[4,16,1], index: 6, kind: input, shape index: {}]   ;;  %s8553_s7 = inlined_call_operand.vmem [shape: f32[2,3,256], index: 7, kind: output, shape index: {}]  }
   0x1   :  { %14 = vsyncpa [#allocation3 + $0x1], 0 }
   0x2   :  { %15 = vsyncpa [#allocation5], 0 }
   0x3   :  { %16 = vsyncpa [#allocation8], 0 }
   0x4   :  { %17 = vsyncpa [#allocation11], 0  ;;  %s7995_s24 = smov 0   ;;  %s7997_s25 = smov 0  }
   0x5   :  { %s7999_s26 = smov 0   ;;  %s8001_s27 = smov 0  }
   0x6 LB: > { %s7942_s28 = smov [#allocation4]   ;;  %s8016_s30 = sadd.s32 4294967295, %s7940_s27   ;;  %s7940_s27 = sphi %s8001_s27, %s8573_s27   ;;  %s7936_s26 = sphi %s7999_s26, %s8572_s26   ;;  %s7932_s25 = sphi %s7997_s25, %s8571_s25   ;;  %s7928_s24 = sphi %s7995_s24, %s8570_s24  }
   0x7   : > { %s218_s29 = sshll.u32 %s7942_s28, 4  ;;  %p6286_p0 = scmp.ge.s32.totalorder %s7940_s27, 1  ;;  %s219_s29 = int_to_ptr.vmem [resolvable:$true] %s218_s29 }
   0x8   : > { %p8554_p1 = scmp.eq.s32.totalorder %s8016_s30, 0  ;;  %p206_p2 = scmp.lt.s32.totalorder %s7940_s27, 3 }
   0x9   : > { %s7943_s9 = smov [#allocation7]   ;;  %s7944_s12 = smov [#allocation6]  }
   0xa   : > { %p8021_p3 = pnand %p6286_p0, %p206_p2  ;;  %s244_s10 = sshll.u32 %s7943_s9, 4  ;;  %s8033_s10 = int_to_ptr.vmem [resolvable:$true] %s244_s10 }
   0xb   : > { %s8035_s13 = sshll.u32 %s7944_s12, 4  ;;  %s7747_s15 = scalar_lea.vmem %s219_s29, 1152  ;;  %s232_s13 = int_to_ptr.vmem [resolvable:$true] %s8035_s13 }
   0xc   : > { %s8557_s8 = scalar_select %p8021_p3, 1, 0 }
   0xd   : > { %p7091_p4 = pneg %p8021_p3  ;;  %p7748_p7 = scmp.ne.s32.totalorder %s219_s29, %s7747_s15 }
   0xe   : > { %p7755_p10 = scmp.lt.s32.totalorder %s219_s29, %s219_s29  ;;  %p7756_p11 = scmp.lt.s32.totalorder %s7747_s15, %s7747_s15 }
   0xf   : > { %p8029_p5 = pnand %p7091_p4, %p8554_p1 }
  0x10   : > { %p7757_p12 = por %p7756_p11, %p7755_p10 }
  0x11   : > { %p8039_p6 = pneg %p8029_p5 }
  0x13   : > { %p7750_p8 = pnand %p7748_p7, %p8039_p6 }
  0x15   : > { %p7751_p9 = pneg %p7750_p8 }
  0x17   : > { %p7758_p13 = pnand %p7757_p12, %p7751_p9 }
  0x19   : > { %7761 = shalt.err (!%p7758_p13)
}
  0x1a   : > { %s7945_s16 = smov 64   ;;  %s7946_s17 = smov 4  }
  0x1b   : > { %7094 = dma.hbm_to_vmem [thread:$0]  (!%p8029_p5), %s8547_s1, 1152, %s219_s29, [#allocation5], %s7945_s16, %s7945_s16, %s7946_s17  }
  0x1c   : > { %s7773_s20 = scalar_lea.vmem %s8033_s10, 9216  ;;  %p7781_p7 = scmp.lt.s32.totalorder %s8033_s10, %s8033_s10 }
  0x1d   : > { %p7774_p0 = scmp.ne.s32.totalorder %s8033_s10, %s7773_s20  ;;  %p7782_p8 = scmp.lt.s32.totalorder %s7773_s20, %s7773_s20 }
  0x1f   : > { %p7776_p2 = pnand %p7774_p0, %p8039_p6  ;;  %p7783_p9 = por %p7782_p8, %p7781_p7 }
  0x21   : > { %p7777_p4 = pneg %p7776_p2 }
  0x23   : > { %p7784_p10 = pnand %p7783_p9, %p7777_p4 }
  0x25   : > { %7787 = shalt.err (!%p7784_p10)
}
  0x26   : > { %s7947_s21 = smov 128   ;;  %s7948_s22 = smov 8  }
  0x27   : > { %7100 = dma.hbm_to_vmem [thread:$0]  (!%p8029_p5), %s8549_s3, 9216, %s8033_s10, [#allocation8], %s7947_s21, %s7947_s21, %s7948_s22  }
  0x28   : > { %s7799_s29 = scalar_lea.vmem %s232_s13, 1152  ;;  %p7807_p0 = scmp.lt.s32.totalorder %s232_s13, %s232_s13 }
  0x29   : > { %p7800_p11 = scmp.ne.s32.totalorder %s232_s13, %s7799_s29  ;;  %p7808_p2 = scmp.lt.s32.totalorder %s7799_s29, %s7799_s29 }
  0x2b   : > { %p7802_p12 = pnand %p7800_p11, %p8039_p6  ;;  %p7809_p4 = por %p7808_p2, %p7807_p0 }
  0x2d   : > { %p7803_p13 = pneg %p7802_p12 }
  0x2f   : > { %p7810_p7 = pnand %p7809_p4, %p7803_p13 }
  0x31   : > { %7813 = shalt.err (!%p7810_p7)
}
  0x32   : > { %7097 = dma.hbm_to_vmem [thread:$0]  (!%p8029_p5), %s8548_s2, 1152, %s232_s13, [#allocation5], %s7945_s16, %s7945_s16, %s7946_s17  }
  0x33   : > { %s7949_s10 = smov [#allocation9]   ;;  %s7950_s18 = smov [#allocation10]  }
  0x34   : > { %s257_s15 = sshll.u32 %s7949_s10, 4  ;;  %s270_s19 = sshll.u32 %s7950_s18, 4  ;;  %s258_s15 = int_to_ptr.vmem [resolvable:$true] %s257_s15  ;;  %s271_s19 = int_to_ptr.vmem [resolvable:$true] %s270_s19 }
  0x35   : > { %s7825_s20 = scalar_lea.vmem %s258_s15, 36864  ;;  %p7833_p11 = scmp.lt.s32.totalorder %s258_s15, %s258_s15 }
  0x36   : > { %p7826_p8 = scmp.ne.s32.totalorder %s258_s15, %s7825_s20  ;;  %p7834_p12 = scmp.lt.s32.totalorder %s7825_s20, %s7825_s20 }
  0x38   : > { %p7828_p9 = pnand %p7826_p8, %p8039_p6  ;;  %p7835_p13 = por %p7834_p12, %p7833_p11 }
  0x3a   : > { %p7829_p10 = pneg %p7828_p9 }
  0x3c   : > { %p7836_p0 = pnand %p7835_p13, %p7829_p10 }
  0x3e   : > { %7839 = shalt.err (!%p7836_p0)
}
  0x3f   : > { %7103 = dma.hbm_to_vmem [thread:$0]  (!%p8029_p5), %s8550_s4, 36864, %s258_s15, [#allocation8], %s7947_s21, %s7947_s21, %s7948_s22  }
  0x40   : > { %s7851_s28 = scalar_lea.vmem %s271_s19, 4608  ;;  %p7859_p8 = scmp.lt.s32.totalorder %s271_s19, %s271_s19 }
  0x41   : > { %p7852_p2 = scmp.ne.s32.totalorder %s271_s19, %s7851_s28  ;;  %p7860_p9 = scmp.lt.s32.totalorder %s7851_s28, %s7851_s28 }
  0x43   : > { %p7854_p4 = pnand %p7852_p2, %p8039_p6  ;;  %p7861_p10 = por %p7860_p9, %p7859_p8 }
  0x45   : > { %p7855_p7 = pneg %p7854_p4 }
  0x47   : > { %p7862_p11 = pnand %p7861_p10, %p7855_p7 }
  0x49   : > { %7865 = shalt.err (!%p7862_p11)
}
  0x4a   : > { %7106 = dma.hbm_to_vmem [thread:$0]  (!%p8029_p5), %s8551_s5, 4608, %s271_s19, [#allocation11], %s7945_s16, %s7945_s16, %s7946_s17  }
  0x4b   : > { %s8100_s11 = sadd.s32 1, %s7940_s27   ;;  %s30_s21 = sadd.s32 1, %s7936_s26 }
  0x4c   : > { %s27_s14 = ssub.s32 %s7940_s27, %s8100_s11  ;;  %p37_p12 = scmp.ne.s32.totalorder %s7936_s26, %s7932_s25 }
  0x4d   : > { %p28_p6 = scmp.eq.s32.totalorder %s27_s14, 0  ;;  %p38_p13 = scmp.eq.s32.totalorder %s7940_s27, 0 }
  0x4e   : > { %p43_p0 = scmp.ne.s32.totalorder %s7932_s25, %s7928_s24  ;;  %p7116_p7 = scmp.lt.s32.totalorder %s7940_s27, 2 }
  0x4f   : > { %s8111_s22 = scalar_select %p28_p6, %s7936_s26, %s30_s21  }
  0x50   : > { %p39_p2 = por %p38_p13, %p37_p12  ;;  %p8115_p4 = por %p8554_p1, %p43_p0 }
  0x51   : > { %s287_s10 = sand.u32 1, %s7936_s26   ;;  %s6779_s18 = sshll.u32 %s7940_s27, 7 }
  0x52   : > { %s8560_s12 = scalar_select %p8115_p4, 1, 0 }
  0x53   : > { %s6293_s15 = sshll.u32 %s287_s10, 3  ;;  %s8125_s13 = scalar_lea.hbm %s8546_s0, %s6779_s18 }
  0x54   : > { %s291_s24 = scalar_lea.vmem [#allocation2], %s6293_s15  ;;  %p8129_p5 = pnand %p7116_p7, %p39_p2 }
  0x55   : > { %s298_s23 = sshll.u32 %s291_s24, 4  ;;  %s8133_s29 = scalar_lea.sflag [#allocation3], %s287_s10  ;;  %s8127_s23 = int_to_ptr.vmem [resolvable:$true] %s298_s23 }
  0x56   : > { %s7866_s27 = scalar_lea.hbm %s8125_s13, 128  ;;  %p7868_p9 = pneg %p8129_p5 }
  0x57   : > { %p7867_p8 = scmp.ne.s32.totalorder %s8125_s13, %s7866_s27  ;;  %s7871_s21 = scalar_lea.hbm %s8546_s0, 256 }
  0x58   : > { %p7872_p6 = scmp.lt.s32.totalorder %s8125_s13, %s8546_s0  ;;  %p7873_p12 = scmp.lt.s32.totalorder %s7871_s21, %s7866_s27 }
  0x59   : > { %p7869_p10 = pnand %p7868_p9, %p7867_p8 }
  0x5a   : > { %p7874_p13 = por %p7873_p12, %p7872_p6 }
  0x5b   : > { %p7870_p11 = pneg %p7869_p10 }
  0x5d   : > { %p7875_p0 = pnand %p7874_p13, %p7870_p11 }
  0x5f   : > { %7878 = shalt.err (!%p7875_p0)
}
  0x60   : > { %s7879_s10 = scalar_lea.vmem %s8127_s23, 128  ;;  %s7951_s19 = smov [#allocation2]  }
  0x61   : > { %p7880_p2 = scmp.ne.s32.totalorder %s8127_s23, %s7879_s10  ;;  %s7884_s20 = sshll.u32 %s7951_s19, 4  ;;  %s7885_s20 = int_to_ptr.vmem [resolvable:$false] %s7884_s20 }
  0x62   : > { %s7886_s24 = scalar_lea.vmem %s7885_s20, 256  ;;  %p7887_p10 = scmp.lt.s32.totalorder %s8127_s23, %s7885_s20 }
  0x63   : > { %p7882_p7 = pnand %p7880_p2, %p7868_p9  ;;  %p7888_p1 = scmp.lt.s32.totalorder %s7886_s24, %s7879_s10 }
  0x65   : > { %p7883_p8 = pneg %p7882_p7  ;;  %p7889_p4 = por %p7888_p1, %p7887_p10 }
  0x67   : > { %p7890_p3 = pnand %p7889_p4, %p7883_p8 }
  0x69   : > { %7893 = shalt.err (!%p7890_p3)
}
  0x6a   : > { %7110 = dma.hbm_to_vmem [thread:$0]  (!%p8129_p5), %s8125_s13, 128, %s8127_s23, %s8133_s29, %s7945_s16, %s7945_s16, %s7946_s17  }
  0x6b   : > { %p8562_p9 = scmp.ne.s32.totalorder %s8557_s8, 0 }
  0x6c   : > { %s312_s27 = sand.u32 (!%p8562_p9), 1, %s7932_s25   ;;  %p8563_p1 = scmp.ne.s32.totalorder (!%p8562_p9), %s8560_s12, 0 }
  0x6d   : > { %310 = sbr.rel (%p8562_p9) target bundleno = 5662 (0x161e), region = 48  ;;  %s6297_s9 = sshll.u32 (!%p8562_p9), %s312_s27, 3 }
  0x6e   : > { %s313_s14 = scalar_lea.sflag (!%p8562_p9), [#allocation3], %s312_s27  ;;  %s316_s21 = scalar_lea.vmem (!%p8562_p9), [#allocation2], %s6297_s9 }
  0x72   : > { %7911 = dma.done.wait (%p8563_p1), %s313_s14, 128  }
  0x73   : > { %7913 = vsyncadd (%p8563_p1), %s313_s14, 4294967168  ;;  %p8564_p3 = scmp.eq.s32.totalorder %s8016_s30, 0 }
  0x75   : > { %7915 = dma.done.wait (%p8564_p3), [#allocation5], 2304   ;;  %p8565_p4 = pmov %p8564_p3 }
  0x76   : > { %p8566_p5 = pmov %p8564_p3 }
  0x77   : > { %7917 = vsyncadd (%p8565_p4), [#allocation5], 4294964992 }
  0x78   : > { %7919 = dma.done.wait (%p8566_p5), [#allocation8], 46080   ;;  %p8567_p11 = pmov %p8564_p3 }
  0x79   : > { %p8568_p6 = pmov %p8564_p3 }
  0x7a   : > { %7921 = vsyncadd (%p8567_p11), [#allocation8], 4294921216 }
  0x7b   : > { %7923 = dma.done.wait (%p8568_p6), [#allocation11], 4608   ;;  %p8569_p12 = pmov %p8564_p3 }
  0x7c   : > { %v7952_v0 = vmov 0.0   ;;  %vm7953_vm0 = vmmov 0   ;;  %v7168_v1 = vld [vmem:[#allocation4] sm:$0xff]   ;;  %v8182_v2 = vld [vmem:[%s316_s21] sm:$0xff]   ;;  %vm388_vm1 = vcmask 130048   ;;  %v7170_v3 = vld [vmem:[#allocation4 + $0x8] sm:$0xff]  }
  0x7d   : > { %7925 = vsyncadd (%p8569_p12), [#allocation11], 4294962688  ;;  %6853 = vmatprep.subr.bf16.mxu0 %v7952_v0  ;;  %6855 = vmatprep.mubr.msk.bf16.mxu0 %vm7953_vm0, %v7952_v0  ;;  %v7172_v9 = vld [vmem:[#allocation10] sm:$0xff]   ;;  %v7171_v15 = vld [vmem:[#allocation10 + $0x8] sm:$0xff]   ;;  %v7954_v24 = vmov 0   ;;  %vm2271_vm2 = vcmask 523264  }
  0x7e   : > { %6871 = vmatprep.subr.bf16.mxu1 %v7952_v0  ;;  %6873 = vmatprep.mubr.msk.bf16.mxu1 %vm7953_vm0, %v7952_v0  ;;  %v7173_v16 = vld [vmem:[#allocation4 + $0x10] sm:$0xff]   ;;  %v7174_v17 = vld [vmem:[#allocation4 + $0x18] sm:$0xff]   ;;  %v7175_v18 = vld [vmem:[#allocation4 + $0x20] sm:$0xff]   ;;  %vm2418_vm3 = vcmask 1043456   ;;  %vm2414_vm4 = vcmask 64512   ;;  %p367_p13 = scmp.lt.s32.totalorder %s8016_s30, 1 }
  0x7f   : > { %6854 = vmatpush3.bf16.msra.mxu0 %v7168_v1  ;;  %v7176_v19 = vld [vmem:[#allocation4 + $0x28] sm:$0xff]   ;;  %v7177_v20 = vld [vmem:[#allocation4 + $0x30] sm:$0xff]   ;;  %v7178_v21 = vld [vmem:[#allocation4 + $0x38] sm:$0xff]   ;;  %7166 = vset.pattern.permute.xlu0 %v7954_v24 }
  0x80   : > { %6859 = vmatprep.subr.bf16.mxu0 %v7952_v0  ;;  %v7179_v22 = vld [vmem:[#allocation4 + $0x40] sm:$0xff]   ;;  %v1323_v23 = vld [vmem:[%s8552_s6] sm:$0xff]  ;;  %7167 = vset.pattern.permute.xlu1 %v7954_v24  ;;  %v1324_v25 = vld [vmem:[%s8552_s6 + $0x8] sm:$0xff]  ;;  %s8575_s30 = smov (!%p367_p13, %s8016_s30), 1 }
  0x81   : > { %1327 = vperm.xlu0 %7166, %v1323_v23   ;;  %v6776_v26 = vld [vmem:[%s8552_s6 + $0x30] sm:$0xff]  ;;  %v7181_v48 = vld [vmem:[#allocation10 + $0x18] sm:$0xff]   ;;  %v7182_v54 = vld [vmem:[#allocation10 + $0x20] sm:$0xff]   ;;  %s6780_s10 = sshll.u32 %s8575_s30, 3 }
  0x82   : > { %6856 = vmatmul.mubr.msk.bf16.vlgmr.msra.gmra.mxu0 %vm388_vm1, %v8182_v2  ;;  %v7180_v42 = vld [vmem:[#allocation10 + $0x10] sm:$0xff]   ;;  %v7183_v60 = vld [vmem:[#allocation10 + $0x28] sm:$0xff]   ;;  %s371_s24 = scalar_lea.vmem %s8553_s7, %s6780_s10 }
  0x83   : > { %6860 = vmatpush3.bf16.msra.mxu0 %v7170_v3  ;;  %6861 = vmatprep.mubr.msk.bf16.mxu0 %vm7953_vm0, %v7952_v0  ;;  %v7184_v3 = vld [vmem:[#allocation10 + $0x30] sm:$0xff]  }
  0x84   : > { %6865 = vmatprep.subr.bf16.mxu0 %v7952_v0 }
  0x85   : > { %1332 = vperm.xlu0 %7166, %v1324_v25  }
  0x89   : > { %6160 = vperm.xlu0 %7166, %v6776_v26  }
  0x8a   : > { %6862 = vmatmul.mubr.msk.bf16.vlgmr.msra.gmra.mxu0 %vm388_vm1, %v8182_v2 }
  0x8b   : > { %6867 = vmatprep.mubr.msk.bf16.mxu0 %vm7953_vm0, %v7952_v0 }
 0x142   : > { %v426_v4 = vpop.f32.mrf.mxu0 }
 0x144   : > { %v6857_v5 = vpop.f32.mrf.mxu0 }
 0x146   : > { %v429_v6 = vpop.f32.mrf.mxu0 }
 0x147   : > { %v435_v7 = vpack.c.bf16 %v429_v6, %v426_v4 }
 0x148   : > { %v6858_v8 = vpop.f32.mrf.mxu0 }
 0x149   : > { %6872 = vmatpush3.bf16.msra.mxu1 %v435_v7 }
 0x14a   : > { %v479_v10 = vpop.f32.mrf.mxu0  ;;  %6883 = vmatprep.subr.bf16.mxu1 %v7952_v0 }
 0x14c   : > { %v6863_v11 = vpop.f32.mrf.mxu0  ;;  %6874 = vmatmul.mubr.msk.bf16.vlgmr.msra.gmra.mxu1 %vm388_vm1, %v7172_v9  ;;  %v7185_v9 = vld [vmem:[#allocation10 + $0x38] sm:$0xff]  }
 0x14d   : > { %6885 = vmatprep.mubr.msk.bf16.mxu1 %vm7953_vm0, %v7952_v0 }
 0x14e   : > { %v482_v12 = vpop.f32.mrf.mxu0 }
 0x14f   : > { %v489_v13 = vpack.c.bf16 %v482_v12, %v479_v10 }
 0x150   : > { %v6864_v14 = vpop.f32.mrf.mxu0 }
 0x151   : > { %6866 = vmatpush3.bf16.msra.mxu0 %v489_v13 }
 0x152   : > { %6877 = vmatprep.subr.bf16.mxu0 %v7952_v0 }
 0x154   : > { %6868 = vmatmul.mubr.msk.bf16.vlgmr.msra.gmra.mxu0 %vm388_vm1, %v7171_v15  ;;  %v7186_v15 = vld [vmem:[#allocation10 + $0x40] sm:$0xff]  }
 0x155   : > { %6878 = vmatpush3.bf16.msra.mxu0 %v7173_v16  ;;  %6879 = vmatprep.mubr.msk.bf16.mxu0 %vm7953_vm0, %v7952_v0  ;;  %v7187_v16 = vld [vmem:[#allocation6] sm:$0xff]  }
 0x156   : > { %6889 = vmatprep.subr.bf16.mxu0 %v7952_v0 }
 0x15c   : > { %6880 = vmatmul.mubr.msk.bf16.vlgmr.msra.gmra.mxu0 %vm388_vm1, %v8182_v2 }
 0x15d   : > { %6890 = vmatpush3.bf16.msra.mxu0 %v7174_v17  ;;  %6891 = vmatprep.mubr.msk.bf16.mxu0 %vm7953_vm0, %v7952_v0  ;;  %v7188_v17 = vld [vmem:[#allocation6 + $0x8] sm:$0xff]  }
 0x15e   : > { %6901 = vmatprep.subr.bf16.mxu0 %v7952_v0 }
 0x164   : > { %6892 = vmatmul.mubr.msk.bf16.vlgmr.msra.gmra.mxu0 %vm388_vm1, %v8182_v2 }
 0x165   : > { %6902 = vmatpush3.bf16.msra.mxu0 %v7175_v18  ;;  %6903 = vmatprep.mubr.msk.bf16.mxu0 %vm7953_vm0, %v7952_v0 }
 0x166   : > { %6913 = vmatprep.subr.bf16.mxu0 %v7952_v0 }
 0x16c   : > { %6904 = vmatmul.mubr.msk.bf16.vlgmr.msra.gmra.mxu0 %vm388_vm1, %v8182_v2 }
 0x16d   : > { %6914 = vmatpush3.bf16.msra.mxu0 %v7176_v19  ;;  %6915 = vmatprep.mubr.msk.bf16.mxu0 %vm7953_vm0, %v7952_v0 }
 0x16e   : > { %6925 = vmatprep.subr.bf16.mxu0 %v7952_v0 }
 0x174   : > { %6916 = vmatmul.mubr.msk.bf16.vlgmr.msra.gmra.mxu0 %vm388_vm1, %v8182_v2 }
 0x175   : > { %6926 = vmatpush3.bf16.msra.mxu0 %v7177_v20  ;;  %6927 = vmatprep.mubr.msk.bf16.mxu0 %vm7953_vm0, %v7952_v0 }
 0x176   : > { %6937 = vmatprep.subr.bf16.mxu0 %v7952_v0 }
 0x17c   : > { %6928 = vmatmul.mubr.msk.bf16.vlgmr.msra.gmra.mxu0 %vm388_vm1, %v8182_v2 }
 0x17d   : > { %6938 = vmatpush3.bf16.msra.mxu0 %v7178_v21  ;;  %6939 = vmatprep.mubr.msk.bf16.mxu0 %vm7953_vm0, %v7952_v0 }
 0x17e   : > { %6949 = vmatprep.subr.bf16.mxu0 %v7952_v0 }
 0x184   : > { %6940 = vmatmul.mubr.msk.bf16.vlgmr.msra.gmra.mxu0 %vm388_vm1, %v8182_v2 }
 0x185   : > { %6950 = vmatpush3.bf16.msra.mxu0 %v7179_v22  ;;  %6951 = vmatprep.mubr.msk.bf16.mxu0 %vm7953_vm0, %v7952_v0 }
 0x186   : > { %6961 = vmatprep.subr.bf16.mxu0 %v7952_v0 }
 0x18c   : > { %6952 = vmatmul.mubr.msk.bf16.vlgmr.msra.gmra.mxu0 %vm388_vm1, %v8182_v2 }
 0x18d   : > { %6963 = vmatprep.mubr.msk.bf16.mxu0 %vm7953_vm0, %v7952_v0  ;;  %6962 = vmatpush3.bf16.msra.mxu0 %v7187_v16  ;;  %v1393_v16 = vld [vmem:[#allocation10 + $0x48] sm:$0xf] }
 0x18e   : > { %6973 = vmatprep.subr.bf16.mxu0 %v7952_v0 }
 0x20c   : > { %v581_v27 = vpop.f32.mrf.mxu1 }
 0x20e   : > { %v6875_v28 = vpop.f32.mrf.mxu1 }
 0x210   : > { %v584_v29 = vpop.f32.mrf.mxu1 }
 0x212   : > { %v6876_v30 = vpop.f32.mrf.mxu1 }
 0x214   : > { %v532_v31 = vpop.f32.mrf.mxu0 }
 0x215   : > { %v8248_v32 = vadd.f32 %v581_v27, %v532_v31 }
 0x216   : > { %v6869_v33 = vpop.f32.mrf.mxu0 }
 0x218   : > { %v535_v34 = vpop.f32.mrf.mxu0 }
 0x219   : > { %v8250_v35 = vadd.f32 %v584_v29, %v535_v34 }
 0x21a   : > { %v6870_v36 = vpop.f32.mrf.mxu0 }
 0x21c   : > { %v631_v37 = vpop.f32.mrf.mxu0 }
 0x21e   : > { %v6881_v38 = vpop.f32.mrf.mxu0 }
 0x220   : > { %v634_v39 = vpop.f32.mrf.mxu0 }
 0x221   : > { %v641_v40 = vpack.c.bf16 %v634_v39, %v631_v37 }
 0x222   : > { %v6882_v41 = vpop.f32.mrf.mxu0 }
 0x223   : > { %6884 = vmatpush3.bf16.msra.mxu1 %v641_v40 }
 0x224   : > { %v736_v43 = vpop.f32.mrf.mxu0  ;;  %6895 = vmatprep.subr.bf16.mxu1 %v7952_v0 }
 0x226   : > { %6886 = vmatmul.mubr.msk.bf16.vlgmr.msra.gmra.mxu1 %vm388_vm1, %v7180_v42  ;;  %v6893_v44 = vpop.f32.mrf.mxu0 }
 0x227   : > { %6897 = vmatprep.mubr.msk.bf16.mxu1 %vm7953_vm0, %v7952_v0 }
 0x228   : > { %v739_v45 = vpop.f32.mrf.mxu0 }
 0x229   : > { %v746_v46 = vpack.c.bf16 %v739_v45, %v736_v43 }
 0x22a   : > { %v6894_v47 = vpop.f32.mrf.mxu0 }
 0x22b   : > { %6896 = vmatpush3.bf16.msra.mxu1 %v746_v46 }
 0x22c   : > { %v841_v49 = vpop.f32.mrf.mxu0  ;;  %6907 = vmatprep.subr.bf16.mxu1 %v7952_v0 }
 0x22e   : > { %6898 = vmatmul.mubr.msk.bf16.vlgmr.msra.gmra.mxu1 %vm388_vm1, %v7181_v48  ;;  %v6905_v50 = vpop.f32.mrf.mxu0 }
 0x22f   : > { %6909 = vmatprep.mubr.msk.bf16.mxu1 %vm7953_vm0, %v7952_v0 }
 0x230   : > { %v844_v51 = vpop.f32.mrf.mxu0 }
 0x231   : > { %v851_v52 = vpack.c.bf16 %v844_v51, %v841_v49 }
 0x232   : > { %v6906_v53 = vpop.f32.mrf.mxu0 }
 0x233   : > { %6908 = vmatpush3.bf16.msra.mxu1 %v851_v52 }
 0x234   : > { %v946_v55 = vpop.f32.mrf.mxu0  ;;  %6919 = vmatprep.subr.bf16.mxu1 %v7952_v0 }
 0x236   : > { %6910 = vmatmul.mubr.msk.bf16.vlgmr.msra.gmra.mxu1 %vm388_vm1, %v7182_v54  ;;  %v6917_v56 = vpop.f32.mrf.mxu0 }
 0x237   : > { %6921 = vmatprep.mubr.msk.bf16.mxu1 %vm7953_vm0, %v7952_v0 }
 0x238   : > { %v949_v57 = vpop.f32.mrf.mxu0 }
 0x239   : > { %v956_v58 = vpack.c.bf16 %v949_v57, %v946_v55  ;;  %v1328_v55 = vpop.permute.xlu0 %1327 }
 0x23a   : > { %v6918_v59 = vpop.f32.mrf.mxu0 }
 0x23b   : > { %6920 = vmatpush3.bf16.msra.mxu1 %v956_v58 }
 0x23c   : > { %v1051_v61 = vpop.f32.mrf.mxu0  ;;  %6931 = vmatprep.subr.bf16.mxu1 %v7952_v0 }
 0x23e   : > { %6922 = vmatmul.mubr.msk.bf16.vlgmr.msra.gmra.mxu1 %vm388_vm1, %v7183_v60  ;;  %v6929_v62 = vpop.f32.mrf.mxu0 }
 0x23f   : > { %6933 = vmatprep.mubr.msk.bf16.mxu1 %vm7953_vm0, %v7952_v0 }
 0x240   : > { %v1054_v63 = vpop.f32.mrf.mxu0 }
 0x241   : > { %v1061_v1 = vpack.c.bf16 %v1054_v63, %v1051_v61 }
 0x242   : > { %v6930_v2 = vpop.f32.mrf.mxu0 }
 0x243   : > { %6932 = vmatpush3.bf16.msra.mxu1 %v1061_v1 }
 0x244   : > { %v1156_v4 = vpop.f32.mrf.mxu0  ;;  %6943 = vmatprep.subr.bf16.mxu1 %v7952_v0 }
 0x246   : > { %6934 = vmatmul.mubr.msk.bf16.vlgmr.msra.gmra.mxu1 %vm388_vm1, %v7184_v3  ;;  %v6941_v5 = vpop.f32.mrf.mxu0 }
 0x247   : > { %6945 = vmatprep.mubr.msk.bf16.mxu1 %vm7953_vm0, %v7952_v0 }
 0x248   : > { %v1159_v6 = vpop.f32.mrf.mxu0 }
 0x249   : > { %v1166_v7 = vpack.c.bf16 %v1159_v6, %v1156_v4 }
 0x24a   : > { %v6942_v8 = vpop.f32.mrf.mxu0 }
 0x24b   : > { %6944 = vmatpush3.bf16.msra.mxu1 %v1166_v7 }
 0x24c   : > { %v1261_v10 = vpop.f32.mrf.mxu0  ;;  %6955 = vmatprep.subr.bf16.mxu1 %v7952_v0 }
 0x24e   : > { %6946 = vmatmul.mubr.msk.bf16.vlgmr.msra.gmra.mxu1 %vm388_vm1, %v7185_v9  ;;  %v6953_v11 = vpop.f32.mrf.mxu0 }
 0x24f   : > { %6957 = vmatprep.mubr.msk.bf16.mxu1 %vm7953_vm0, %v7952_v0 }
 0x250   : > { %v1264_v12 = vpop.f32.mrf.mxu0 }
 0x251   : > { %v1271_v13 = vpack.c.bf16 %v1264_v12, %v1261_v10 }
 0x252   : > { %v6954_v14 = vpop.f32.mrf.mxu0 }
 0x253   : > { %6956 = vmatpush3.bf16.msra.mxu1 %v1271_v13 }
 0x254   : > { %6967 = vmatprep.subr.bf16.mxu1 %v7952_v0 }
 0x256   : > { %6958 = vmatmul.mubr.msk.bf16.vlgmr.msra.gmra.mxu1 %vm388_vm1, %v7186_v15  ;;  %v1446_v15 = vld [vmem:[#allocation10 + $0x50] sm:$0xf] }
 0x257   : > { %6969 = vmatprep.mubr.msk.bf16.mxu1 %vm7953_vm0, %v7952_v0  ;;  %6968 = vmatpush3.bf16.msra.mxu1 %v7188_v17  ;;  %v7189_v17 = vld [vmem:[#allocation6 + $0x10] sm:$0xff]  }
 0x258   : > { %6979 = vmatprep.subr.bf16.mxu1 %v7952_v0 }
 0x2e6   : > { %v684_v18 = vpop.f32.mrf.mxu1 }
 0x2e7   : > { %v691_v40 = vadd.f32 %v684_v18, %v8248_v32  ;;  %v7190_v18 = vld [vmem:[#allocation6 + $0x18] sm:$0xff]  }
 0x2e8   : > { %v6887_v19 = vpop.f32.mrf.mxu1 }
 0x2e9   : > { %v7191_v19 = vld [vmem:[#allocation6 + $0x20] sm:$0xff]  }
 0x2ea   : > { %v687_v20 = vpop.f32.mrf.mxu1 }
 0x2eb   : > { %v692_v44 = vadd.f32 %v687_v20, %v8250_v35  ;;  %v1333_v35 = vpop.permute.xlu0 %1332  ;;  %v7192_v20 = vld [vmem:[#allocation6 + $0x28] sm:$0xff]  }
 0x2ec   : > { %v6888_v21 = vpop.f32.mrf.mxu1 }
 0x2ed   : > { %v7193_v21 = vld [vmem:[#allocation6 + $0x30] sm:$0xff]  }
 0x2ee   : > { %v789_v22 = vpop.f32.mrf.mxu1 }
 0x2ef   : > { %v796_v42 = vadd.f32 %v789_v22, %v691_v40  ;;  %v7194_v22 = vld [vmem:[#allocation6 + $0x38] sm:$0xff]  }
 0x2f0   : > { %v6899_v23 = vpop.f32.mrf.mxu1 }
 0x2f1   : > { %v7195_v23 = vld [vmem:[#allocation6 + $0x40] sm:$0xff]  }
 0x2f2   : > { %v792_v25 = vpop.f32.mrf.mxu1 }
 0x2f3   : > { %v797_v47 = vadd.f32 %v792_v25, %v692_v44  ;;  %v6369_v25 = vld [vmem:[%s8552_s6 + $0x10] sm:$0xff] }
 0x2f4   : > { %v6900_v26 = vpop.f32.mrf.mxu1  ;;  %2217 = vperm.xlu1 %7167, %v6369_v25  }
 0x2f5   : > { %v6469_v26 = vld [vmem:[%s8552_s6 + $0x20] sm:$0xff] }
 0x2f6   : > { %v894_v27 = vpop.f32.mrf.mxu1 }
 0x2f7   : > { %v901_v45 = vadd.f32 %v894_v27, %v796_v42 }
 0x2f8   : > { %v6911_v28 = vpop.f32.mrf.mxu1  ;;  %3542 = vperm.xlu1 %7167, %v6469_v26  }
 0x2fa   : > { %v897_v29 = vpop.f32.mrf.mxu1 }
 0x2fb   : > { %v902_v50 = vadd.f32 %v897_v29, %v797_v47 }
 0x2fc   : > { %v6912_v30 = vpop.f32.mrf.mxu1 }
 0x2fe   : > { %v999_v31 = vpop.f32.mrf.mxu1 }
 0x2ff   : > { %v1006_v48 = vadd.f32 %v999_v31, %v901_v45 }
 0x300   : > { %v6923_v33 = vpop.f32.mrf.mxu1 }
 0x302   : > { %v1002_v34 = vpop.f32.mrf.mxu1 }
 0x303   : > { %v1007_v53 = vadd.f32 %v1002_v34, %v902_v50 }
 0x304   : > { %v6924_v36 = vpop.f32.mrf.mxu1 }
 0x306   : > { %v1104_v37 = vpop.f32.mrf.mxu1 }
 0x307   : > { %v1111_v51 = vadd.f32 %v1104_v37, %v1006_v48 }
 0x308   : > { %v6935_v38 = vpop.f32.mrf.mxu1 }
 0x30a   : > { %v1107_v39 = vpop.f32.mrf.mxu1 }
 0x30b   : > { %v1112_v57 = vadd.f32 %v1107_v39, %v1007_v53 }
 0x30c   : > { %v6936_v41 = vpop.f32.mrf.mxu1 }
 0x30e   : > { %v1209_v43 = vpop.f32.mrf.mxu1 }
 0x30f   : > { %v1216_v54 = vadd.f32 %v1209_v43, %v1111_v51  ;;  %v1585_v43 = vld [vmem:[#allocation10 + $0x58] sm:$0xf] }
 0x310   : > { %v6947_v46 = vpop.f32.mrf.mxu1 }
 0x312   : > { %v1212_v49 = vpop.f32.mrf.mxu1 }
 0x313   : > { %v1217_v59 = vadd.f32 %v1212_v49, %v1112_v57  ;;  %v1682_v49 = vld [vmem:[#allocation10 + $0x60] sm:$0xf] }
 0x314   : > { %v6948_v52 = vpop.f32.mrf.mxu1 }
 0x316   : > { %v1314_v56 = vpop.f32.mrf.mxu1 }
 0x317   : > { %v1321_v58 = vadd.f32 %v1314_v56, %v1216_v54 }
 0x318   : > { %v6959_v32 = vpop.f32.mrf.mxu1 }
 0x319   : > { %v1335_v61 = vadd.f32 %v1328_v55, %v1321_v58  ;;  %v1779_v55 = vld [vmem:[#allocation10 + $0x68] sm:$0xf] }
 0x31a   : > { %v1317_v60 = vpop.f32.mrf.mxu1 }
 0x31b   : > { %v1322_v62 = vadd.f32 %v1317_v60, %v1217_v59  ;;  %v1337_v2 = vmax.f32 %v1335_v61, 0.0  ;;  %v1876_v60 = vld [vmem:[#allocation10 + $0x70] sm:$0xf] }
 0x31c   : > { %v6960_v63 = vpop.f32.mrf.mxu1 }
 0x31d   : > { %v1336_v1 = vadd.f32 %v1333_v35, %v1322_v62 }
 0x31f   : > { %v1338_v3 = vmax.f32 %v1336_v1, 0.0 }
 0x321   : > { %v1339_v4 = vpack.c.bf16 %v1338_v3, %v1337_v2  ;;  %v1973_v2 = vld [vmem:[#allocation10 + $0x78] sm:$0xf] }
 0x323   : > { %6964 = vmatmul.mubr.msk.bf16.vlgmr.msra.gmra.mxu0 %vm388_vm1, %v1339_v4  ;;  %6970 = vmatmul.mubr.msk.bf16.vlgmr.msra.gmra.mxu1 %vm388_vm1, %v1339_v4 }
 0x324   : > { %6975 = vmatprep.mubr.msk.bf16.mxu0 %vm7953_vm0, %v7952_v0  ;;  %6981 = vmatprep.mubr.msk.bf16.mxu1 %vm7953_vm0, %v7952_v0 }
 0x3e3   : > { %v1385_v5 = vpop.f32.mrf.mxu0  ;;  %v1438_v6 = vpop.f32.mrf.mxu1 }
 0x3e5   : > { %v6965_v7 = vpop.f32.mrf.mxu0  ;;  %v6971_v8 = vpop.f32.mrf.mxu1 }
 0x3e6   : > { %v2070_v8 = vld [vmem:[#allocation10 + $0x80] sm:$0xf] }
 0x3e7   : > { %v1388_v9 = vpop.f32.mrf.mxu0  ;;  %v1441_v10 = vpop.f32.mrf.mxu1 }
 0x3e8   : > { %v1394_v11 = vpack.c.bf16 %v1388_v9, %v1385_v5  ;;  %v1447_v12 = vpack.c.bf16 %v1441_v10, %v1438_v6 }
 0x3e9   : > { %v6966_v13 = vpop.f32.mrf.mxu0  ;;  %v6972_v14 = vpop.f32.mrf.mxu1 }
 0x3ea   : > { %6974 = vmatpush3.bf16.msra.mxu0 %v1447_v12  ;;  %6980 = vmatpush3.bf16.msra.mxu1 %v1394_v11  ;;  %v2167_v14 = vld [vmem:[#allocation10 + $0x88] sm:$0xf] }
 0x3eb   : > { %6985 = vmatprep.subr.bf16.mxu0 %v7952_v0  ;;  %6991 = vmatprep.subr.bf16.mxu1 %v7952_v0 }
 0x3ed   : > { %6976 = vmatmul.mubr.msk.bf16.vlgmr.msra.gmra.mxu0 %vm388_vm1, %v1446_v15  ;;  %6982 = vmatmul.mubr.msk.bf16.vlgmr.msra.gmra.mxu1 %vm388_vm1, %v1393_v16  ;;  %v7198_v15 = vld [vmem:[#allocation7 + $0x34] ss:$8 sps:$4 sm:$0xff]   ;;  %v7196_v16 = vld [vmem:[#allocation7 + $0x30] ss:$8 sps:$4 sm:$0xff]  }
 0x3ee   : > { %6986 = vmatpush3.bf16.msra.mxu0 %v7189_v17  ;;  %6987 = vmatprep.mubr.msk.bf16.mxu0 %vm7953_vm0, %v7952_v0  ;;  %v7201_v17 = vld [vmem:[#allocation7 + $0x24] ss:$8 sps:$4 sm:$0xff]  }
 0x3ef   : > { %6997 = vmatprep.subr.bf16.mxu0 %v7952_v0  ;;  %6993 = vmatprep.mubr.msk.bf16.mxu1 %vm7953_vm0, %v7952_v0 }
 0x3f5   : > { %6988 = vmatmul.mubr.msk.bf16.vlgmr.msra.gmra.mxu0 %vm388_vm1, %v1339_v4 }
 0x3f6   : > { %6998 = vmatpush3.bf16.msra.mxu0 %v7190_v18  ;;  %6999 = vmatprep.mubr.msk.bf16.mxu0 %vm7953_vm0, %v7952_v0  ;;  %v7199_v18 = vld [vmem:[#allocation7 + $0x20] ss:$8 sps:$4 sm:$0xff]  }
 0x3f7   : > { %7009 = vmatprep.subr.bf16.mxu0 %v7952_v0 }
 0x3fd   : > { %7000 = vmatmul.mubr.msk.bf16.vlgmr.msra.gmra.mxu0 %vm388_vm1, %v1339_v4 }
 0x3fe   : > { %7010 = vmatpush3.bf16.msra.mxu0 %v7191_v19  ;;  %7011 = vmatprep.mubr.msk.bf16.mxu0 %vm7953_vm0, %v7952_v0  ;;  %v7204_v19 = vld [vmem:[#allocation7 + $0x14] ss:$8 sps:$4 sm:$0xff]  }
 0x3ff   : > { %7021 = vmatprep.subr.bf16.mxu0 %v7952_v0 }
 0x405   : > { %7012 = vmatmul.mubr.msk.bf16.vlgmr.msra.gmra.mxu0 %vm388_vm1, %v1339_v4 }
 0x406   : > { %7022 = vmatpush3.bf16.msra.mxu0 %v7192_v20  ;;  %7023 = vmatprep.mubr.msk.bf16.mxu0 %vm7953_vm0, %v7952_v0  ;;  %v7202_v20 = vld [vmem:[#allocation7 + $0x10] ss:$8 sps:$4 sm:$0xff]  }
 0x407   : > { %7033 = vmatprep.subr.bf16.mxu0 %v7952_v0 }
 0x40d   : > { %7024 = vmatmul.mubr.msk.bf16.vlgmr.msra.gmra.mxu0 %vm388_vm1, %v1339_v4 }
 0x40e   : > { %7034 = vmatpush3.bf16.msra.mxu0 %v7193_v21  ;;  %7035 = vmatprep.mubr.msk.bf16.mxu0 %vm7953_vm0, %v7952_v0  ;;  %v7205_v21 = vld [vmem:[#allocation7] ss:$8 sps:$4 sm:$0xff]  }
 0x40f   : > { %7045 = vmatprep.subr.bf16.mxu0 %v7952_v0 }
 0x415   : > { %7036 = vmatmul.mubr.msk.bf16.vlgmr.msra.gmra.mxu0 %vm388_vm1, %v1339_v4 }
 0x416   : > { %7046 = vmatpush3.bf16.msra.mxu0 %v7194_v22  ;;  %7047 = vmatprep.mubr.msk.bf16.mxu0 %vm7953_vm0, %v7952_v0  ;;  %v7210_v22 = vld [vmem:[#allocation7 + $0x74] ss:$8 sps:$4 sm:$0xff]  }
 0x417   : > { %7057 = vmatprep.subr.bf16.mxu0 %v7952_v0 }
 0x41d   : > { %7048 = vmatmul.mubr.msk.bf16.vlgmr.msra.gmra.mxu0 %vm388_vm1, %v1339_v4 }
 0x41e   : > { %7058 = vmatpush3.bf16.msra.mxu0 %v7195_v23  ;;  %7059 = vmatprep.mubr.msk.bf16.mxu0 %vm7953_vm0, %v7952_v0 }
 0x41f   : > { %2283 = vmatprep.subr.bf16.mxu0 %v7198_v15 }
 0x425   : > { %7060 = vmatmul.mubr.msk.bf16.vlgmr.msra.gmra.mxu0 %vm388_vm1, %v1339_v4 }
 0x426   : > { %2307 = vmatprep.mubr.bf16.mxu0 %v7954_v24  ;;  %2284 = vmatpush1.bf16.msra.mxu0 %v7196_v16 }
 0x427   : > { %2285 = vmatprep.subr.bf16.mxu0 %v7201_v17 }
 0x42a   : > { %2286 = vmatpush1.bf16.msra.mxu0 %v7199_v18 }
 0x42b   : > { %2287 = vmatprep.subr.bf16.mxu0 %v7204_v19  ;;  %v7222_v19 = vld [vmem:[#allocation7 + $0xb4] ss:$8 sps:$4 sm:$0xff]  }
 0x42e   : > { %2288 = vmatpush1.bf16.msra.mxu0 %v7202_v20 }
 0x4ad   : > { %v1485_v27 = vpop.f32.mrf.mxu0  ;;  %v1528_v28 = vpop.f32.mrf.mxu1 }
 0x4ae   : > { %v8330_v29 = vadd.f32 %v1528_v28, %v1485_v27 }
 0x4af   : > { %v6977_v30 = vpop.f32.mrf.mxu0  ;;  %v6983_v31 = vpop.f32.mrf.mxu1 }
 0x4b1   : > { %v1488_v33 = vpop.f32.mrf.mxu0  ;;  %v1531_v34 = vpop.f32.mrf.mxu1 }
 0x4b3   : > { %v6978_v36 = vpop.f32.mrf.mxu0  ;;  %v6984_v37 = vpop.f32.mrf.mxu1 }
 0x4b5   : > { %v1577_v38 = vpop.f32.mrf.mxu0 }
 0x4b7   : > { %v6989_v39 = vpop.f32.mrf.mxu0 }
 0x4b9   : > { %v1580_v40 = vpop.f32.mrf.mxu0 }
 0x4ba   : > { %v1586_v41 = vpack.c.bf16 %v1580_v40, %v1577_v38 }
 0x4bb   : > { %v6990_v42 = vpop.f32.mrf.mxu0 }
 0x4bc   : > { %6992 = vmatpush3.bf16.msra.mxu1 %v1586_v41 }
 0x4bd   : > { %v1674_v44 = vpop.f32.mrf.mxu0  ;;  %7003 = vmatprep.subr.bf16.mxu1 %v7952_v0 }
 0x4bf   : > { %6994 = vmatmul.mubr.msk.bf16.vlgmr.msra.gmra.mxu1 %vm388_vm1, %v1585_v43  ;;  %v7001_v45 = vpop.f32.mrf.mxu0 }
 0x4c0   : > { %7005 = vmatprep.mubr.msk.bf16.mxu1 %vm7953_vm0, %v7952_v0 }
 0x4c1   : > { %v1677_v46 = vpop.f32.mrf.mxu0 }
 0x4c2   : > { %v1683_v47 = vpack.c.bf16 %v1677_v46, %v1674_v44 }
 0x4c3   : > { %v7002_v48 = vpop.f32.mrf.mxu0 }
 0x4c4   : > { %7004 = vmatpush3.bf16.msra.mxu1 %v1683_v47 }
 0x4c5   : > { %v1771_v50 = vpop.f32.mrf.mxu0  ;;  %7015 = vmatprep.subr.bf16.mxu1 %v7952_v0 }
 0x4c7   : > { %7006 = vmatmul.mubr.msk.bf16.vlgmr.msra.gmra.mxu1 %vm388_vm1, %v1682_v49  ;;  %v7013_v51 = vpop.f32.mrf.mxu0 }
 0x4c8   : > { %7017 = vmatprep.mubr.msk.bf16.mxu1 %vm7953_vm0, %v7952_v0 }
 0x4c9   : > { %v1774_v52 = vpop.f32.mrf.mxu0 }
 0x4ca   : > { %v1780_v53 = vpack.c.bf16 %v1774_v52, %v1771_v50 }
 0x4cb   : > { %v7014_v54 = vpop.f32.mrf.mxu0 }
 0x4cc   : > { %7016 = vmatpush3.bf16.msra.mxu1 %v1780_v53 }
 0x4cd   : > { %v1868_v56 = vpop.f32.mrf.mxu0  ;;  %7027 = vmatprep.subr.bf16.mxu1 %v7952_v0 }
 0x4cf   : > { %7018 = vmatmul.mubr.msk.bf16.vlgmr.msra.gmra.mxu1 %vm388_vm1, %v1779_v55  ;;  %v7025_v57 = vpop.f32.mrf.mxu0 }
 0x4d0   : > { %7029 = vmatprep.mubr.msk.bf16.mxu1 %vm7953_vm0, %v7952_v0 }
 0x4d1   : > { %v1871_v58 = vpop.f32.mrf.mxu0 }
 0x4d2   : > { %v1877_v32 = vpack.c.bf16 %v1871_v58, %v1868_v56 }
 0x4d3   : > { %v7026_v59 = vpop.f32.mrf.mxu0 }
 0x4d4   : > { %7028 = vmatpush3.bf16.msra.mxu1 %v1877_v32  ;;  %v2218_v32 = vpop.permute.xlu1 %2217 }
 0x4d5   : > { %v1965_v61 = vpop.f32.mrf.mxu0  ;;  %7039 = vmatprep.subr.bf16.mxu1 %v7952_v0 }
 0x4d7   : > { %7030 = vmatmul.mubr.msk.bf16.vlgmr.msra.gmra.mxu1 %vm388_vm1, %v1876_v60  ;;  %v7037_v62 = vpop.f32.mrf.mxu0 }
 0x4d8   : > { %7041 = vmatprep.mubr.msk.bf16.mxu1 %vm7953_vm0, %v7952_v0 }
 0x4d9   : > { %v1968_v35 = vpop.f32.mrf.mxu0 }
 0x4da   : > { %v1974_v63 = vpack.c.bf16 %v1968_v35, %v1965_v61 }
 0x4db   : > { %v7038_v1 = vpop.f32.mrf.mxu0 }
 0x4dc   : > { %7040 = vmatpush3.bf16.msra.mxu1 %v1974_v63  ;;  %v7208_v63 = vld [vmem:[#allocation7 + $0x70] ss:$8 sps:$4 sm:$0xff]   ;;  %v7213_v1 = vld [vmem:[#allocation7 + $0x64] ss:$8 sps:$4 sm:$0xff]  }
 0x4dd   : > { %v2062_v3 = vpop.f32.mrf.mxu0  ;;  %7051 = vmatprep.subr.bf16.mxu1 %v7952_v0 }
 0x4df   : > { %7042 = vmatmul.mubr.msk.bf16.vlgmr.msra.gmra.mxu1 %vm388_vm1, %v1973_v2  ;;  %v7049_v4 = vpop.f32.mrf.mxu0  ;;  %v7211_v2 = vld [vmem:[#allocation7 + $0x60] ss:$8 sps:$4 sm:$0xff]  }
 0x4e0   : > { %7053 = vmatprep.mubr.msk.bf16.mxu1 %vm7953_vm0, %v7952_v0  ;;  %v7214_v4 = vld [vmem:[#allocation7 + $0x50] ss:$8 sps:$4 sm:$0xff]  }
 0x4e1   : > { %v2065_v5 = vpop.f32.mrf.mxu0 }
 0x4e2   : > { %v2071_v6 = vpack.c.bf16 %v2065_v5, %v2062_v3  ;;  %v7216_v3 = vld [vmem:[#allocation7 + $0x54] ss:$8 sps:$4 sm:$0xff]   ;;  %v7219_v5 = vld [vmem:[#allocation7 + $0x44] ss:$8 sps:$4 sm:$0xff]  }
 0x4e3   : > { %v7050_v7 = vpop.f32.mrf.mxu0 }
 0x4e4   : > { %7052 = vmatpush3.bf16.msra.mxu1 %v2071_v6  ;;  %v7217_v6 = vld [vmem:[#allocation7 + $0x40] ss:$8 sps:$4 sm:$0xff]  }
 0x4e5   : > { %v2159_v9 = vpop.f32.mrf.mxu0  ;;  %7063 = vmatprep.subr.bf16.mxu1 %v7952_v0 }
 0x4e7   : > { %7054 = vmatmul.mubr.msk.bf16.vlgmr.msra.gmra.mxu1 %vm388_vm1, %v2070_v8  ;;  %v7061_v10 = vpop.f32.mrf.mxu0 }
 0x4e8   : > { %7065 = vmatprep.mubr.msk.bf16.mxu1 %vm7953_vm0, %v7952_v0  ;;  %v7207_v0 = vld [vmem:[#allocation7 + $0x4] ss:$8 sps:$4 sm:$0xff]  }
 0x4e9   : > { %v2162_v11 = vpop.f32.mrf.mxu0  ;;  %2289 = vmatprep.subr.bf16.mxu0 %v7207_v0 }
 0x4ea   : > { %v2168_v12 = vpack.c.bf16 %v2162_v11, %v2159_v9  ;;  %2290 = vmatpush1.bf16.msra.mxu0 %v7205_v21 }
 0x4eb   : > { %v7062_v13 = vpop.f32.mrf.mxu0  ;;  %2377 = vmatprep.subr.bf16.mxu0 %v7210_v22  ;;  %v2411_v22 = vld [vmem:[#allocation10 + $0x98] sm:$0xf] }
 0x4ec   : > { %7064 = vmatpush3.bf16.msra.mxu1 %v2168_v12 }
 0x4ef   : > { %7066 = vmatmul.mubr.msk.bf16.vlgmr.msra.gmra.mxu1 %vm388_vm1, %v2167_v14  ;;  %v2317_v14 = vld [vmem:[#allocation10 + $0x90] sm:$0xf] }
 0x4f0   : > { %2507 = vmatprep.mubr.bf16.mxu1 %v7954_v24 }
 0x57f   : > { %v1624_v23 = vpop.f32.mrf.mxu1 }
 0x580   : > { %v1630_v46 = vadd.f32 %v1624_v23, %v8330_v29  ;;  %v7220_v23 = vld [vmem:[#allocation7 + $0xb0] ss:$8 sps:$4 sm:$0xff]  }
 0x581   : > { %v6995_v25 = vpop.f32.mrf.mxu1 }
 0x582   : > { %v7225_v25 = vld [vmem:[#allocation7 + $0xa4] ss:$8 sps:$4 sm:$0xff]  }
 0x583   : > { %v1627_v26 = vpop.f32.mrf.mxu1 }
 0x584   : > { %v7223_v26 = vld [vmem:[#allocation7 + $0xa0] ss:$8 sps:$4 sm:$0xff]  }
 0x585   : > { %v6996_v27 = vpop.f32.mrf.mxu1 }
 0x586   : > { %v7228_v27 = vld [vmem:[#allocation7 + $0x94] ss:$8 sps:$4 sm:$0xff]  }
 0x587   : > { %v1721_v28 = vpop.f32.mrf.mxu1 }
 0x588   : > { %v1727_v48 = vadd.f32 %v1721_v28, %v1630_v46  ;;  %v7226_v28 = vld [vmem:[#allocation7 + $0x90] ss:$8 sps:$4 sm:$0xff]  }
 0x589   : > { %v7007_v30 = vpop.f32.mrf.mxu1 }
 0x58a   : > { %v7231_v30 = vld [vmem:[#allocation7 + $0x84] ss:$8 sps:$4 sm:$0xff]  }
 0x58b   : > { %v1724_v31 = vpop.f32.mrf.mxu1 }
 0x58c   : > { %v7229_v31 = vld [vmem:[#allocation7 + $0x80] ss:$8 sps:$4 sm:$0xff]  }
 0x58d   : > { %v7008_v33 = vpop.f32.mrf.mxu1 }
 0x58f   : > { %v1818_v34 = vpop.f32.mrf.mxu1 }
 0x590   : > { %v1824_v50 = vadd.f32 %v1818_v34, %v1727_v48  ;;  %v7234_v48 = vld [vmem:[#allocation7 + $0xf4] ss:$8 sps:$4 sm:$0xff]  }
 0x591   : > { %v7019_v36 = vpop.f32.mrf.mxu1 }
 0x593   : > { %v1821_v37 = vpop.f32.mrf.mxu1 }
 0x595   : > { %v7020_v38 = vpop.f32.mrf.mxu1 }
 0x597   : > { %v1915_v39 = vpop.f32.mrf.mxu1 }
 0x598   : > { %v1921_v52 = vadd.f32 %v1915_v39, %v1824_v50 }
 0x599   : > { %v7031_v40 = vpop.f32.mrf.mxu1 }
 0x59b   : > { %v1918_v41 = vpop.f32.mrf.mxu1 }
 0x59d   : > { %v7032_v42 = vpop.f32.mrf.mxu1 }
 0x59f   : > { %v2012_v43 = vpop.f32.mrf.mxu1 }
 0x5a0   : > { %v2018_v54 = vadd.f32 %v2012_v43, %v1921_v52  ;;  %v2607_v52 = vld [vmem:[#allocation10 + $0xa0] sm:$0xf] }
 0x5a1   : > { %v7043_v44 = vpop.f32.mrf.mxu1 }
 0x5a3   : > { %v2015_v45 = vpop.f32.mrf.mxu1 }
 0x5a5   : > { %v7044_v47 = vpop.f32.mrf.mxu1 }
 0x5a7   : > { %v2109_v49 = vpop.f32.mrf.mxu1 }
 0x5a8   : > { %v2115_v56 = vadd.f32 %v2109_v49, %v2018_v54  ;;  %v7237_v54 = vld [vmem:[#allocation7 + $0xe4] ss:$8 sps:$4 sm:$0xff]  }
 0x5a9   : > { %v7055_v51 = vpop.f32.mrf.mxu1 }
 0x5ab   : > { %v2112_v53 = vpop.f32.mrf.mxu1 }
 0x5ac   : > { %v7232_v53 = vld [vmem:[#allocation7 + $0xf0] ss:$8 sps:$4 sm:$0xff]  }
 0x5ad   : > { %v7056_v55 = vpop.f32.mrf.mxu1 }
 0x5ae   : > { %v7235_v55 = vld [vmem:[#allocation7 + $0xe0] ss:$8 sps:$4 sm:$0xff]  }
 0x5af   : > { %v2206_v57 = vpop.f32.mrf.mxu1 }
 0x5b0   : > { %v2212_v58 = vadd.f32 %v2206_v57, %v2115_v56  ;;  %v7240_v56 = vld [vmem:[#allocation7 + $0xd4] ss:$8 sps:$4 sm:$0xff]   ;;  %v7238_v57 = vld [vmem:[#allocation7 + $0xd0] ss:$8 sps:$4 sm:$0xff]  }
 0x5b1   : > { %v7067_v59 = vpop.f32.mrf.mxu1 }
 0x5b2   : > { %v2220_v60 = vadd.f32 %v2218_v32, %v2212_v58  ;;  %v7243_v58 = vld [vmem:[#allocation7 + $0xc4] ss:$8 sps:$4 sm:$0xff]   ;;  %v7241_v32 = vld [vmem:[#allocation7 + $0xc0] ss:$8 sps:$4 sm:$0xff]  }
 0x5b3   : > { %v2209_v61 = vpop.f32.mrf.mxu1 }
 0x5b4   : > { %v2221_v62 = vmax.f32 %v2220_v60, 0.0 }
 0x5b5   : > { %v7068_v35 = vpop.f32.mrf.mxu1 }
 0x5b6   : > { %v8359_v29 = vpack.c.bf16 %v2221_v62, %v2221_v62 }
 0x5b8   : > { %6378 = vmatmul.mubr.msk.bf16.vlgmr.msra.gmra.mxu0 %vm2271_vm2, %v8359_v29 }
 0x5b9   : > { %2378 = vmatpush1.bf16.msra.mxu0 %v7208_v63  ;;  %2401 = vmatprep.mubr.bf16.mxu0 %v7954_v24 }
 0x5ba   : > { %2379 = vmatprep.subr.bf16.mxu0 %v7213_v1 }
 0x5bd   : > { %2380 = vmatpush1.bf16.msra.mxu0 %v7211_v2 }
 0x5be   : > { %2381 = vmatprep.subr.bf16.mxu0 %v7216_v3 }
 0x5c1   : > { %2382 = vmatpush1.bf16.msra.mxu0 %v7214_v4 }
 0x5c2   : > { %2383 = vmatprep.subr.bf16.mxu0 %v7219_v5  ;;  %v7246_v5 = vld [vmem:[#allocation7 + $0x134] ss:$8 sps:$4 sm:$0xff]  }
 0x5c5   : > { %2384 = vmatpush1.bf16.msra.mxu0 %v7217_v6 }
 0x5c8   : > { %6387 = vmatmul.mubr.msk.bf16.vlgmr.msra.gmra.mxu0 %vm2271_vm2, %v8359_v29 }
 0x5c9   : > { %2457 = vmatprep.mubr.bf16.mxu0 %v7954_v24 }
 0x678   : > { %v2309_v7 = vpop.f32.mrf.mxu0 }
 0x679   : > { %v2318_v8 = vpack.c.bf16 %v2309_v7, %v2309_v7 }
 0x67a   : > { %v2311_v9 = vpop.f32.mrf.mxu0 }
 0x67b   : > { %v2319_v10 = vpack.c.bf16 %v2311_v9, %v2311_v9  ;;  %v2470_v12 = vsel %vm2418_vm3, %v2318_v8, 0  ;;  %v2753_v9 = vld [vmem:[#allocation10 + $0xa8] sm:$0xf] }
 0x67c   : > { %v2313_v11 = vpop.f32.mrf.mxu0 }
 0x67d   : > { %6390 = vmatprep.subr.msk.bf16.mxu1 %vm2418_vm3, %v2319_v10  ;;  %v7244_v10 = vld [vmem:[#allocation7 + $0x130] ss:$8 sps:$4 sm:$0xff]   ;;  %v7249_v11 = vld [vmem:[#allocation7 + $0x124] ss:$8 sps:$4 sm:$0xff]  }
 0x67e   : > { %v2314_v13 = vpop.f32.mrf.mxu0  ;;  %2490 = vmatpush1.bf16.msra.mxu1 %v2470_v12  ;;  %v7247_v12 = vld [vmem:[#allocation7 + $0x120] ss:$8 sps:$4 sm:$0xff]  }
 0x67f   : > { %v7252_v13 = vld [vmem:[#allocation7 + $0x114] ss:$8 sps:$4 sm:$0xff]  }
 0x681   : > { %6391 = vmatmul.mubr.msk.bf16.vlgmr.msra.gmra.mxu1 %vm2414_vm4, %v2317_v14  ;;  %v7250_v14 = vld [vmem:[#allocation7 + $0x110] ss:$8 sps:$4 sm:$0xff]  }
 0x682   : > { %2651 = vmatprep.mubr.bf16.mxu1 %v7954_v24 }
 0x688   : > { %v2403_v15 = vpop.f32.mrf.mxu0 }
 0x689   : > { %v2412_v16 = vpack.c.bf16 %v2403_v15, %v2403_v15  ;;  %v7255_v15 = vld [vmem:[#allocation7 + $0x104] ss:$8 sps:$4 sm:$0xff]  }
 0x68a   : > { %v2405_v17 = vpop.f32.mrf.mxu0 }
 0x68b   : > { %v2413_v18 = vpack.c.bf16 %v2405_v17, %v2405_v17  ;;  %v2420_v0 = vsel %vm2418_vm3, %v2412_v16, 0  ;;  %v7253_v16 = vld [vmem:[#allocation7 + $0x100] ss:$8 sps:$4 sm:$0xff]  }
 0x68c   : > { %v2407_v20 = vpop.f32.mrf.mxu0 }
 0x68d   : > { %6388 = vmatprep.subr.msk.bf16.mxu0 %vm2418_vm3, %v2413_v18 }
 0x68e   : > { %v2408_v21 = vpop.f32.mrf.mxu0  ;;  %2440 = vmatpush1.bf16.msra.mxu0 %v2420_v0 }
 0x68f   : > { %2573 = vmatprep.subr.bf16.mxu0 %v7222_v19 }
 0x691   : > { %6389 = vmatmul.mubr.msk.bf16.vlgmr.msra.gmra.mxu0 %vm2414_vm4, %v2411_v22 }
 0x692   : > { %2574 = vmatpush1.bf16.msra.mxu0 %v7220_v23  ;;  %2597 = vmatprep.mubr.bf16.mxu0 %v7954_v24 }
 0x693   : > { %2575 = vmatprep.subr.bf16.mxu0 %v7225_v25 }
 0x696   : > { %2576 = vmatpush1.bf16.msra.mxu0 %v7223_v26 }
 0x697   : > { %2577 = vmatprep.subr.bf16.mxu0 %v7228_v27  ;;  %v7258_v27 = vld [vmem:[#allocation7 + $0x174] ss:$8 sps:$4 sm:$0xff]  }
 0x69a   : > { %2578 = vmatpush1.bf16.msra.mxu0 %v7226_v28 }
 0x69b   : > { %2579 = vmatprep.subr.bf16.mxu0 %v7231_v30 }
 0x69e   : > { %2580 = vmatpush1.bf16.msra.mxu0 %v7229_v31 }
 0x6a1   : > { %6400 = vmatmul.mubr.msk.bf16.vlgmr.msra.gmra.mxu0 %vm2271_vm2, %v8359_v29 }
 0x6a2   : > { %2797 = vmatprep.mubr.bf16.mxu0 %v7954_v24 }
 0x741   : > { %v2509_v33 = vpop.f32.mrf.mxu1 }
 0x743   : > { %v2511_v34 = vpop.f32.mrf.mxu1 }
 0x745   : > { %v2513_v36 = vpop.f32.mrf.mxu1 }
 0x746   : > { %v7261_v36 = vld [vmem:[#allocation7 + $0x164] ss:$8 sps:$4 sm:$0xff]  }
 0x747   : > { %v2514_v37 = vpop.f32.mrf.mxu1 }
 0x748   : > { %v7259_v37 = vld [vmem:[#allocation7 + $0x160] ss:$8 sps:$4 sm:$0xff]  }
 0x751   : > { %v2459_v38 = vpop.f32.mrf.mxu0 }
 0x752   : > { %v2510_v39 = vadd.f32 %v2509_v33, %v2459_v38  ;;  %v2899_v33 = vld [vmem:[#allocation10 + $0xb0] sm:$0xf]  ;;  %v7264_v38 = vld [vmem:[#allocation7 + $0x154] ss:$8 sps:$4 sm:$0xff]  }
 0x753   : > { %v2461_v40 = vpop.f32.mrf.mxu0 }
 0x754   : > { %v2512_v41 = vadd.f32 %v2511_v34, %v2461_v40  ;;  %v7256_v34 = vld [vmem:[#allocation7 + $0x170] ss:$8 sps:$4 sm:$0xff]   ;;  %v7267_v40 = vld [vmem:[#allocation7 + $0x144] ss:$8 sps:$4 sm:$0xff]  }
 0x755   : > { %v2463_v42 = vpop.f32.mrf.mxu0 }
 0x757   : > { %v2464_v43 = vpop.f32.mrf.mxu0 }
 0x761   : > { %v2599_v44 = vpop.f32.mrf.mxu0 }
 0x762   : > { %v2608_v45 = vpack.c.bf16 %v2599_v44, %v2599_v44 }
 0x763   : > { %v2601_v46 = vpop.f32.mrf.mxu0 }
 0x764   : > { %v2609_v47 = vpack.c.bf16 %v2601_v46, %v2601_v46  ;;  %v2614_v50 = vsel %vm2418_vm3, %v2608_v45, 0 }
 0x765   : > { %v2603_v49 = vpop.f32.mrf.mxu0 }
 0x766   : > { %6401 = vmatprep.subr.msk.bf16.mxu1 %vm2418_vm3, %v2609_v47 }
 0x767   : > { %v2604_v51 = vpop.f32.mrf.mxu0  ;;  %2634 = vmatpush1.bf16.msra.mxu1 %v2614_v50 }
 0x768   : > { %2719 = vmatprep.subr.bf16.mxu1 %v7234_v48 }
 0x76a   : > { %6402 = vmatmul.mubr.msk.bf16.vlgmr.msra.gmra.mxu1 %vm2414_vm4, %v2607_v52  ;;  %v7270_v52 = vld [vmem:[#allocation7 + $0x1b4] ss:$8 sps:$4 sm:$0xff]  }
 0x76b   : > { %2720 = vmatpush1.bf16.msra.mxu1 %v7232_v53  ;;  %2743 = vmatprep.mubr.bf16.mxu1 %v7954_v24 }
 0x76c   : > { %2721 = vmatprep.subr.bf16.mxu1 %v7237_v54 }
 0x76f   : > { %2722 = vmatpush1.bf16.msra.mxu1 %v7235_v55 }
 0x770   : > { %2723 = vmatprep.subr.bf16.mxu1 %v7240_v56  ;;  %v3045_v56 = vld [vmem:[#allocation10 + $0xb8] sm:$0xf] }
 0x773   : > { %2724 = vmatpush1.bf16.msra.mxu1 %v7238_v57  ;;  %v7268_v57 = vld [vmem:[#allocation7 + $0x1b0] ss:$8 sps:$4 sm:$0xff]  }
 0x774   : > { %2725 = vmatprep.subr.bf16.mxu1 %v7243_v58  ;;  %v7273_v58 = vld [vmem:[#allocation7 + $0x1a4] ss:$8 sps:$4 sm:$0xff]  }
 0x777   : > { %2726 = vmatpush1.bf16.msra.mxu1 %v7241_v32  ;;  %v7271_v32 = vld [vmem:[#allocation7 + $0x1a0] ss:$8 sps:$4 sm:$0xff]  }
 0x77a   : > { %6411 = vmatmul.mubr.msk.bf16.vlgmr.msra.gmra.mxu1 %vm2271_vm2, %v8359_v29 }
 0x77b   : > { %2943 = vmatprep.mubr.bf16.mxu1 %v7954_v24 }
 0x82a   : > { %v2653_v59 = vpop.f32.mrf.mxu1 }
 0x82b   : > { %v2660_v60 = vadd.f32 %v2653_v59, %v2510_v39  ;;  %v7262_v39 = vld [vmem:[#allocation7 + $0x150] ss:$8 sps:$4 sm:$0xff]   ;;  %v7276_v59 = vld [vmem:[#allocation7 + $0x194] ss:$8 sps:$4 sm:$0xff]  }
 0x82c   : > { %v2655_v61 = vpop.f32.mrf.mxu1 }
 0x82d   : > { %v2661_v62 = vadd.f32 %v2655_v61, %v2512_v41  ;;  %v7265_v41 = vld [vmem:[#allocation7 + $0x140] ss:$8 sps:$4 sm:$0xff]   ;;  %v7279_v61 = vld [vmem:[#allocation7 + $0x184] ss:$8 sps:$4 sm:$0xff]  }
 0x82e   : > { %v2657_v35 = vpop.f32.mrf.mxu1 }
 0x830   : > { %v2658_v63 = vpop.f32.mrf.mxu1 }
 0x83a   : > { %v2745_v1 = vpop.f32.mrf.mxu1 }
 0x83b   : > { %v2754_v2 = vpack.c.bf16 %v2745_v1, %v2745_v1 }
 0x83c   : > { %v2747_v3 = vpop.f32.mrf.mxu1 }
 0x83d   : > { %v2755_v4 = vpack.c.bf16 %v2747_v3, %v2747_v3  ;;  %v2760_v7 = vsel %vm2418_vm3, %v2754_v2, 0 }
 0x83e   : > { %v2749_v6 = vpop.f32.mrf.mxu1 }
 0x83f   : > { %6412 = vmatprep.subr.msk.bf16.mxu0 %vm2418_vm3, %v2755_v4 }
 0x840   : > { %v2750_v8 = vpop.f32.mrf.mxu1  ;;  %2780 = vmatpush1.bf16.msra.mxu0 %v2760_v7 }
 0x841   : > { %2865 = vmatprep.subr.bf16.mxu0 %v7246_v5 }
 0x843   : > { %6413 = vmatmul.mubr.msk.bf16.vlgmr.msra.gmra.mxu0 %vm2414_vm4, %v2753_v9  ;;  %v7282_v9 = vld [vmem:[#allocation7 + $0x1f4] ss:$8 sps:$4 sm:$0xff]  }
 0x844   : > { %2866 = vmatpush1.bf16.msra.mxu0 %v7244_v10  ;;  %2889 = vmatprep.mubr.bf16.mxu0 %v7954_v24 }
 0x845   : > { %2867 = vmatprep.subr.bf16.mxu0 %v7249_v11 }
 0x848   : > { %2868 = vmatpush1.bf16.msra.mxu0 %v7247_v12 }
 0x849   : > { %2869 = vmatprep.subr.bf16.mxu0 %v7252_v13  ;;  %v3191_v13 = vld [vmem:[#allocation10 + $0xc0] sm:$0xf] }
 0x84c   : > { %2870 = vmatpush1.bf16.msra.mxu0 %v7250_v14  ;;  %v7280_v14 = vld [vmem:[#allocation7 + $0x1f0] ss:$8 sps:$4 sm:$0xff]  }
 0x84d   : > { %2871 = vmatprep.subr.bf16.mxu0 %v7255_v15  ;;  %v7285_v15 = vld [vmem:[#allocation7 + $0x1e4] ss:$8 sps:$4 sm:$0xff]  }
 0x850   : > { %2872 = vmatpush1.bf16.msra.mxu0 %v7253_v16  ;;  %v7283_v16 = vld [vmem:[#allocation7 + $0x1e0] ss:$8 sps:$4 sm:$0xff]  }
 0x853   : > { %6422 = vmatmul.mubr.msk.bf16.vlgmr.msra.gmra.mxu0 %vm2271_vm2, %v8359_v29 }
 0x854   : > { %3089 = vmatprep.mubr.bf16.mxu0 %v7954_v24 }
 0x903   : > { %v2799_v17 = vpop.f32.mrf.mxu0 }
 0x904   : > { %v2806_v18 = vadd.f32 %v2799_v17, %v2660_v60  ;;  %v7274_v60 = vld [vmem:[#allocation7 + $0x190] ss:$8 sps:$4 sm:$0xff]   ;;  %v7288_v17 = vld [vmem:[#allocation7 + $0x1d4] ss:$8 sps:$4 sm:$0xff]  }
 0x905   : > { %v2801_v19 = vpop.f32.mrf.mxu0 }
 0x906   : > { %v2807_v20 = vadd.f32 %v2801_v19, %v2661_v62  ;;  %v7277_v62 = vld [vmem:[#allocation7 + $0x180] ss:$8 sps:$4 sm:$0xff]   ;;  %v7291_v19 = vld [vmem:[#allocation7 + $0x1c4] ss:$8 sps:$4 sm:$0xff]  }
 0x907   : > { %v2803_v0 = vpop.f32.mrf.mxu0 }
 0x909   : > { %v2804_v21 = vpop.f32.mrf.mxu0 }
 0x913   : > { %v2891_v22 = vpop.f32.mrf.mxu0 }
 0x914   : > { %v2900_v23 = vpack.c.bf16 %v2891_v22, %v2891_v22 }
 0x915   : > { %v2893_v25 = vpop.f32.mrf.mxu0 }
 0x916   : > { %v2901_v26 = vpack.c.bf16 %v2893_v25, %v2893_v25  ;;  %v2906_v30 = vsel %vm2418_vm3, %v2900_v23, 0 }
 0x917   : > { %v2895_v28 = vpop.f32.mrf.mxu0 }
 0x918   : > { %6423 = vmatprep.subr.msk.bf16.mxu1 %vm2418_vm3, %v2901_v26 }
 0x919   : > { %v2896_v31 = vpop.f32.mrf.mxu0  ;;  %2926 = vmatpush1.bf16.msra.mxu1 %v2906_v30 }
 0x91a   : > { %3011 = vmatprep.subr.bf16.mxu1 %v7258_v27 }
 0x91c   : > { %6424 = vmatmul.mubr.msk.bf16.vlgmr.msra.gmra.mxu1 %vm2414_vm4, %v2899_v33  ;;  %v7294_v33 = vld [vmem:[#allocation7 + $0x234] ss:$8 sps:$4 sm:$0xff]  }
 0x91d   : > { %3012 = vmatpush1.bf16.msra.mxu1 %v7256_v34  ;;  %3035 = vmatprep.mubr.bf16.mxu1 %v7954_v24 }
 0x91e   : > { %3013 = vmatprep.subr.bf16.mxu1 %v7261_v36 }
 0x921   : > { %3014 = vmatpush1.bf16.msra.mxu1 %v7259_v37 }
 0x922   : > { %3015 = vmatprep.subr.bf16.mxu1 %v7264_v38  ;;  %v3337_v38 = vld [vmem:[#allocation10 + $0xc8] sm:$0xf] }
 0x925   : > { %3016 = vmatpush1.bf16.msra.mxu1 %v7262_v39  ;;  %v7292_v39 = vld [vmem:[#allocation7 + $0x230] ss:$8 sps:$4 sm:$0xff]  }
 0x926   : > { %3017 = vmatprep.subr.bf16.mxu1 %v7267_v40  ;;  %v7297_v40 = vld [vmem:[#allocation7 + $0x224] ss:$8 sps:$4 sm:$0xff]  }
 0x929   : > { %3018 = vmatpush1.bf16.msra.mxu1 %v7265_v41  ;;  %v7295_v41 = vld [vmem:[#allocation7 + $0x220] ss:$8 sps:$4 sm:$0xff]  }
 0x92c   : > { %6433 = vmatmul.mubr.msk.bf16.vlgmr.msra.gmra.mxu1 %vm2271_vm2, %v8359_v29 }
 0x92d   : > { %3235 = vmatprep.mubr.bf16.mxu1 %v7954_v24 }
 0x9dc   : > { %v2945_v42 = vpop.f32.mrf.mxu1 }
 0x9dd   : > { %v2952_v43 = vadd.f32 %v2945_v42, %v2806_v18  ;;  %v7286_v18 = vld [vmem:[#allocation7 + $0x1d0] ss:$8 sps:$4 sm:$0xff]   ;;  %v7300_v42 = vld [vmem:[#allocation7 + $0x214] ss:$8 sps:$4 sm:$0xff]  }
 0x9de   : > { %v2947_v44 = vpop.f32.mrf.mxu1 }
 0x9df   : > { %v2953_v45 = vadd.f32 %v2947_v44, %v2807_v20  ;;  %v7289_v20 = vld [vmem:[#allocation7 + $0x1c0] ss:$8 sps:$4 sm:$0xff]   ;;  %v7303_v44 = vld [vmem:[#allocation7 + $0x204] ss:$8 sps:$4 sm:$0xff]  }
 0x9e0   : > { %v2949_v46 = vpop.f32.mrf.mxu1 }
 0x9e1   : > { %v7307_v46 = vld [vmem:[#allocation9 + $0x170] ss:$8 sps:$4 sm:$0xff]  }
 0x9e2   : > { %v2950_v47 = vpop.f32.mrf.mxu1 }
 0x9e3   : > { %v7309_v47 = vld [vmem:[#allocation9 + $0x174] ss:$8 sps:$4 sm:$0xff]  }
 0x9ec   : > { %v3037_v48 = vpop.f32.mrf.mxu1 }
 0x9ed   : > { %v3046_v49 = vpack.c.bf16 %v3037_v48, %v3037_v48  ;;  %v7315_v48 = vld [vmem:[#allocation9 + $0x164] ss:$8 sps:$4 sm:$0xff]  }
 0x9ee   : > { %v3039_v50 = vpop.f32.mrf.mxu1 }
 0x9ef   : > { %v3047_v51 = vpack.c.bf16 %v3039_v50, %v3039_v50  ;;  %v3052_v54 = vsel %vm2418_vm3, %v3046_v49, 0  ;;  %v7313_v49 = vld [vmem:[#allocation9 + $0x160] ss:$8 sps:$4 sm:$0xff]   ;;  %v7321_v50 = vld [vmem:[#allocation9 + $0x154] ss:$8 sps:$4 sm:$0xff]  }
 0x9f0   : > { %v3041_v53 = vpop.f32.mrf.mxu1 }
 0x9f1   : > { %6434 = vmatprep.subr.msk.bf16.mxu0 %vm2418_vm3, %v3047_v51  ;;  %v7319_v51 = vld [vmem:[#allocation9 + $0x150] ss:$8 sps:$4 sm:$0xff]   ;;  %v7325_v53 = vld [vmem:[#allocation9 + $0x140] ss:$8 sps:$4 sm:$0xff]  }
 0x9f2   : > { %v3042_v55 = vpop.f32.mrf.mxu1  ;;  %3072 = vmatpush1.bf16.msra.mxu0 %v3052_v54  ;;  %v7333_v54 = vld [vmem:[#allocation9 + $0x134] ss:$8 sps:$4 sm:$0xff]  }
 0x9f3   : > { %3157 = vmatprep.subr.bf16.mxu0 %v7270_v52  ;;  %v7327_v52 = vld [vmem:[#allocation9 + $0x144] ss:$8 sps:$4 sm:$0xff]   ;;  %v7331_v55 = vld [vmem:[#allocation9 + $0x130] ss:$8 sps:$4 sm:$0xff]  }
 0x9f5   : > { %6435 = vmatmul.mubr.msk.bf16.vlgmr.msra.gmra.mxu0 %vm2414_vm4, %v3045_v56  ;;  %v7337_v56 = vld [vmem:[#allocation9 + $0x120] ss:$8 sps:$4 sm:$0xff]  }
 0x9f6   : > { %3158 = vmatpush1.bf16.msra.mxu0 %v7268_v57  ;;  %3181 = vmatprep.mubr.bf16.mxu0 %v7954_v24  ;;  %v7345_v57 = vld [vmem:[#allocation9 + $0x114] ss:$8 sps:$4 sm:$0xff]  }
 0x9f7   : > { %3159 = vmatprep.subr.bf16.mxu0 %v7273_v58  ;;  %v7343_v58 = vld [vmem:[#allocation9 + $0x110] ss:$8 sps:$4 sm:$0xff]  }
 0x9fa   : > { %3160 = vmatpush1.bf16.msra.mxu0 %v7271_v32  ;;  %v7351_v32 = vld [vmem:[#allocation9 + $0x104] ss:$8 sps:$4 sm:$0xff]  }
 0x9fb   : > { %3161 = vmatprep.subr.bf16.mxu0 %v7276_v59  ;;  %v7349_v59 = vld [vmem:[#allocation9 + $0x100] ss:$8 sps:$4 sm:$0xff]  }
 0x9fe   : > { %3162 = vmatpush1.bf16.msra.mxu0 %v7274_v60  ;;  %v7357_v60 = vld [vmem:[#allocation9 + $0x1f4] ss:$8 sps:$4 sm:$0xff]  }
 0x9ff   : > { %3163 = vmatprep.subr.bf16.mxu0 %v7279_v61  ;;  %v7355_v61 = vld [vmem:[#allocation9 + $0x1f0] ss:$8 sps:$4 sm:$0xff]  }
 0xa02   : > { %3164 = vmatpush1.bf16.msra.mxu0 %v7277_v62  ;;  %v7363_v62 = vld [vmem:[#allocation9 + $0x1e4] ss:$8 sps:$4 sm:$0xff]  }
 0xa05   : > { %6444 = vmatmul.mubr.msk.bf16.vlgmr.msra.gmra.mxu0 %vm2271_vm2, %v8359_v29 }
 0xa06   : > { %3381 = vmatprep.mubr.bf16.mxu0 %v7954_v24 }
 0xab5   : > { %v3091_v35 = vpop.f32.mrf.mxu0 }
 0xab6   : > { %v3098_v63 = vadd.f32 %v3091_v35, %v2952_v43  ;;  %v7298_v43 = vld [vmem:[#allocation7 + $0x210] ss:$8 sps:$4 sm:$0xff]   ;;  %v7361_v35 = vld [vmem:[#allocation9 + $0x1e0] ss:$8 sps:$4 sm:$0xff]  }
 0xab7   : > { %v3093_v1 = vpop.f32.mrf.mxu0 }
 0xab8   : > { %v3099_v2 = vadd.f32 %v3093_v1, %v2953_v45  ;;  %v7301_v45 = vld [vmem:[#allocation7 + $0x200] ss:$8 sps:$4 sm:$0xff]   ;;  %v7367_v1 = vld [vmem:[#allocation9 + $0x1d0] ss:$8 sps:$4 sm:$0xff]  }
 0xab9   : > { %v3095_v3 = vpop.f32.mrf.mxu0 }
 0xaba   : > { %v7373_v3 = vld [vmem:[#allocation9 + $0x1c0] ss:$8 sps:$4 sm:$0xff]  }
 0xabb   : > { %v3096_v4 = vpop.f32.mrf.mxu0 }
 0xabc   : > { %v7381_v4 = vld [vmem:[#allocation9 + $0x1b4] ss:$8 sps:$4 sm:$0xff]  }
 0xac5   : > { %v3183_v5 = vpop.f32.mrf.mxu0 }
 0xac6   : > { %v3192_v6 = vpack.c.bf16 %v3183_v5, %v3183_v5  ;;  %v7379_v5 = vld [vmem:[#allocation9 + $0x1b0] ss:$8 sps:$4 sm:$0xff]  }
 0xac7   : > { %v3185_v7 = vpop.f32.mrf.mxu0 }
 0xac8   : > { %v3193_v8 = vpack.c.bf16 %v3185_v7, %v3185_v7  ;;  %v3198_v11 = vsel %vm2418_vm3, %v3192_v6, 0 }
 0xac9   : > { %v3187_v10 = vpop.f32.mrf.mxu0 }
 0xaca   : > { %6445 = vmatprep.subr.msk.bf16.mxu1 %vm2418_vm3, %v3193_v8 }
 0xacb   : > { %v3188_v12 = vpop.f32.mrf.mxu0  ;;  %3218 = vmatpush1.bf16.msra.mxu1 %v3198_v11 }
 0xacc   : > { %3303 = vmatprep.subr.bf16.mxu1 %v7282_v9 }
 0xace   : > { %6446 = vmatmul.mubr.msk.bf16.vlgmr.msra.gmra.mxu1 %vm2414_vm4, %v3191_v13 }
 0xacf   : > { %3304 = vmatpush1.bf16.msra.mxu1 %v7280_v14  ;;  %3327 = vmatprep.mubr.bf16.mxu1 %v7954_v24 }
 0xad0   : > { %3305 = vmatprep.subr.bf16.mxu1 %v7285_v15 }
 0xad3   : > { %3306 = vmatpush1.bf16.msra.mxu1 %v7283_v16  ;;  %v7306_v16 = vld [vmem:[#allocation9 + $0x74] ss:$8 sps:$4 sm:$0xff]  }
 0xad4   : > { %3307 = vmatprep.subr.bf16.mxu1 %v7288_v17 }
 0xad7   : > { %3308 = vmatpush1.bf16.msra.mxu1 %v7286_v18 }
 0xad8   : > { %3309 = vmatprep.subr.bf16.mxu1 %v7291_v19 }
 0xadb   : > { %3310 = vmatpush1.bf16.msra.mxu1 %v7289_v20  ;;  %v3483_v20 = vld [vmem:[#allocation10 + $0xd0] sm:$0xf] }
 0xade   : > { %6455 = vmatmul.mubr.msk.bf16.vlgmr.msra.gmra.mxu1 %vm2271_vm2, %v8359_v29 }
 0xadf   : > { %3527 = vmatprep.mubr.bf16.mxu1 %v7954_v24 }
 0xb8e   : > { %v3237_v0 = vpop.f32.mrf.mxu1 }
 0xb8f   : > { %v8413_v21 = vadd.f32 %v3237_v0, %v3098_v63  ;;  %v7369_v63 = vld [vmem:[#allocation9 + $0x1d4] ss:$8 sps:$4 sm:$0xff]   ;;  %v7304_v0 = vld [vmem:[#allocation9 + $0x70] ss:$8 sps:$4 sm:$0xff]  }
 0xb90   : > { %v3239_v22 = vpop.f32.mrf.mxu1 }
 0xb91   : > { %v8415_v23 = vadd.f32 %v3239_v22, %v3099_v2  ;;  %v7375_v2 = vld [vmem:[#allocation9 + $0x1c4] ss:$8 sps:$4 sm:$0xff]   ;;  %v7310_v22 = vld [vmem:[#allocation9 + $0x60] ss:$8 sps:$4 sm:$0xff]  }
 0xb92   : > { %v3241_v25 = vpop.f32.mrf.mxu1 }
 0xb93   : > { %v7316_v25 = vld [vmem:[#allocation9 + $0x50] ss:$8 sps:$4 sm:$0xff]  }
 0xb94   : > { %v3242_v26 = vpop.f32.mrf.mxu1 }
 0xb95   : > { %v7324_v26 = vld [vmem:[#allocation9 + $0x44] ss:$8 sps:$4 sm:$0xff]  }
 0xb9e   : > { %v3329_v27 = vpop.f32.mrf.mxu1 }
 0xb9f   : > { %v3338_v28 = vpack.c.bf16 %v3329_v27, %v3329_v27  ;;  %v7322_v27 = vld [vmem:[#allocation9 + $0x40] ss:$8 sps:$4 sm:$0xff]  }
 0xba0   : > { %v3331_v30 = vpop.f32.mrf.mxu1 }
 0xba1   : > { %v3339_v31 = vpack.c.bf16 %v3331_v30, %v3331_v30  ;;  %v3344_v36 = vsel %vm2418_vm3, %v3338_v28, 0  ;;  %v7330_v28 = vld [vmem:[#allocation9 + $0x34] ss:$8 sps:$4 sm:$0xff]   ;;  %v7328_v30 = vld [vmem:[#allocation9 + $0x30] ss:$8 sps:$4 sm:$0xff]  }
 0xba2   : > { %v3333_v34 = vpop.f32.mrf.mxu1 }
 0xba3   : > { %6456 = vmatprep.subr.msk.bf16.mxu0 %vm2418_vm3, %v3339_v31  ;;  %v7336_v31 = vld [vmem:[#allocation9 + $0x24] ss:$8 sps:$4 sm:$0xff]   ;;  %v7342_v34 = vld [vmem:[#allocation9 + $0x14] ss:$8 sps:$4 sm:$0xff]  }
 0xba4   : > { %v3334_v37 = vpop.f32.mrf.mxu1  ;;  %3364 = vmatpush1.bf16.msra.mxu0 %v3344_v36  ;;  %v7340_v36 = vld [vmem:[#allocation9 + $0x10] ss:$8 sps:$4 sm:$0xff]  }
 0xba5   : > { %3449 = vmatprep.subr.bf16.mxu0 %v7294_v33  ;;  %v7334_v33 = vld [vmem:[#allocation9 + $0x20] ss:$8 sps:$4 sm:$0xff]   ;;  %v7348_v37 = vld [vmem:[#allocation9 + $0x4] ss:$8 sps:$4 sm:$0xff]  }
 0xba7   : > { %6457 = vmatmul.mubr.msk.bf16.vlgmr.msra.gmra.mxu0 %vm2414_vm4, %v3337_v38  ;;  %v7346_v38 = vld [vmem:[#allocation9] ss:$8 sps:$4 sm:$0xff]  }
 0xba8   : > { %3450 = vmatpush1.bf16.msra.mxu0 %v7292_v39  ;;  %3473 = vmatprep.mubr.bf16.mxu0 %v7954_v24  ;;  %v7354_v39 = vld [vmem:[#allocation9 + $0xf4] ss:$8 sps:$4 sm:$0xff]  }
 0xba9   : > { %3451 = vmatprep.subr.bf16.mxu0 %v7297_v40  ;;  %v7352_v40 = vld [vmem:[#allocation9 + $0xf0] ss:$8 sps:$4 sm:$0xff]  }
 0xbac   : > { %3452 = vmatpush1.bf16.msra.mxu0 %v7295_v41  ;;  %v7360_v41 = vld [vmem:[#allocation9 + $0xe4] ss:$8 sps:$4 sm:$0xff]  }
 0xbad   : > { %3453 = vmatprep.subr.bf16.mxu0 %v7300_v42  ;;  %v7358_v42 = vld [vmem:[#allocation9 + $0xe0] ss:$8 sps:$4 sm:$0xff]  }
 0xbb0   : > { %3454 = vmatpush1.bf16.msra.mxu0 %v7298_v43  ;;  %v7366_v43 = vld [vmem:[#allocation9 + $0xd4] ss:$8 sps:$4 sm:$0xff]  }
 0xbb1   : > { %3455 = vmatprep.subr.bf16.mxu0 %v7303_v44  ;;  %v7364_v44 = vld [vmem:[#allocation9 + $0xd0] ss:$8 sps:$4 sm:$0xff]  }
 0xbb4   : > { %3456 = vmatpush1.bf16.msra.mxu0 %v7301_v45  ;;  %v7372_v45 = vld [vmem:[#allocation9 + $0xc4] ss:$8 sps:$4 sm:$0xff]  }
 0xbb5   : > { %3981 = vmatprep.subr.bf16.mxu0 %v7309_v47  ;;  %v7378_v47 = vld [vmem:[#allocation9 + $0xb4] ss:$8 sps:$4 sm:$0xff]  }
 0xbb7   : > { %6466 = vmatmul.mubr.msk.bf16.vlgmr.msra.gmra.mxu0 %vm2271_vm2, %v8359_v29  ;;  %v7339_v29 = vld [vmem:[#allocation9 + $0x124] ss:$8 sps:$4 sm:$0xff]  }
 0xbb8   : > { %3982 = vmatpush1.bf16.msra.mxu0 %v7307_v46  ;;  %v7370_v46 = vld [vmem:[#allocation9 + $0xc0] ss:$8 sps:$4 sm:$0xff]  }
 0xbb9   : > { %3983 = vmatprep.subr.bf16.mxu0 %v7315_v48  ;;  %v7376_v48 = vld [vmem:[#allocation9 + $0xb0] ss:$8 sps:$4 sm:$0xff]  }
 0xbbc   : > { %3984 = vmatpush1.bf16.msra.mxu0 %v7313_v49  ;;  %v7384_v49 = vld [vmem:[#allocation9 + $0xa4] ss:$8 sps:$4 sm:$0xff]  }
 0xbbd   : > { %3985 = vmatprep.subr.bf16.mxu0 %v7321_v50  ;;  %v7387_v50 = vld [vmem:[#allocation9 + $0x1a4] ss:$8 sps:$4 sm:$0xff]  }
 0xbc0   : > { %3986 = vmatpush1.bf16.msra.mxu0 %v7319_v51  ;;  %v7382_v51 = vld [vmem:[#allocation9 + $0xa0] ss:$8 sps:$4 sm:$0xff]  }
 0xbc1   : > { %3987 = vmatprep.subr.bf16.mxu0 %v7327_v52  ;;  %v7385_v52 = vld [vmem:[#allocation9 + $0x1a0] ss:$8 sps:$4 sm:$0xff]  }
 0xbc4   : > { %3988 = vmatpush1.bf16.msra.mxu0 %v7325_v53  ;;  %v7390_v53 = vld [vmem:[#allocation9 + $0x94] ss:$8 sps:$4 sm:$0xff]  }
 0xbc5   : > { %3989 = vmatprep.subr.bf16.mxu0 %v7333_v54  ;;  %v7393_v54 = vld [vmem:[#allocation9 + $0x194] ss:$8 sps:$4 sm:$0xff]  }
 0xbc8   : > { %3990 = vmatpush1.bf16.msra.mxu0 %v7331_v55  ;;  %v7388_v55 = vld [vmem:[#allocation9 + $0x90] ss:$8 sps:$4 sm:$0xff]  }
 0xbc9   : > { %3991 = vmatprep.subr.bf16.mxu0 %v7339_v29  ;;  %v7391_v29 = vld [vmem:[#allocation9 + $0x190] ss:$8 sps:$4 sm:$0xff]  }
 0xbcc   : > { %3992 = vmatpush1.bf16.msra.mxu0 %v7337_v56  ;;  %v7396_v56 = vld [vmem:[#allocation9 + $0x84] ss:$8 sps:$4 sm:$0xff]  }
 0xbcd   : > { %3993 = vmatprep.subr.bf16.mxu0 %v7345_v57  ;;  %v7399_v57 = vld [vmem:[#allocation9 + $0x184] ss:$8 sps:$4 sm:$0xff]  }
 0xbd0   : > { %3994 = vmatpush1.bf16.msra.mxu0 %v7343_v58  ;;  %v7394_v58 = vld [vmem:[#allocation9 + $0x80] ss:$8 sps:$4 sm:$0xff]  }
 0xbd1   : > { %3995 = vmatprep.subr.bf16.mxu0 %v7351_v32  ;;  %v7397_v32 = vld [vmem:[#allocation9 + $0x180] ss:$8 sps:$4 sm:$0xff]  }
 0xbd4   : > { %3996 = vmatpush1.bf16.msra.mxu0 %v7349_v59 }
 0xbd5   : > { %3997 = vmatprep.subr.bf16.mxu0 %v7357_v60 }
 0xbd8   : > { %3998 = vmatpush2.bf16.msra.mxu0 %v7355_v61  ;;  %v3543_v61 = vpop.permute.xlu1 %3542 }
 0xbd9   : > { %3999 = vmatprep.subr.bf16.mxu0 %v7363_v62 }
 0xbdc   : > { %4000 = vmatpush2.bf16.msra.mxu0 %v7361_v35 }
 0xbdd   : > { %4001 = vmatprep.subr.bf16.mxu0 %v7369_v63 }
 0xbe0   : > { %4002 = vmatpush2.bf16.msra.mxu0 %v7367_v1 }
 0xbe1   : > { %4003 = vmatprep.subr.bf16.mxu0 %v7375_v2 }
 0xbe4   : > { %4004 = vmatpush2.bf16.msra.mxu0 %v7373_v3 }
 0xbe5   : > { %4005 = vmatprep.subr.bf16.mxu0 %v7381_v4 }
 0xbe8   : > { %4006 = vmatpush2.bf16.msra.mxu0 %v7379_v5 }
 0xbe9   : > { %4007 = vmatprep.subr.bf16.mxu0 %v7387_v50  ;;  %v7433_v50 = vld [vmem:[#allocation9 + $0x2c0] ss:$8 sps:$4 sm:$0xff]  }
 0xbec   : > { %4008 = vmatpush2.bf16.msra.mxu0 %v7385_v52  ;;  %v7436_v52 = vld [vmem:[#allocation9 + $0x2b0] ss:$8 sps:$4 sm:$0xff]  }
 0xbed   : > { %4009 = vmatprep.subr.bf16.mxu0 %v7393_v54  ;;  %v7439_v54 = vld [vmem:[#allocation9 + $0x2a0] ss:$8 sps:$4 sm:$0xff]  }
 0xbf0   : > { %4010 = vmatpush2.bf16.msra.mxu0 %v7391_v29  ;;  %v7442_v29 = vld [vmem:[#allocation9 + $0x290] ss:$8 sps:$4 sm:$0xff]  }
 0xbf1   : > { %4011 = vmatprep.subr.bf16.mxu0 %v7399_v57  ;;  %v7445_v57 = vld [vmem:[#allocation9 + $0x280] ss:$8 sps:$4 sm:$0xff]  }
 0xbf4   : > { %4012 = vmatpush2.bf16.msra.mxu0 %v7397_v32 }
 0xc67   : > { %v3383_v6 = vpop.f32.mrf.mxu0 }
 0xc68   : > { %v8424_v7 = vadd.f32 %v3383_v6, %v8413_v21  ;;  %v7312_v21 = vld [vmem:[#allocation9 + $0x64] ss:$8 sps:$4 sm:$0xff]  }
 0xc69   : > { %v3385_v8 = vpop.f32.mrf.mxu0 }
 0xc6a   : > { %v8427_v9 = vadd.f32 %v3385_v8, %v8415_v23  ;;  %v7318_v23 = vld [vmem:[#allocation9 + $0x54] ss:$8 sps:$4 sm:$0xff]  }
 0xc6b   : > { %v3387_v10 = vpop.f32.mrf.mxu0 }
 0xc6d   : > { %v3388_v11 = vpop.f32.mrf.mxu0 }
 0xc77   : > { %v3475_v12 = vpop.f32.mrf.mxu0 }
 0xc78   : > { %v3484_v13 = vpack.c.bf16 %v3475_v12, %v3475_v12 }
 0xc79   : > { %v3477_v14 = vpop.f32.mrf.mxu0 }
 0xc7a   : > { %v3485_v15 = vpack.c.bf16 %v3477_v14, %v3477_v14  ;;  %v3490_v18 = vsel %vm2418_vm3, %v3484_v13, 0 }
 0xc7b   : > { %v3479_v17 = vpop.f32.mrf.mxu0 }
 0xc7c   : > { %6467 = vmatprep.subr.msk.bf16.mxu1 %vm2418_vm3, %v3485_v15 }
 0xc7d   : > { %v3480_v19 = vpop.f32.mrf.mxu0  ;;  %3510 = vmatpush1.bf16.msra.mxu1 %v3490_v18 }
 0xc7e   : > { %3743 = vmatprep.subr.bf16.mxu1 %v7306_v16  ;;  %v7402_v16 = vld [vmem:[#allocation9 + $0x274] ss:$8 sps:$4 sm:$0xff]  }
 0xc80   : > { %6468 = vmatmul.mubr.msk.bf16.vlgmr.msra.gmra.mxu1 %vm2414_vm4, %v3483_v20 }
 0xc81   : > { %3744 = vmatpush1.bf16.msra.mxu1 %v7304_v0 }
 0xc82   : > { %3745 = vmatprep.subr.bf16.mxu1 %v7312_v21 }
 0xc85   : > { %3746 = vmatpush1.bf16.msra.mxu1 %v7310_v22  ;;  %v4023_v22 = vld [vmem:[#allocation10 + $0xe0] sm:$0xf] }
 0xc86   : > { %3747 = vmatprep.subr.bf16.mxu1 %v7318_v23  ;;  %v3785_v23 = vld [vmem:[#allocation10 + $0xd8] sm:$0xf] }
 0xc89   : > { %3748 = vmatpush1.bf16.msra.mxu1 %v7316_v25  ;;  %v7400_v25 = vld [vmem:[#allocation9 + $0x270] ss:$8 sps:$4 sm:$0xff]  }
 0xc8a   : > { %3749 = vmatprep.subr.bf16.mxu1 %v7324_v26  ;;  %v7405_v26 = vld [vmem:[#allocation9 + $0x264] ss:$8 sps:$4 sm:$0xff]  }
 0xc8d   : > { %3750 = vmatpush1.bf16.msra.mxu1 %v7322_v27  ;;  %v7403_v27 = vld [vmem:[#allocation9 + $0x260] ss:$8 sps:$4 sm:$0xff]  }
 0xc8e   : > { %3751 = vmatprep.subr.bf16.mxu1 %v7330_v28  ;;  %v7408_v28 = vld [vmem:[#allocation9 + $0x254] ss:$8 sps:$4 sm:$0xff]  }
 0xc91   : > { %3752 = vmatpush1.bf16.msra.mxu1 %v7328_v30  ;;  %v7406_v30 = vld [vmem:[#allocation9 + $0x250] ss:$8 sps:$4 sm:$0xff]  }
 0xc92   : > { %3753 = vmatprep.subr.bf16.mxu1 %v7336_v31  ;;  %v7411_v31 = vld [vmem:[#allocation9 + $0x244] ss:$8 sps:$4 sm:$0xff]  }
 0xc95   : > { %3754 = vmatpush1.bf16.msra.mxu1 %v7334_v33  ;;  %v7409_v33 = vld [vmem:[#allocation9 + $0x240] ss:$8 sps:$4 sm:$0xff]  }
 0xc96   : > { %3755 = vmatprep.subr.bf16.mxu1 %v7342_v34  ;;  %v7414_v34 = vld [vmem:[#allocation9 + $0x234] ss:$8 sps:$4 sm:$0xff]  }
 0xc99   : > { %3756 = vmatpush1.bf16.msra.mxu1 %v7340_v36  ;;  %v7412_v36 = vld [vmem:[#allocation9 + $0x230] ss:$8 sps:$4 sm:$0xff]  }
 0xc9a   : > { %3757 = vmatprep.subr.bf16.mxu1 %v7348_v37  ;;  %v7417_v37 = vld [vmem:[#allocation9 + $0x224] ss:$8 sps:$4 sm:$0xff]  }
 0xc9d   : > { %3758 = vmatpush1.bf16.msra.mxu1 %v7346_v38  ;;  %v7415_v38 = vld [vmem:[#allocation9 + $0x220] ss:$8 sps:$4 sm:$0xff]  }
 0xc9e   : > { %3759 = vmatprep.subr.bf16.mxu1 %v7354_v39  ;;  %v7420_v39 = vld [vmem:[#allocation9 + $0x214] ss:$8 sps:$4 sm:$0xff]  }
 0xca1   : > { %3760 = vmatpush2.bf16.msra.mxu1 %v7352_v40  ;;  %v7418_v40 = vld [vmem:[#allocation9 + $0x210] ss:$8 sps:$4 sm:$0xff]  }
 0xca2   : > { %3761 = vmatprep.subr.bf16.mxu1 %v7360_v41  ;;  %v7423_v41 = vld [vmem:[#allocation9 + $0x204] ss:$8 sps:$4 sm:$0xff]  }
 0xca5   : > { %3762 = vmatpush2.bf16.msra.mxu1 %v7358_v42  ;;  %v7421_v42 = vld [vmem:[#allocation9 + $0x200] ss:$8 sps:$4 sm:$0xff]  }
 0xca6   : > { %3763 = vmatprep.subr.bf16.mxu1 %v7366_v43  ;;  %v7426_v43 = vld [vmem:[#allocation9 + $0x2f4] ss:$8 sps:$4 sm:$0xff]  }
 0xca9   : > { %3764 = vmatpush2.bf16.msra.mxu1 %v7364_v44  ;;  %v7424_v44 = vld [vmem:[#allocation9 + $0x2f0] ss:$8 sps:$4 sm:$0xff]  }
 0xcaa   : > { %3765 = vmatprep.subr.bf16.mxu1 %v7372_v45  ;;  %v7429_v45 = vld [vmem:[#allocation9 + $0x2e4] ss:$8 sps:$4 sm:$0xff]  }
 0xcad   : > { %3766 = vmatpush2.bf16.msra.mxu1 %v7370_v46  ;;  %v7427_v46 = vld [vmem:[#allocation9 + $0x2e0] ss:$8 sps:$4 sm:$0xff]  }
 0xcae   : > { %3767 = vmatprep.subr.bf16.mxu1 %v7378_v47  ;;  %v7432_v47 = vld [vmem:[#allocation9 + $0x2d4] ss:$8 sps:$4 sm:$0xff]  }
 0xcb1   : > { %3768 = vmatpush2.bf16.msra.mxu1 %v7376_v48  ;;  %v7430_v48 = vld [vmem:[#allocation9 + $0x2d0] ss:$8 sps:$4 sm:$0xff]  }
 0xcb2   : > { %3769 = vmatprep.subr.bf16.mxu1 %v7384_v49  ;;  %v7435_v49 = vld [vmem:[#allocation9 + $0x2c4] ss:$8 sps:$4 sm:$0xff]  }
 0xcb5   : > { %3770 = vmatpush2.bf16.msra.mxu1 %v7382_v51  ;;  %v7438_v51 = vld [vmem:[#allocation9 + $0x2b4] ss:$8 sps:$4 sm:$0xff]  }
 0xcb6   : > { %3771 = vmatprep.subr.bf16.mxu1 %v7390_v53  ;;  %v7441_v53 = vld [vmem:[#allocation9 + $0x2a4] ss:$8 sps:$4 sm:$0xff]  }
 0xcb9   : > { %3772 = vmatpush2.bf16.msra.mxu1 %v7388_v55  ;;  %v7444_v55 = vld [vmem:[#allocation9 + $0x294] ss:$8 sps:$4 sm:$0xff]  }
 0xcba   : > { %3773 = vmatprep.subr.bf16.mxu1 %v7396_v56  ;;  %v7447_v56 = vld [vmem:[#allocation9 + $0x284] ss:$8 sps:$4 sm:$0xff]  }
 0xcbd   : > { %3774 = vmatpush2.bf16.msra.mxu1 %v7394_v58 }
 0xd40   : > { %v3529_v59 = vpop.f32.mrf.mxu1 }
 0xd41   : > { %v3536_v60 = vadd.f32 %v3529_v59, %v8424_v7 }
 0xd42   : > { %v3531_v62 = vpop.f32.mrf.mxu1 }
 0xd43   : > { %v3545_v35 = vadd.f32 %v3543_v61, %v3536_v60  ;;  %v3537_v63 = vadd.f32 %v3531_v62, %v8427_v9 }
 0xd44   : > { %v3533_v1 = vpop.f32.mrf.mxu1 }
 0xd45   : > { %v3546_v2 = vadd.f32 %v3543_v61, %v3537_v63  ;;  %v3547_v3 = vmax.f32 %v3545_v35, 0.0 }
 0xd46   : > { %v3534_v4 = vpop.f32.mrf.mxu1 }
 0xd47   : > { %v3548_v5 = vmax.f32 %v3546_v2, 0.0  ;;  %v8436_v8 = vpack.c.bf16 %v3547_v3, %v3547_v3 }
 0xd49   : > { %v8434_v6 = vpack.c.bf16 %v3548_v5, %v3548_v5 }
 0xd4b   : > { %3775 = vmatprep.mubr.bf16.mxu1 %v8434_v6  ;;  %4013 = vmatprep.mubr.bf16.mxu0 %v8434_v6 }
 0xd4c   : > { %3776 = vmatmul.mubr.bf16.vlgmr.msra.gmra.mxu1 %v8436_v8  ;;  %4014 = vmatmul.mubr.bf16.vlgmr.msra.gmra.mxu0 %v8436_v8 }
 0xd4d   : > { %4067 = vmatprep.mubr.bf16.mxu1 %v7954_v24  ;;  %4117 = vmatprep.mubr.bf16.mxu0 %v7954_v24 }
 0xe0c   : > { %v3777_v7 = vpop.f32.mrf.mxu1  ;;  %v4015_v9 = vpop.f32.mrf.mxu0 }
 0xe0d   : > { %v3786_v10 = vpack.c.bf16 %v3777_v7, %v3777_v7  ;;  %v4024_v11 = vpack.c.bf16 %v4015_v9, %v4015_v9  ;;  %v7450_v9 = vld [vmem:[#allocation9 + $0x374] ss:$8 sps:$4 sm:$0xff]  }
 0xe0e   : > { %v3779_v12 = vpop.f32.mrf.mxu1  ;;  %v4017_v13 = vpop.f32.mrf.mxu0 }
 0xe0f   : > { %v3787_v14 = vpack.c.bf16 %v3779_v12, %v3779_v12  ;;  %v4025_v15 = vpack.c.bf16 %v4017_v13, %v4017_v13  ;;  %v4080_v19 = vsel %vm2418_vm3, %v3786_v10, 0  ;;  %v4030_v20 = vsel %vm2418_vm3, %v4024_v11, 0  ;;  %v4361_v13 = vld [vmem:[#allocation10 + $0xe8] sm:$0xf] }
 0xe10   : > { %v3781_v17 = vpop.f32.mrf.mxu1  ;;  %v4019_v18 = vpop.f32.mrf.mxu0 }
 0xe11   : > { %6534 = vmatprep.subr.msk.bf16.mxu1 %vm2418_vm3, %v4025_v15  ;;  %6536 = vmatprep.subr.msk.bf16.mxu0 %vm2418_vm3, %v3787_v14  ;;  %v7448_v14 = vld [vmem:[#allocation9 + $0x370] ss:$8 sps:$4 sm:$0xff]   ;;  %v7453_v15 = vld [vmem:[#allocation9 + $0x364] ss:$8 sps:$4 sm:$0xff]   ;;  %v7456_v17 = vld [vmem:[#allocation9 + $0x354] ss:$8 sps:$4 sm:$0xff]  }
 0xe12   : > { %v3782_v0 = vpop.f32.mrf.mxu1  ;;  %v4020_v21 = vpop.f32.mrf.mxu0  ;;  %4050 = vmatpush1.bf16.msra.mxu1 %v4030_v20  ;;  %4100 = vmatpush1.bf16.msra.mxu0 %v4080_v19  ;;  %v7454_v18 = vld [vmem:[#allocation9 + $0x350] ss:$8 sps:$4 sm:$0xff]   ;;  %v7459_v19 = vld [vmem:[#allocation9 + $0x344] ss:$8 sps:$4 sm:$0xff]   ;;  %v7457_v20 = vld [vmem:[#allocation9 + $0x340] ss:$8 sps:$4 sm:$0xff]  }
 0xe13   : > { %4319 = vmatprep.subr.bf16.mxu1 %v7402_v16  ;;  %v7451_v16 = vld [vmem:[#allocation9 + $0x360] ss:$8 sps:$4 sm:$0xff]   ;;  %v7462_v0 = vld [vmem:[#allocation9 + $0x334] ss:$8 sps:$4 sm:$0xff]   ;;  %v7460_v21 = vld [vmem:[#allocation9 + $0x330] ss:$8 sps:$4 sm:$0xff]  }
 0xe15   : > { %6535 = vmatmul.mubr.msk.bf16.vlgmr.msra.gmra.mxu1 %vm2414_vm4, %v4023_v22  ;;  %6537 = vmatmul.mubr.msk.bf16.vlgmr.msra.gmra.mxu0 %vm2414_vm4, %v3785_v23  ;;  %v7465_v22 = vld [vmem:[#allocation9 + $0x324] ss:$8 sps:$4 sm:$0xff]   ;;  %v7463_v23 = vld [vmem:[#allocation9 + $0x320] ss:$8 sps:$4 sm:$0xff]  }
 0xe16   : > { %4320 = vmatpush1.bf16.msra.mxu1 %v7400_v25  ;;  %4351 = vmatprep.mubr.bf16.mxu1 %v8434_v6  ;;  %v7468_v25 = vld [vmem:[#allocation9 + $0x314] ss:$8 sps:$4 sm:$0xff]  }
 0xe17   : > { %4321 = vmatprep.subr.bf16.mxu1 %v7405_v26  ;;  %4405 = vmatprep.mubr.bf16.mxu0 %v7954_v24  ;;  %v7466_v26 = vld [vmem:[#allocation9 + $0x310] ss:$8 sps:$4 sm:$0xff]  }
 0xe1a   : > { %4322 = vmatpush1.bf16.msra.mxu1 %v7403_v27  ;;  %v7471_v27 = vld [vmem:[#allocation9 + $0x304] ss:$8 sps:$4 sm:$0xff]  }
 0xe1b   : > { %4323 = vmatprep.subr.bf16.mxu1 %v7408_v28  ;;  %v7469_v28 = vld [vmem:[#allocation9 + $0x300] ss:$8 sps:$4 sm:$0xff]  }
 0xe1e   : > { %4324 = vmatpush1.bf16.msra.mxu1 %v7406_v30  ;;  %v7474_v30 = vld [vmem:[#allocation9 + $0x3f4] ss:$8 sps:$4 sm:$0xff]  }
 0xe1f   : > { %4325 = vmatprep.subr.bf16.mxu1 %v7411_v31  ;;  %v7472_v31 = vld [vmem:[#allocation9 + $0x3f0] ss:$8 sps:$4 sm:$0xff]  }
 0xe22   : > { %4326 = vmatpush1.bf16.msra.mxu1 %v7409_v33  ;;  %v7477_v33 = vld [vmem:[#allocation9 + $0x3e4] ss:$8 sps:$4 sm:$0xff]  }
 0xe23   : > { %4327 = vmatprep.subr.bf16.mxu1 %v7414_v34  ;;  %v7475_v34 = vld [vmem:[#allocation9 + $0x3e0] ss:$8 sps:$4 sm:$0xff]  }
 0xe26   : > { %4328 = vmatpush1.bf16.msra.mxu1 %v7412_v36  ;;  %v7480_v36 = vld [vmem:[#allocation9 + $0x3d4] ss:$8 sps:$4 sm:$0xff]  }
 0xe27   : > { %4329 = vmatprep.subr.bf16.mxu1 %v7417_v37  ;;  %v7478_v37 = vld [vmem:[#allocation9 + $0x3d0] ss:$8 sps:$4 sm:$0xff]  }
 0xe2a   : > { %4330 = vmatpush1.bf16.msra.mxu1 %v7415_v38  ;;  %v7483_v38 = vld [vmem:[#allocation9 + $0x3c4] ss:$8 sps:$4 sm:$0xff]  }
 0xe2b   : > { %4331 = vmatprep.subr.bf16.mxu1 %v7420_v39  ;;  %v7481_v39 = vld [vmem:[#allocation9 + $0x3c0] ss:$8 sps:$4 sm:$0xff]  }
 0xe2e   : > { %4332 = vmatpush1.bf16.msra.mxu1 %v7418_v40  ;;  %v7486_v40 = vld [vmem:[#allocation9 + $0x3b4] ss:$8 sps:$4 sm:$0xff]  }
 0xe2f   : > { %4333 = vmatprep.subr.bf16.mxu1 %v7423_v41  ;;  %v7484_v41 = vld [vmem:[#allocation9 + $0x3b0] ss:$8 sps:$4 sm:$0xff]  }
 0xe32   : > { %4334 = vmatpush1.bf16.msra.mxu1 %v7421_v42  ;;  %v7489_v42 = vld [vmem:[#allocation9 + $0x3a4] ss:$8 sps:$4 sm:$0xff]  }
 0xe33   : > { %4335 = vmatprep.subr.bf16.mxu1 %v7426_v43  ;;  %v7487_v43 = vld [vmem:[#allocation9 + $0x3a0] ss:$8 sps:$4 sm:$0xff]  }
 0xe36   : > { %4336 = vmatpush2.bf16.msra.mxu1 %v7424_v44  ;;  %v7492_v44 = vld [vmem:[#allocation9 + $0x394] ss:$8 sps:$4 sm:$0xff]  }
 0xe37   : > { %4337 = vmatprep.subr.bf16.mxu1 %v7429_v45  ;;  %v7490_v45 = vld [vmem:[#allocation9 + $0x390] ss:$8 sps:$4 sm:$0xff]  }
 0xe3a   : > { %4338 = vmatpush2.bf16.msra.mxu1 %v7427_v46  ;;  %v7495_v46 = vld [vmem:[#allocation9 + $0x384] ss:$8 sps:$4 sm:$0xff]  }
 0xe3b   : > { %4339 = vmatprep.subr.bf16.mxu1 %v7432_v47  ;;  %v7493_v47 = vld [vmem:[#allocation9 + $0x380] ss:$8 sps:$4 sm:$0xff]  }
 0xe3e   : > { %4340 = vmatpush2.bf16.msra.mxu1 %v7430_v48 }
 0xe3f   : > { %4341 = vmatprep.subr.bf16.mxu1 %v7435_v49 }
 0xe42   : > { %4342 = vmatpush2.bf16.msra.mxu1 %v7433_v50 }
 0xe43   : > { %4343 = vmatprep.subr.bf16.mxu1 %v7438_v51 }
 0xe46   : > { %4344 = vmatpush2.bf16.msra.mxu1 %v7436_v52 }
 0xe47   : > { %4345 = vmatprep.subr.bf16.mxu1 %v7441_v53 }
 0xe4a   : > { %4346 = vmatpush2.bf16.msra.mxu1 %v7439_v54 }
 0xe4b   : > { %4347 = vmatprep.subr.bf16.mxu1 %v7444_v55 }
 0xe4e   : > { %4348 = vmatpush2.bf16.msra.mxu1 %v7442_v29 }
 0xe4f   : > { %4349 = vmatprep.subr.bf16.mxu1 %v7447_v56 }
 0xe52   : > { %4350 = vmatpush2.bf16.msra.mxu1 %v7445_v57  ;;  %v7498_v57 = vld [vmem:[#allocation9 + $0x474] ss:$8 sps:$4 sm:$0xff]  }
 0xe55   : > { %4352 = vmatmul.mubr.bf16.vlgmr.msra.gmra.mxu1 %v8436_v8 }
 0xe56   : > { %4695 = vmatprep.mubr.bf16.mxu1 %v7954_v24 }
 0xed5   : > { %v4069_v58 = vpop.f32.mrf.mxu1  ;;  %v4119_v32 = vpop.f32.mrf.mxu0 }
 0xed6   : > { %v8454_v59 = vadd.f32 %v4119_v32, %v4069_v58 }
 0xed7   : > { %v4071_v60 = vpop.f32.mrf.mxu1  ;;  %v4121_v61 = vpop.f32.mrf.mxu0 }
 0xed8   : > { %v8456_v62 = vadd.f32 %v4121_v61, %v4071_v60  ;;  %v7496_v61 = vld [vmem:[#allocation9 + $0x470] ss:$8 sps:$4 sm:$0xff]  }
 0xed9   : > { %v4073_v35 = vpop.f32.mrf.mxu1  ;;  %v4123_v63 = vpop.f32.mrf.mxu0 }
 0xeda   : > { %v7501_v35 = vld [vmem:[#allocation9 + $0x464] ss:$8 sps:$4 sm:$0xff]   ;;  %v7504_v63 = vld [vmem:[#allocation9 + $0x454] ss:$8 sps:$4 sm:$0xff]  }
 0xedb   : > { %v4074_v1 = vpop.f32.mrf.mxu1  ;;  %v4124_v2 = vpop.f32.mrf.mxu0 }
 0xedc   : > { %v7502_v1 = vld [vmem:[#allocation9 + $0x450] ss:$8 sps:$4 sm:$0xff]   ;;  %v7507_v2 = vld [vmem:[#allocation9 + $0x444] ss:$8 sps:$4 sm:$0xff]  }
 0xf15   : > { %v4353_v3 = vpop.f32.mrf.mxu1 }
 0xf16   : > { %v4362_v4 = vpack.c.bf16 %v4353_v3, %v4353_v3  ;;  %v7505_v3 = vld [vmem:[#allocation9 + $0x440] ss:$8 sps:$4 sm:$0xff]  }
 0xf17   : > { %v4355_v5 = vpop.f32.mrf.mxu1 }
 0xf18   : > { %v4363_v7 = vpack.c.bf16 %v4355_v5, %v4355_v5  ;;  %v4368_v11 = vsel %vm2418_vm3, %v4362_v4, 0  ;;  %v7510_v4 = vld [vmem:[#allocation9 + $0x434] ss:$8 sps:$4 sm:$0xff]   ;;  %v7508_v5 = vld [vmem:[#allocation9 + $0x430] ss:$8 sps:$4 sm:$0xff]  }
 0xf19   : > { %v4357_v10 = vpop.f32.mrf.mxu1 }
 0xf1a   : > { %6570 = vmatprep.subr.msk.bf16.mxu0 %vm2418_vm3, %v4363_v7  ;;  %v7513_v7 = vld [vmem:[#allocation9 + $0x424] ss:$8 sps:$4 sm:$0xff]   ;;  %v7516_v10 = vld [vmem:[#allocation9 + $0x414] ss:$8 sps:$4 sm:$0xff]  }
 0xf1b   : > { %v4358_v12 = vpop.f32.mrf.mxu1  ;;  %4388 = vmatpush1.bf16.msra.mxu0 %v4368_v11  ;;  %v7514_v11 = vld [vmem:[#allocation9 + $0x410] ss:$8 sps:$4 sm:$0xff]  }
 0xf1c   : > { %4609 = vmatprep.subr.bf16.mxu0 %v7450_v9  ;;  %v7511_v9 = vld [vmem:[#allocation9 + $0x420] ss:$8 sps:$4 sm:$0xff]   ;;  %v7519_v12 = vld [vmem:[#allocation9 + $0x404] ss:$8 sps:$4 sm:$0xff]  }
 0xf1e   : > { %6571 = vmatmul.mubr.msk.bf16.vlgmr.msra.gmra.mxu0 %vm2414_vm4, %v4361_v13  ;;  %v7517_v13 = vld [vmem:[#allocation9 + $0x400] ss:$8 sps:$4 sm:$0xff]  }
 0xf1f   : > { %4610 = vmatpush1.bf16.msra.mxu0 %v7448_v14  ;;  %4641 = vmatprep.mubr.bf16.mxu0 %v8434_v6  ;;  %v7522_v14 = vld [vmem:[#allocation9 + $0x4f4] ss:$8 sps:$4 sm:$0xff]  }
 0xf20   : > { %4611 = vmatprep.subr.bf16.mxu0 %v7453_v15  ;;  %v7520_v15 = vld [vmem:[#allocation9 + $0x4f0] ss:$8 sps:$4 sm:$0xff]  }
 0xf23   : > { %4612 = vmatpush1.bf16.msra.mxu0 %v7451_v16  ;;  %v7525_v16 = vld [vmem:[#allocation9 + $0x4e4] ss:$8 sps:$4 sm:$0xff]  }
 0xf24   : > { %4613 = vmatprep.subr.bf16.mxu0 %v7456_v17  ;;  %v7523_v17 = vld [vmem:[#allocation9 + $0x4e0] ss:$8 sps:$4 sm:$0xff]  }
 0xf27   : > { %4614 = vmatpush1.bf16.msra.mxu0 %v7454_v18  ;;  %v7528_v18 = vld [vmem:[#allocation9 + $0x4d4] ss:$8 sps:$4 sm:$0xff]  }
 0xf28   : > { %4615 = vmatprep.subr.bf16.mxu0 %v7459_v19  ;;  %v7526_v19 = vld [vmem:[#allocation9 + $0x4d0] ss:$8 sps:$4 sm:$0xff]  }
 0xf2b   : > { %4616 = vmatpush1.bf16.msra.mxu0 %v7457_v20  ;;  %v7531_v20 = vld [vmem:[#allocation9 + $0x4c4] ss:$8 sps:$4 sm:$0xff]  }
 0xf2c   : > { %4617 = vmatprep.subr.bf16.mxu0 %v7462_v0  ;;  %v7529_v0 = vld [vmem:[#allocation9 + $0x4c0] ss:$8 sps:$4 sm:$0xff]  }
 0xf2f   : > { %4618 = vmatpush1.bf16.msra.mxu0 %v7460_v21  ;;  %v7534_v21 = vld [vmem:[#allocation9 + $0x4b4] ss:$8 sps:$4 sm:$0xff]  }
 0xf30   : > { %4619 = vmatprep.subr.bf16.mxu0 %v7465_v22  ;;  %v7532_v22 = vld [vmem:[#allocation9 + $0x4b0] ss:$8 sps:$4 sm:$0xff]  }
 0xf33   : > { %4620 = vmatpush1.bf16.msra.mxu0 %v7463_v23  ;;  %v7537_v23 = vld [vmem:[#allocation9 + $0x4a4] ss:$8 sps:$4 sm:$0xff]  }
 0xf34   : > { %4621 = vmatprep.subr.bf16.mxu0 %v7468_v25  ;;  %v7535_v25 = vld [vmem:[#allocation9 + $0x4a0] ss:$8 sps:$4 sm:$0xff]  }
 0xf37   : > { %4622 = vmatpush1.bf16.msra.mxu0 %v7466_v26  ;;  %v7540_v26 = vld [vmem:[#allocation9 + $0x494] ss:$8 sps:$4 sm:$0xff]  }
 0xf38   : > { %4623 = vmatprep.subr.bf16.mxu0 %v7471_v27  ;;  %v7538_v27 = vld [vmem:[#allocation9 + $0x490] ss:$8 sps:$4 sm:$0xff]  }
 0xf3b   : > { %4624 = vmatpush1.bf16.msra.mxu0 %v7469_v28  ;;  %v7543_v28 = vld [vmem:[#allocation9 + $0x484] ss:$8 sps:$4 sm:$0xff]  }
 0xf3c   : > { %4625 = vmatprep.subr.bf16.mxu0 %v7474_v30  ;;  %v7541_v30 = vld [vmem:[#allocation9 + $0x480] ss:$8 sps:$4 sm:$0xff]  }
 0xf3f   : > { %4626 = vmatpush2.bf16.msra.mxu0 %v7472_v31 }
 0xf40   : > { %4627 = vmatprep.subr.bf16.mxu0 %v7477_v33 }
 0xf43   : > { %4628 = vmatpush2.bf16.msra.mxu0 %v7475_v34 }
 0xf44   : > { %4629 = vmatprep.subr.bf16.mxu0 %v7480_v36 }
 0xf47   : > { %4630 = vmatpush2.bf16.msra.mxu0 %v7478_v37 }
 0xf48   : > { %4631 = vmatprep.subr.bf16.mxu0 %v7483_v38 }
 0xf4b   : > { %4632 = vmatpush2.bf16.msra.mxu0 %v7481_v39 }
 0xf4c   : > { %4633 = vmatprep.subr.bf16.mxu0 %v7486_v40 }
 0xf4f   : > { %4634 = vmatpush2.bf16.msra.mxu0 %v7484_v41 }
 0xf50   : > { %4635 = vmatprep.subr.bf16.mxu0 %v7489_v42 }
 0xf53   : > { %4636 = vmatpush2.bf16.msra.mxu0 %v7487_v43  ;;  %v7546_v43 = vld [vmem:[#allocation9 + $0x574] ss:$8 sps:$4 sm:$0xff]  }
 0xf54   : > { %4637 = vmatprep.subr.bf16.mxu0 %v7492_v44 }
 0xf57   : > { %4638 = vmatpush2.bf16.msra.mxu0 %v7490_v45 }
 0xf58   : > { %4639 = vmatprep.subr.bf16.mxu0 %v7495_v46 }
 0xf5b   : > { %4640 = vmatpush2.bf16.msra.mxu0 %v7493_v47  ;;  %v4941_v47 = vld [vmem:[#allocation10 + $0xf8] sm:$0xf] }
 0xf5e   : > { %4642 = vmatmul.mubr.bf16.vlgmr.msra.gmra.mxu0 %v8436_v8 }
 0xf5f   : > { %4985 = vmatprep.mubr.bf16.mxu0 %v7954_v24 }
 0xfde   : > { %v4407_v48 = vpop.f32.mrf.mxu0 }
 0xfdf   : > { %v8465_v49 = vadd.f32 %v4407_v48, %v8454_v59  ;;  %v4651_v59 = vld [vmem:[#allocation10 + $0xf0] sm:$0xf] }
 0xfe0   : > { %v4409_v50 = vpop.f32.mrf.mxu0  ;;  %v7544_v48 = vld [vmem:[#allocation9 + $0x570] ss:$8 sps:$4 sm:$0xff]  }
 0xfe1   : > { %v8468_v51 = vadd.f32 %v4409_v50, %v8456_v62  ;;  %v7499_v62 = vld [vmem:[#allocation9 + $0x460] ss:$8 sps:$4 sm:$0xff]  }
 0xfe2   : > { %v4411_v52 = vpop.f32.mrf.mxu0  ;;  %v7547_v50 = vld [vmem:[#allocation9 + $0x560] ss:$8 sps:$4 sm:$0xff]  }
 0xfe3   : > { %v7550_v52 = vld [vmem:[#allocation9 + $0x550] ss:$8 sps:$4 sm:$0xff]  }
 0xfe4   : > { %v4412_v53 = vpop.f32.mrf.mxu0 }
 0xfe5   : > { %v7555_v53 = vld [vmem:[#allocation9 + $0x544] ss:$8 sps:$4 sm:$0xff]  }
0x101e   : > { %v4643_v54 = vpop.f32.mrf.mxu0 }
0x101f   : > { %v4652_v55 = vpack.c.bf16 %v4643_v54, %v4643_v54  ;;  %v7553_v54 = vld [vmem:[#allocation9 + $0x540] ss:$8 sps:$4 sm:$0xff]  }
0x1020   : > { %v4645_v29 = vpop.f32.mrf.mxu0 }
0x1021   : > { %v4653_v56 = vpack.c.bf16 %v4645_v29, %v4645_v29  ;;  %v4658_v32 = vsel %vm2418_vm3, %v4652_v55, 0  ;;  %v7558_v55 = vld [vmem:[#allocation9 + $0x534] ss:$8 sps:$4 sm:$0xff]   ;;  %v7556_v29 = vld [vmem:[#allocation9 + $0x530] ss:$8 sps:$4 sm:$0xff]  }
0x1022   : > { %v4647_v58 = vpop.f32.mrf.mxu0 }
0x1023   : > { %6604 = vmatprep.subr.msk.bf16.mxu1 %vm2418_vm3, %v4653_v56  ;;  %v7561_v56 = vld [vmem:[#allocation9 + $0x524] ss:$8 sps:$4 sm:$0xff]   ;;  %v7564_v58 = vld [vmem:[#allocation9 + $0x514] ss:$8 sps:$4 sm:$0xff]  }
0x1024   : > { %v4648_v60 = vpop.f32.mrf.mxu0  ;;  %4678 = vmatpush1.bf16.msra.mxu1 %v4658_v32  ;;  %v7562_v32 = vld [vmem:[#allocation9 + $0x510] ss:$8 sps:$4 sm:$0xff]  }
0x1025   : > { %4899 = vmatprep.subr.bf16.mxu1 %v7498_v57  ;;  %v7559_v57 = vld [vmem:[#allocation9 + $0x520] ss:$8 sps:$4 sm:$0xff]   ;;  %v7567_v60 = vld [vmem:[#allocation9 + $0x504] ss:$8 sps:$4 sm:$0xff]  }
0x1027   : > { %6605 = vmatmul.mubr.msk.bf16.vlgmr.msra.gmra.mxu1 %vm2414_vm4, %v4651_v59  ;;  %v7565_v59 = vld [vmem:[#allocation9 + $0x500] ss:$8 sps:$4 sm:$0xff]  }
0x1028   : > { %4900 = vmatpush1.bf16.msra.mxu1 %v7496_v61  ;;  %4931 = vmatprep.mubr.bf16.mxu1 %v8434_v6  ;;  %v7570_v61 = vld [vmem:[#allocation9 + $0x5f4] ss:$8 sps:$4 sm:$0xff]  }
0x1029   : > { %4901 = vmatprep.subr.bf16.mxu1 %v7501_v35  ;;  %v7568_v35 = vld [vmem:[#allocation9 + $0x5f0] ss:$8 sps:$4 sm:$0xff]  }
0x102c   : > { %4902 = vmatpush1.bf16.msra.mxu1 %v7499_v62  ;;  %v7573_v62 = vld [vmem:[#allocation9 + $0x5e4] ss:$8 sps:$4 sm:$0xff]  }
0x102d   : > { %4903 = vmatprep.subr.bf16.mxu1 %v7504_v63  ;;  %v7571_v63 = vld [vmem:[#allocation9 + $0x5e0] ss:$8 sps:$4 sm:$0xff]  }
0x1030   : > { %4904 = vmatpush1.bf16.msra.mxu1 %v7502_v1  ;;  %v7576_v1 = vld [vmem:[#allocation9 + $0x5d4] ss:$8 sps:$4 sm:$0xff]  }
0x1031   : > { %4905 = vmatprep.subr.bf16.mxu1 %v7507_v2  ;;  %v7574_v2 = vld [vmem:[#allocation9 + $0x5d0] ss:$8 sps:$4 sm:$0xff]  }
0x1034   : > { %4906 = vmatpush1.bf16.msra.mxu1 %v7505_v3  ;;  %v7579_v3 = vld [vmem:[#allocation9 + $0x5c4] ss:$8 sps:$4 sm:$0xff]  }
0x1035   : > { %4907 = vmatprep.subr.bf16.mxu1 %v7510_v4  ;;  %v7577_v4 = vld [vmem:[#allocation9 + $0x5c0] ss:$8 sps:$4 sm:$0xff]  }
0x1038   : > { %4908 = vmatpush1.bf16.msra.mxu1 %v7508_v5  ;;  %v7582_v5 = vld [vmem:[#allocation9 + $0x5b4] ss:$8 sps:$4 sm:$0xff]  }
0x1039   : > { %4909 = vmatprep.subr.bf16.mxu1 %v7513_v7  ;;  %v7580_v7 = vld [vmem:[#allocation9 + $0x5b0] ss:$8 sps:$4 sm:$0xff]  }
0x103c   : > { %4910 = vmatpush1.bf16.msra.mxu1 %v7511_v9  ;;  %v7585_v9 = vld [vmem:[#allocation9 + $0x5a4] ss:$8 sps:$4 sm:$0xff]  }
0x103d   : > { %4911 = vmatprep.subr.bf16.mxu1 %v7516_v10  ;;  %v7583_v10 = vld [vmem:[#allocation9 + $0x5a0] ss:$8 sps:$4 sm:$0xff]  }
0x1040   : > { %4912 = vmatpush1.bf16.msra.mxu1 %v7514_v11  ;;  %v7588_v11 = vld [vmem:[#allocation9 + $0x594] ss:$8 sps:$4 sm:$0xff]  }
0x1041   : > { %4913 = vmatprep.subr.bf16.mxu1 %v7519_v12  ;;  %v7586_v12 = vld [vmem:[#allocation9 + $0x590] ss:$8 sps:$4 sm:$0xff]  }
0x1044   : > { %4914 = vmatpush1.bf16.msra.mxu1 %v7517_v13  ;;  %v7591_v13 = vld [vmem:[#allocation9 + $0x584] ss:$8 sps:$4 sm:$0xff]  }
0x1045   : > { %4915 = vmatprep.subr.bf16.mxu1 %v7522_v14  ;;  %v7589_v14 = vld [vmem:[#allocation9 + $0x580] ss:$8 sps:$4 sm:$0xff]  }
0x1048   : > { %4916 = vmatpush2.bf16.msra.mxu1 %v7520_v15 }
0x1049   : > { %4917 = vmatprep.subr.bf16.mxu1 %v7525_v16 }
0x104c   : > { %4918 = vmatpush2.bf16.msra.mxu1 %v7523_v17 }
0x104d   : > { %4919 = vmatprep.subr.bf16.mxu1 %v7528_v18 }
0x1050   : > { %4920 = vmatpush2.bf16.msra.mxu1 %v7526_v19 }
0x1051   : > { %4921 = vmatprep.subr.bf16.mxu1 %v7531_v20 }
0x1054   : > { %4922 = vmatpush2.bf16.msra.mxu1 %v7529_v0 }
0x1055   : > { %4923 = vmatprep.subr.bf16.mxu1 %v7534_v21 }
0x1058   : > { %4924 = vmatpush2.bf16.msra.mxu1 %v7532_v22 }
0x1059   : > { %4925 = vmatprep.subr.bf16.mxu1 %v7537_v23 }
0x105c   : > { %4926 = vmatpush2.bf16.msra.mxu1 %v7535_v25  ;;  %v7594_v25 = vld [vmem:[#allocation9 + $0x674] ss:$8 sps:$4 sm:$0xff]  }
0x105d   : > { %4927 = vmatprep.subr.bf16.mxu1 %v7540_v26 }
0x1060   : > { %4928 = vmatpush2.bf16.msra.mxu1 %v7538_v27 }
0x1061   : > { %4929 = vmatprep.subr.bf16.mxu1 %v7543_v28 }
0x1064   : > { %4930 = vmatpush2.bf16.msra.mxu1 %v7541_v30  ;;  %v5231_v30 = vld [vmem:[#allocation10 + $0x100] sm:$0xf] }
0x1067   : > { %4932 = vmatmul.mubr.bf16.vlgmr.msra.gmra.mxu1 %v8436_v8 }
0x1068   : > { %5275 = vmatprep.mubr.bf16.mxu1 %v7954_v24 }
0x10e7   : > { %v4697_v31 = vpop.f32.mrf.mxu1 }
0x10e8   : > { %v8477_v33 = vadd.f32 %v4697_v31, %v8465_v49  ;;  %v7549_v49 = vld [vmem:[#allocation9 + $0x564] ss:$8 sps:$4 sm:$0xff]   ;;  %v7592_v31 = vld [vmem:[#allocation9 + $0x670] ss:$8 sps:$4 sm:$0xff]  }
0x10e9   : > { %v4699_v34 = vpop.f32.mrf.mxu1 }
0x10ea   : > { %v8480_v36 = vadd.f32 %v4699_v34, %v8468_v51  ;;  %v7552_v51 = vld [vmem:[#allocation9 + $0x554] ss:$8 sps:$4 sm:$0xff]   ;;  %v7595_v34 = vld [vmem:[#allocation9 + $0x660] ss:$8 sps:$4 sm:$0xff]  }
0x10eb   : > { %v4701_v37 = vpop.f32.mrf.mxu1 }
0x10ec   : > { %v7598_v37 = vld [vmem:[#allocation9 + $0x650] ss:$8 sps:$4 sm:$0xff]  }
0x10ed   : > { %v4702_v38 = vpop.f32.mrf.mxu1 }
0x10ee   : > { %v7603_v38 = vld [vmem:[#allocation9 + $0x644] ss:$8 sps:$4 sm:$0xff]  }
0x1127   : > { %v4933_v39 = vpop.f32.mrf.mxu1 }
0x1128   : > { %v4942_v40 = vpack.c.bf16 %v4933_v39, %v4933_v39  ;;  %v7601_v39 = vld [vmem:[#allocation9 + $0x640] ss:$8 sps:$4 sm:$0xff]  }
0x1129   : > { %v4935_v41 = vpop.f32.mrf.mxu1 }
0x112a   : > { %v4943_v42 = vpack.c.bf16 %v4935_v41, %v4935_v41  ;;  %v4948_v45 = vsel %vm2418_vm3, %v4942_v40, 0  ;;  %v7606_v40 = vld [vmem:[#allocation9 + $0x634] ss:$8 sps:$4 sm:$0xff]   ;;  %v7604_v41 = vld [vmem:[#allocation9 + $0x630] ss:$8 sps:$4 sm:$0xff]  }
0x112b   : > { %v4937_v44 = vpop.f32.mrf.mxu1 }
0x112c   : > { %6638 = vmatprep.subr.msk.bf16.mxu0 %vm2418_vm3, %v4943_v42  ;;  %v7609_v42 = vld [vmem:[#allocation9 + $0x624] ss:$8 sps:$4 sm:$0xff]   ;;  %v7612_v44 = vld [vmem:[#allocation9 + $0x614] ss:$8 sps:$4 sm:$0xff]  }
0x112d   : > { %v4938_v46 = vpop.f32.mrf.mxu1  ;;  %4968 = vmatpush1.bf16.msra.mxu0 %v4948_v45  ;;  %v7610_v45 = vld [vmem:[#allocation9 + $0x610] ss:$8 sps:$4 sm:$0xff]  }
0x112e   : > { %5189 = vmatprep.subr.bf16.mxu0 %v7546_v43  ;;  %v7607_v43 = vld [vmem:[#allocation9 + $0x620] ss:$8 sps:$4 sm:$0xff]   ;;  %v7615_v46 = vld [vmem:[#allocation9 + $0x604] ss:$8 sps:$4 sm:$0xff]  }
0x1130   : > { %6639 = vmatmul.mubr.msk.bf16.vlgmr.msra.gmra.mxu0 %vm2414_vm4, %v4941_v47  ;;  %v7613_v47 = vld [vmem:[#allocation9 + $0x600] ss:$8 sps:$4 sm:$0xff]  }
0x1131   : > { %5190 = vmatpush1.bf16.msra.mxu0 %v7544_v48  ;;  %5221 = vmatprep.mubr.bf16.mxu0 %v8434_v6  ;;  %v7618_v48 = vld [vmem:[#allocation9 + $0x6f4] ss:$8 sps:$4 sm:$0xff]  }
0x1132   : > { %5191 = vmatprep.subr.bf16.mxu0 %v7549_v49  ;;  %v7616_v49 = vld [vmem:[#allocation9 + $0x6f0] ss:$8 sps:$4 sm:$0xff]  }
0x1135   : > { %5192 = vmatpush1.bf16.msra.mxu0 %v7547_v50  ;;  %v7621_v50 = vld [vmem:[#allocation9 + $0x6e4] ss:$8 sps:$4 sm:$0xff]  }
0x1136   : > { %5193 = vmatprep.subr.bf16.mxu0 %v7552_v51  ;;  %v7619_v51 = vld [vmem:[#allocation9 + $0x6e0] ss:$8 sps:$4 sm:$0xff]  }
0x1139   : > { %5194 = vmatpush1.bf16.msra.mxu0 %v7550_v52  ;;  %v7624_v52 = vld [vmem:[#allocation9 + $0x6d4] ss:$8 sps:$4 sm:$0xff]  }
0x113a   : > { %5195 = vmatprep.subr.bf16.mxu0 %v7555_v53  ;;  %v7622_v53 = vld [vmem:[#allocation9 + $0x6d0] ss:$8 sps:$4 sm:$0xff]  }
0x113d   : > { %5196 = vmatpush1.bf16.msra.mxu0 %v7553_v54  ;;  %v7627_v54 = vld [vmem:[#allocation9 + $0x6c4] ss:$8 sps:$4 sm:$0xff]  }
0x113e   : > { %5197 = vmatprep.subr.bf16.mxu0 %v7558_v55  ;;  %v7625_v55 = vld [vmem:[#allocation9 + $0x6c0] ss:$8 sps:$4 sm:$0xff]  }
0x1141   : > { %5198 = vmatpush1.bf16.msra.mxu0 %v7556_v29  ;;  %v7630_v29 = vld [vmem:[#allocation9 + $0x6b4] ss:$8 sps:$4 sm:$0xff]  }
0x1142   : > { %5199 = vmatprep.subr.bf16.mxu0 %v7561_v56  ;;  %v7628_v56 = vld [vmem:[#allocation9 + $0x6b0] ss:$8 sps:$4 sm:$0xff]  }
0x1145   : > { %5200 = vmatpush1.bf16.msra.mxu0 %v7559_v57  ;;  %v7633_v57 = vld [vmem:[#allocation9 + $0x6a4] ss:$8 sps:$4 sm:$0xff]  }
0x1146   : > { %5201 = vmatprep.subr.bf16.mxu0 %v7564_v58  ;;  %v7631_v58 = vld [vmem:[#allocation9 + $0x6a0] ss:$8 sps:$4 sm:$0xff]  }
0x1149   : > { %5202 = vmatpush1.bf16.msra.mxu0 %v7562_v32  ;;  %v7636_v32 = vld [vmem:[#allocation9 + $0x694] ss:$8 sps:$4 sm:$0xff]  }
0x114a   : > { %5203 = vmatprep.subr.bf16.mxu0 %v7567_v60  ;;  %v7634_v60 = vld [vmem:[#allocation9 + $0x690] ss:$8 sps:$4 sm:$0xff]  }
0x114d   : > { %5204 = vmatpush1.bf16.msra.mxu0 %v7565_v59  ;;  %v7639_v59 = vld [vmem:[#allocation9 + $0x684] ss:$8 sps:$4 sm:$0xff]  }
0x114e   : > { %5205 = vmatprep.subr.bf16.mxu0 %v7570_v61  ;;  %v7637_v61 = vld [vmem:[#allocation9 + $0x680] ss:$8 sps:$4 sm:$0xff]  }
0x1151   : > { %5206 = vmatpush2.bf16.msra.mxu0 %v7568_v35 }
0x1152   : > { %5207 = vmatprep.subr.bf16.mxu0 %v7573_v62 }
0x1155   : > { %5208 = vmatpush2.bf16.msra.mxu0 %v7571_v63 }
0x1156   : > { %5209 = vmatprep.subr.bf16.mxu0 %v7576_v1 }
0x1159   : > { %5210 = vmatpush2.bf16.msra.mxu0 %v7574_v2 }
0x115a   : > { %5211 = vmatprep.subr.bf16.mxu0 %v7579_v3 }
0x115d   : > { %5212 = vmatpush2.bf16.msra.mxu0 %v7577_v4 }
0x115e   : > { %5213 = vmatprep.subr.bf16.mxu0 %v7582_v5 }
0x1161   : > { %5214 = vmatpush2.bf16.msra.mxu0 %v7580_v7 }
0x1162   : > { %5215 = vmatprep.subr.bf16.mxu0 %v7585_v9 }
0x1165   : > { %5216 = vmatpush2.bf16.msra.mxu0 %v7583_v10  ;;  %v7642_v10 = vld [vmem:[#allocation9 + $0x774] ss:$8 sps:$4 sm:$0xff]  }
0x1166   : > { %5217 = vmatprep.subr.bf16.mxu0 %v7588_v11 }
0x1169   : > { %5218 = vmatpush2.bf16.msra.mxu0 %v7586_v12 }
0x116a   : > { %5219 = vmatprep.subr.bf16.mxu0 %v7591_v13 }
0x116d   : > { %5220 = vmatpush2.bf16.msra.mxu0 %v7589_v14  ;;  %v5521_v14 = vld [vmem:[#allocation10 + $0x108] sm:$0xf] }
0x1170   : > { %5222 = vmatmul.mubr.bf16.vlgmr.msra.gmra.mxu0 %v8436_v8 }
0x1171   : > { %5565 = vmatprep.mubr.bf16.mxu0 %v7954_v24 }
0x11f0   : > { %v4987_v15 = vpop.f32.mrf.mxu0 }
0x11f1   : > { %v8489_v16 = vadd.f32 %v4987_v15, %v8477_v33  ;;  %v7597_v33 = vld [vmem:[#allocation9 + $0x664] ss:$8 sps:$4 sm:$0xff]   ;;  %v7640_v15 = vld [vmem:[#allocation9 + $0x770] ss:$8 sps:$4 sm:$0xff]  }
0x11f2   : > { %v4989_v17 = vpop.f32.mrf.mxu0 }
0x11f3   : > { %v8492_v18 = vadd.f32 %v4989_v17, %v8480_v36  ;;  %v7600_v36 = vld [vmem:[#allocation9 + $0x654] ss:$8 sps:$4 sm:$0xff]   ;;  %v7643_v17 = vld [vmem:[#allocation9 + $0x760] ss:$8 sps:$4 sm:$0xff]  }
0x11f4   : > { %v4991_v19 = vpop.f32.mrf.mxu0 }
0x11f5   : > { %v7646_v19 = vld [vmem:[#allocation9 + $0x750] ss:$8 sps:$4 sm:$0xff]  }
0x11f6   : > { %v4992_v20 = vpop.f32.mrf.mxu0 }
0x11f7   : > { %v7651_v20 = vld [vmem:[#allocation9 + $0x744] ss:$8 sps:$4 sm:$0xff]  }
0x1230   : > { %v5223_v0 = vpop.f32.mrf.mxu0 }
0x1231   : > { %v5232_v21 = vpack.c.bf16 %v5223_v0, %v5223_v0  ;;  %v7649_v0 = vld [vmem:[#allocation9 + $0x740] ss:$8 sps:$4 sm:$0xff]  }
0x1232   : > { %v5225_v22 = vpop.f32.mrf.mxu0 }
0x1233   : > { %v5233_v23 = vpack.c.bf16 %v5225_v22, %v5225_v22  ;;  %v5238_v27 = vsel %vm2418_vm3, %v5232_v21, 0  ;;  %v7654_v21 = vld [vmem:[#allocation9 + $0x734] ss:$8 sps:$4 sm:$0xff]   ;;  %v7652_v22 = vld [vmem:[#allocation9 + $0x730] ss:$8 sps:$4 sm:$0xff]  }
0x1234   : > { %v5227_v26 = vpop.f32.mrf.mxu0 }
0x1235   : > { %6672 = vmatprep.subr.msk.bf16.mxu1 %vm2418_vm3, %v5233_v23  ;;  %v7657_v23 = vld [vmem:[#allocation9 + $0x724] ss:$8 sps:$4 sm:$0xff]   ;;  %v7660_v26 = vld [vmem:[#allocation9 + $0x714] ss:$8 sps:$4 sm:$0xff]  }
0x1236   : > { %v5228_v28 = vpop.f32.mrf.mxu0  ;;  %5258 = vmatpush1.bf16.msra.mxu1 %v5238_v27  ;;  %v7658_v27 = vld [vmem:[#allocation9 + $0x710] ss:$8 sps:$4 sm:$0xff]  }
0x1237   : > { %5479 = vmatprep.subr.bf16.mxu1 %v7594_v25  ;;  %v7655_v25 = vld [vmem:[#allocation9 + $0x720] ss:$8 sps:$4 sm:$0xff]   ;;  %v7663_v28 = vld [vmem:[#allocation9 + $0x704] ss:$8 sps:$4 sm:$0xff]  }
0x1239   : > { %6673 = vmatmul.mubr.msk.bf16.vlgmr.msra.gmra.mxu1 %vm2414_vm4, %v5231_v30  ;;  %v7661_v30 = vld [vmem:[#allocation9 + $0x700] ss:$8 sps:$4 sm:$0xff]  }
0x123a   : > { %5480 = vmatpush1.bf16.msra.mxu1 %v7592_v31  ;;  %5511 = vmatprep.mubr.bf16.mxu1 %v8434_v6  ;;  %v7666_v31 = vld [vmem:[#allocation9 + $0x7f4] ss:$8 sps:$4 sm:$0xff]  }
0x123b   : > { %5481 = vmatprep.subr.bf16.mxu1 %v7597_v33  ;;  %v7664_v33 = vld [vmem:[#allocation9 + $0x7f0] ss:$8 sps:$4 sm:$0xff]  }
0x123e   : > { %5482 = vmatpush1.bf16.msra.mxu1 %v7595_v34  ;;  %v7669_v34 = vld [vmem:[#allocation9 + $0x7e4] ss:$8 sps:$4 sm:$0xff]  }
0x123f   : > { %5483 = vmatprep.subr.bf16.mxu1 %v7600_v36  ;;  %v7667_v36 = vld [vmem:[#allocation9 + $0x7e0] ss:$8 sps:$4 sm:$0xff]  }
0x1242   : > { %5484 = vmatpush1.bf16.msra.mxu1 %v7598_v37  ;;  %v7672_v37 = vld [vmem:[#allocation9 + $0x7d4] ss:$8 sps:$4 sm:$0xff]  }
0x1243   : > { %5485 = vmatprep.subr.bf16.mxu1 %v7603_v38  ;;  %v7670_v38 = vld [vmem:[#allocation9 + $0x7d0] ss:$8 sps:$4 sm:$0xff]  }
0x1246   : > { %5486 = vmatpush1.bf16.msra.mxu1 %v7601_v39  ;;  %v7675_v39 = vld [vmem:[#allocation9 + $0x7c4] ss:$8 sps:$4 sm:$0xff]  }
0x1247   : > { %5487 = vmatprep.subr.bf16.mxu1 %v7606_v40  ;;  %v7673_v40 = vld [vmem:[#allocation9 + $0x7c0] ss:$8 sps:$4 sm:$0xff]  }
0x124a   : > { %5488 = vmatpush1.bf16.msra.mxu1 %v7604_v41  ;;  %v7678_v41 = vld [vmem:[#allocation9 + $0x7b4] ss:$8 sps:$4 sm:$0xff]  }
0x124b   : > { %5489 = vmatprep.subr.bf16.mxu1 %v7609_v42  ;;  %v7676_v42 = vld [vmem:[#allocation9 + $0x7b0] ss:$8 sps:$4 sm:$0xff]  }
0x124e   : > { %5490 = vmatpush1.bf16.msra.mxu1 %v7607_v43  ;;  %v7681_v43 = vld [vmem:[#allocation9 + $0x7a4] ss:$8 sps:$4 sm:$0xff]  }
0x124f   : > { %5491 = vmatprep.subr.bf16.mxu1 %v7612_v44  ;;  %v7679_v44 = vld [vmem:[#allocation9 + $0x7a0] ss:$8 sps:$4 sm:$0xff]  }
0x1252   : > { %5492 = vmatpush1.bf16.msra.mxu1 %v7610_v45  ;;  %v7684_v45 = vld [vmem:[#allocation9 + $0x794] ss:$8 sps:$4 sm:$0xff]  }
0x1253   : > { %5493 = vmatprep.subr.bf16.mxu1 %v7615_v46  ;;  %v7682_v46 = vld [vmem:[#allocation9 + $0x790] ss:$8 sps:$4 sm:$0xff]  }
0x1256   : > { %5494 = vmatpush1.bf16.msra.mxu1 %v7613_v47  ;;  %v7687_v47 = vld [vmem:[#allocation9 + $0x784] ss:$8 sps:$4 sm:$0xff]  }
0x1257   : > { %5495 = vmatprep.subr.bf16.mxu1 %v7618_v48  ;;  %v7685_v48 = vld [vmem:[#allocation9 + $0x780] ss:$8 sps:$4 sm:$0xff]  }
0x125a   : > { %5496 = vmatpush2.bf16.msra.mxu1 %v7616_v49 }
0x125b   : > { %5497 = vmatprep.subr.bf16.mxu1 %v7621_v50 }
0x125e   : > { %5498 = vmatpush2.bf16.msra.mxu1 %v7619_v51 }
0x125f   : > { %5499 = vmatprep.subr.bf16.mxu1 %v7624_v52 }
0x1262   : > { %5500 = vmatpush2.bf16.msra.mxu1 %v7622_v53 }
0x1263   : > { %5501 = vmatprep.subr.bf16.mxu1 %v7627_v54 }
0x1266   : > { %5502 = vmatpush2.bf16.msra.mxu1 %v7625_v55 }
0x1267   : > { %5503 = vmatprep.subr.bf16.mxu1 %v7630_v29 }
0x126a   : > { %5504 = vmatpush2.bf16.msra.mxu1 %v7628_v56 }
0x126b   : > { %5505 = vmatprep.subr.bf16.mxu1 %v7633_v57 }
0x126e   : > { %5506 = vmatpush2.bf16.msra.mxu1 %v7631_v58  ;;  %v7690_v58 = vld [vmem:[#allocation9 + $0x874] ss:$8 sps:$4 sm:$0xff]  }
0x126f   : > { %5507 = vmatprep.subr.bf16.mxu1 %v7636_v32 }
0x1272   : > { %5508 = vmatpush2.bf16.msra.mxu1 %v7634_v60 }
0x1273   : > { %5509 = vmatprep.subr.bf16.mxu1 %v7639_v59  ;;  %v5811_v59 = vld [vmem:[#allocation10 + $0x110] sm:$0xf] }
0x1276   : > { %5510 = vmatpush2.bf16.msra.mxu1 %v7637_v61  ;;  %v7688_v61 = vld [vmem:[#allocation9 + $0x870] ss:$8 sps:$4 sm:$0xff]  }
0x1279   : > { %5512 = vmatmul.mubr.bf16.vlgmr.msra.gmra.mxu1 %v8436_v8 }
0x127a   : > { %5855 = vmatprep.mubr.bf16.mxu1 %v7954_v24 }
0x12f9   : > { %v5277_v35 = vpop.f32.mrf.mxu1 }
0x12fa   : > { %v8501_v62 = vadd.f32 %v5277_v35, %v8489_v16  ;;  %v7645_v16 = vld [vmem:[#allocation9 + $0x764] ss:$8 sps:$4 sm:$0xff]  }
0x12fb   : > { %v5279_v63 = vpop.f32.mrf.mxu1  ;;  %v7693_v35 = vld [vmem:[#allocation9 + $0x864] ss:$8 sps:$4 sm:$0xff]  }
0x12fc   : > { %v8504_v1 = vadd.f32 %v5279_v63, %v8492_v18  ;;  %v7648_v18 = vld [vmem:[#allocation9 + $0x754] ss:$8 sps:$4 sm:$0xff]  }
0x12fd   : > { %v5281_v2 = vpop.f32.mrf.mxu1  ;;  %v7696_v63 = vld [vmem:[#allocation9 + $0x854] ss:$8 sps:$4 sm:$0xff]  }
0x12fe   : > { %v7699_v2 = vld [vmem:[#allocation9 + $0x844] ss:$8 sps:$4 sm:$0xff]  }
0x12ff   : > { %v5282_v3 = vpop.f32.mrf.mxu1 }
0x1300   : > { %v7697_v3 = vld [vmem:[#allocation9 + $0x840] ss:$8 sps:$4 sm:$0xff]  }
0x1339   : > { %v5513_v4 = vpop.f32.mrf.mxu1 }
0x133a   : > { %v5522_v5 = vpack.c.bf16 %v5513_v4, %v5513_v4  ;;  %v7702_v4 = vld [vmem:[#allocation9 + $0x834] ss:$8 sps:$4 sm:$0xff]  }
0x133b   : > { %v5515_v7 = vpop.f32.mrf.mxu1 }
0x133c   : > { %v5523_v9 = vpack.c.bf16 %v5515_v7, %v5515_v7  ;;  %v5528_v12 = vsel %vm2418_vm3, %v5522_v5, 0  ;;  %v7700_v5 = vld [vmem:[#allocation9 + $0x830] ss:$8 sps:$4 sm:$0xff]   ;;  %v7705_v7 = vld [vmem:[#allocation9 + $0x824] ss:$8 sps:$4 sm:$0xff]  }
0x133d   : > { %v5517_v11 = vpop.f32.mrf.mxu1 }
0x133e   : > { %6706 = vmatprep.subr.msk.bf16.mxu0 %vm2418_vm3, %v5523_v9  ;;  %v7703_v9 = vld [vmem:[#allocation9 + $0x820] ss:$8 sps:$4 sm:$0xff]   ;;  %v7711_v11 = vld [vmem:[#allocation9 + $0x804] ss:$8 sps:$4 sm:$0xff]  }
0x133f   : > { %v5518_v13 = vpop.f32.mrf.mxu1  ;;  %5548 = vmatpush1.bf16.msra.mxu0 %v5528_v12  ;;  %v7709_v12 = vld [vmem:[#allocation9 + $0x800] ss:$8 sps:$4 sm:$0xff]  }
0x1340   : > { %5769 = vmatprep.subr.bf16.mxu0 %v7642_v10  ;;  %v7708_v10 = vld [vmem:[#allocation9 + $0x814] ss:$8 sps:$4 sm:$0xff]  }
0x1341   : > { %v7714_v13 = vld [vmem:[#allocation9 + $0x8f4] ss:$8 sps:$4 sm:$0xff]  }
0x1342   : > { %6707 = vmatmul.mubr.msk.bf16.vlgmr.msra.gmra.mxu0 %vm2414_vm4, %v5521_v14  ;;  %v7712_v14 = vld [vmem:[#allocation9 + $0x8f0] ss:$8 sps:$4 sm:$0xff]  }
0x1343   : > { %5770 = vmatpush1.bf16.msra.mxu0 %v7640_v15  ;;  %5801 = vmatprep.mubr.bf16.mxu0 %v8434_v6  ;;  %v7717_v15 = vld [vmem:[#allocation9 + $0x8e4] ss:$8 sps:$4 sm:$0xff]  }
0x1344   : > { %5771 = vmatprep.subr.bf16.mxu0 %v7645_v16  ;;  %v7715_v16 = vld [vmem:[#allocation9 + $0x8e0] ss:$8 sps:$4 sm:$0xff]  }
0x1347   : > { %5772 = vmatpush1.bf16.msra.mxu0 %v7643_v17  ;;  %v7720_v17 = vld [vmem:[#allocation9 + $0x8d4] ss:$8 sps:$4 sm:$0xff]  }
0x1348   : > { %5773 = vmatprep.subr.bf16.mxu0 %v7648_v18  ;;  %v7718_v18 = vld [vmem:[#allocation9 + $0x8d0] ss:$8 sps:$4 sm:$0xff]  }
0x134b   : > { %5774 = vmatpush1.bf16.msra.mxu0 %v7646_v19  ;;  %v7723_v19 = vld [vmem:[#allocation9 + $0x8c4] ss:$8 sps:$4 sm:$0xff]  }
0x134c   : > { %5775 = vmatprep.subr.bf16.mxu0 %v7651_v20  ;;  %v7721_v20 = vld [vmem:[#allocation9 + $0x8c0] ss:$8 sps:$4 sm:$0xff]  }
0x134f   : > { %5776 = vmatpush1.bf16.msra.mxu0 %v7649_v0  ;;  %v7726_v0 = vld [vmem:[#allocation9 + $0x8b4] ss:$8 sps:$4 sm:$0xff]  }
0x1350   : > { %5777 = vmatprep.subr.bf16.mxu0 %v7654_v21  ;;  %v7724_v21 = vld [vmem:[#allocation9 + $0x8b0] ss:$8 sps:$4 sm:$0xff]  }
0x1353   : > { %5778 = vmatpush1.bf16.msra.mxu0 %v7652_v22  ;;  %v7729_v22 = vld [vmem:[#allocation9 + $0x8a4] ss:$8 sps:$4 sm:$0xff]  }
0x1354   : > { %5779 = vmatprep.subr.bf16.mxu0 %v7657_v23  ;;  %v7727_v23 = vld [vmem:[#allocation9 + $0x8a0] ss:$8 sps:$4 sm:$0xff]  }
0x1357   : > { %5780 = vmatpush1.bf16.msra.mxu0 %v7655_v25  ;;  %v7732_v25 = vld [vmem:[#allocation9 + $0x894] ss:$8 sps:$4 sm:$0xff]  }
0x1358   : > { %5781 = vmatprep.subr.bf16.mxu0 %v7660_v26  ;;  %v7730_v26 = vld [vmem:[#allocation9 + $0x890] ss:$8 sps:$4 sm:$0xff]  }
0x135b   : > { %5782 = vmatpush1.bf16.msra.mxu0 %v7658_v27  ;;  %v7735_v27 = vld [vmem:[#allocation9 + $0x884] ss:$8 sps:$4 sm:$0xff]  }
0x135c   : > { %5783 = vmatprep.subr.bf16.mxu0 %v7663_v28  ;;  %v7733_v28 = vld [vmem:[#allocation9 + $0x880] ss:$8 sps:$4 sm:$0xff]  }
0x135f   : > { %5784 = vmatpush1.bf16.msra.mxu0 %v7661_v30 }
0x1360   : > { %5785 = vmatprep.subr.bf16.mxu0 %v7666_v31 }
0x1363   : > { %5786 = vmatpush2.bf16.msra.mxu0 %v7664_v33 }
0x1364   : > { %5787 = vmatprep.subr.bf16.mxu0 %v7669_v34 }
0x1367   : > { %5788 = vmatpush2.bf16.msra.mxu0 %v7667_v36 }
0x1368   : > { %5789 = vmatprep.subr.bf16.mxu0 %v7672_v37 }
0x136b   : > { %5790 = vmatpush2.bf16.msra.mxu0 %v7670_v38 }
0x136c   : > { %5791 = vmatprep.subr.bf16.mxu0 %v7675_v39 }
0x136f   : > { %5792 = vmatpush2.bf16.msra.mxu0 %v7673_v40 }
0x1370   : > { %5793 = vmatprep.subr.bf16.mxu0 %v7678_v41 }
0x1373   : > { %5794 = vmatpush2.bf16.msra.mxu0 %v7676_v42 }
0x1374   : > { %5795 = vmatprep.subr.bf16.mxu0 %v7681_v43 }
0x1377   : > { %5796 = vmatpush2.bf16.msra.mxu0 %v7679_v44  ;;  %v6101_v44 = vld [vmem:[#allocation10 + $0x118] sm:$0xf] }
0x1378   : > { %5797 = vmatprep.subr.bf16.mxu0 %v7684_v45 }
0x137b   : > { %5798 = vmatpush2.bf16.msra.mxu0 %v7682_v46 }
0x137c   : > { %5799 = vmatprep.subr.bf16.mxu0 %v7687_v47 }
0x137f   : > { %5800 = vmatpush2.bf16.msra.mxu0 %v7685_v48 }
0x1382   : > { %5802 = vmatmul.mubr.bf16.vlgmr.msra.gmra.mxu0 %v8436_v8 }
0x1383   : > { %6145 = vmatprep.mubr.bf16.mxu0 %v7954_v24 }
0x1402   : > { %v5567_v49 = vpop.f32.mrf.mxu0 }
0x1403   : > { %v8513_v50 = vadd.f32 %v5567_v49, %v8501_v62  ;;  %v7691_v62 = vld [vmem:[#allocation9 + $0x860] ss:$8 sps:$4 sm:$0xff]   ;;  %v6161_v49 = vpop.permute.xlu0 %6160 }
0x1404   : > { %v5569_v51 = vpop.f32.mrf.mxu0 }
0x1405   : > { %v8516_v52 = vadd.f32 %v5569_v51, %v8504_v1  ;;  %v7694_v1 = vld [vmem:[#allocation9 + $0x850] ss:$8 sps:$4 sm:$0xff]  }
0x1406   : > { %v5571_v53 = vpop.f32.mrf.mxu0 }
0x1408   : > { %v5572_v54 = vpop.f32.mrf.mxu0 }
0x1442   : > { %v5803_v55 = vpop.f32.mrf.mxu0 }
0x1443   : > { %v5812_v29 = vpack.c.bf16 %v5803_v55, %v5803_v55 }
0x1444   : > { %v5805_v56 = vpop.f32.mrf.mxu0 }
0x1445   : > { %v5813_v57 = vpack.c.bf16 %v5805_v56, %v5805_v56  ;;  %v5818_v60 = vsel %vm2418_vm3, %v5812_v29, 0 }
0x1446   : > { %v5807_v32 = vpop.f32.mrf.mxu0 }
0x1447   : > { %6740 = vmatprep.subr.msk.bf16.mxu1 %vm2418_vm3, %v5813_v57 }
0x1448   : > { %v5808_v24 = vpop.f32.mrf.mxu0  ;;  %5838 = vmatpush1.bf16.msra.mxu1 %v5818_v60 }
0x1449   : > { %6059 = vmatprep.subr.bf16.mxu1 %v7690_v58 }
0x144b   : > { %6741 = vmatmul.mubr.msk.bf16.vlgmr.msra.gmra.mxu1 %vm2414_vm4, %v5811_v59 }
0x144c   : > { %6060 = vmatpush1.bf16.msra.mxu1 %v7688_v61  ;;  %6091 = vmatprep.mubr.bf16.mxu1 %v8434_v6  ;;  %v7706_v6 = vld [vmem:[#allocation9 + $0x810] ss:$8 sps:$4 sm:$0xff]  }
0x144d   : > { %6061 = vmatprep.subr.bf16.mxu1 %v7693_v35 }
0x1450   : > { %6062 = vmatpush1.bf16.msra.mxu1 %v7691_v62 }
0x1451   : > { %6063 = vmatprep.subr.bf16.mxu1 %v7696_v63 }
0x1454   : > { %6064 = vmatpush1.bf16.msra.mxu1 %v7694_v1 }
0x1455   : > { %6065 = vmatprep.subr.bf16.mxu1 %v7699_v2 }
0x1458   : > { %6066 = vmatpush1.bf16.msra.mxu1 %v7697_v3 }
0x1459   : > { %6067 = vmatprep.subr.bf16.mxu1 %v7702_v4 }
0x145c   : > { %6068 = vmatpush1.bf16.msra.mxu1 %v7700_v5 }
0x145d   : > { %6069 = vmatprep.subr.bf16.mxu1 %v7705_v7 }
0x1460   : > { %6070 = vmatpush1.bf16.msra.mxu1 %v7703_v9 }
0x1461   : > { %6071 = vmatprep.subr.bf16.mxu1 %v7708_v10 }
0x1464   : > { %6072 = vmatpush1.bf16.msra.mxu1 %v7706_v6 }
0x1465   : > { %6073 = vmatprep.subr.bf16.mxu1 %v7711_v11 }
0x1468   : > { %6074 = vmatpush1.bf16.msra.mxu1 %v7709_v12 }
0x1469   : > { %6075 = vmatprep.subr.bf16.mxu1 %v7714_v13 }
0x146c   : > { %6076 = vmatpush2.bf16.msra.mxu1 %v7712_v14 }
0x146d   : > { %6077 = vmatprep.subr.bf16.mxu1 %v7717_v15 }
0x1470   : > { %6078 = vmatpush2.bf16.msra.mxu1 %v7715_v16 }
0x1471   : > { %6079 = vmatprep.subr.bf16.mxu1 %v7720_v17 }
0x1474   : > { %6080 = vmatpush2.bf16.msra.mxu1 %v7718_v18 }
0x1475   : > { %6081 = vmatprep.subr.bf16.mxu1 %v7723_v19 }
0x1478   : > { %6082 = vmatpush2.bf16.msra.mxu1 %v7721_v20 }
0x1479   : > { %6083 = vmatprep.subr.bf16.mxu1 %v7726_v0 }
0x147c   : > { %6084 = vmatpush2.bf16.msra.mxu1 %v7724_v21 }
0x147d   : > { %6085 = vmatprep.subr.bf16.mxu1 %v7729_v22 }
0x1480   : > { %6086 = vmatpush2.bf16.msra.mxu1 %v7727_v23 }
0x1481   : > { %6087 = vmatprep.subr.bf16.mxu1 %v7732_v25 }
0x1484   : > { %6088 = vmatpush2.bf16.msra.mxu1 %v7730_v26 }
0x1485   : > { %6089 = vmatprep.subr.bf16.mxu1 %v7735_v27 }
0x1488   : > { %6090 = vmatpush2.bf16.msra.mxu1 %v7733_v28 }
0x148b   : > { %6092 = vmatmul.mubr.bf16.vlgmr.msra.gmra.mxu1 %v8436_v8 }
0x150b   : > { %v5857_v30 = vpop.f32.mrf.mxu1 }
0x150c   : > { %v5864_v31 = vadd.f32 %v5857_v30, %v8513_v50 }
0x150d   : > { %v5859_v33 = vpop.f32.mrf.mxu1 }
0x150e   : > { %v5865_v34 = vadd.f32 %v5859_v33, %v8516_v52 }
0x150f   : > { %v5861_v36 = vpop.f32.mrf.mxu1 }
0x1511   : > { %v5862_v37 = vpop.f32.mrf.mxu1 }
0x154b   : > { %v6093_v38 = vpop.f32.mrf.mxu1 }
0x154c   : > { %v6102_v39 = vpack.c.bf16 %v6093_v38, %v6093_v38 }
0x154d   : > { %v6095_v40 = vpop.f32.mrf.mxu1 }
0x154e   : > { %v6103_v41 = vpack.c.bf16 %v6095_v40, %v6095_v40  ;;  %v6108_v43 = vsel %vm2418_vm3, %v6102_v39, 0 }
0x154f   : > { %v6097_v42 = vpop.f32.mrf.mxu1 }
0x1550   : > { %6774 = vmatprep.subr.msk.bf16.mxu0 %vm2418_vm3, %v6103_v41 }
0x1551   : > { %v6098_v8 = vpop.f32.mrf.mxu1  ;;  %6128 = vmatpush1.bf16.msra.mxu0 %v6108_v43 }
0x1554   : > { %6775 = vmatmul.mubr.msk.bf16.vlgmr.msra.gmra.mxu0 %vm2414_vm4, %v6101_v44 }
0x1614   : > { %v6147_v45 = vpop.f32.mrf.mxu0 }
0x1615   : > { %v6154_v46 = vadd.f32 %v6147_v45, %v5864_v31 }
0x1616   : > { %v6149_v47 = vpop.f32.mrf.mxu0 }
0x1617   : > { %v6155_v48 = vadd.f32 %v6149_v47, %v5865_v34  ;;  %v6163_v51 = vadd.f32 %v6161_v49, %v6154_v46 }
0x1618   : > { %v6151_v50 = vpop.f32.mrf.mxu0 }
0x1619   : > { %v6164_v52 = vadd.f32 %v6161_v49, %v6155_v48 }
0x161a   : > { %v6152_v53 = vpop.f32.mrf.mxu0 }
0x161b   : > { %v6167_v54 = vcombine.low %v6163_v51, %v6164_v52 }
0x161d   : > { %6169 = vst [vmem:[%s371_s24] sm:$0x77] %v6167_v54 }
0x161e PF: > { %p20_p0 = scmp.ge.s32.totalorder %s8100_s11, 4   ;;  %s8570_s24 = smov %s7932_s25 }
0x161f   : > { %s8571_s25 = smov %s7936_s26  ;;  %s8572_s26 = smov %s8111_s22 }
0x1620   : > { %s8573_s27 = smov %s8100_s11  ;;  %22 = sbr.rel (!%p20_p0) target bundleno = 6 (0x6), region = 178 }
0x1625   :  { %6191 = vsyncpa [#allocation3], 1 }
0x1626   :  { %6193 = vsyncpa [#allocation3 + $0x1], 1 }
0x1627   :  { %6194 = vsyncpa [#allocation5], 1 }
0x1628   :  { %6195 = vsyncpa [#allocation8], 1 }
0x1629   :  { %6196 = vsyncpa [#allocation11], 1 }

</bundles_post_ra>
